<compile_context>
chip_gen: v6e
topology: v6e:2x2x1
jax: 0.10.0
libtpu: 0.0.40
codegen_flags: <defaults>
</compile_context>

<pallas_src>
import math

import jax
import jax.numpy as jnp
from jax import lax
from jax.experimental import pallas as pl
from jax.experimental.pallas import tpu as pltpu


def _lstm_mean_kernel(x_ref,                        # (Tc*Bp, Dp) bf16, time-major chunk
                      wih0_ref, whh0_ref, b0_ref,   # (Dp,4Hp)bf16 (Hp,4Hp)bf16 (1,4Hp)f32
                      wih1_ref, whh1_ref, b1_ref,   # (Hp,4Hp)bf16 (Hp,4Hp)bf16 (1,4Hp)f32
                      out_ref, hn_ref, cn_ref,      # (Bp,Hp) (2,Bp,Hp) (2,Bp,Hp) f32
                      xg0_ref,                      # scratch (Tc*Bp, 4Hp) f32
                      h0_ref, c0_ref, h1_ref, c1_ref, acc_ref):  # scratch (Bp,Hp) f32
    Bp, Hp = out_ref.shape
    Tc = x_ref.shape[0] // Bp
    t_chunk = pl.program_id(0)
    n_chunks = pl.num_programs(0)

    @pl.when(t_chunk == 0)
    def _():
        zeros = jnp.zeros((Bp, Hp), jnp.float32)
        h0_ref[...] = zeros
        c0_ref[...] = zeros
        h1_ref[...] = zeros
        c1_ref[...] = zeros
        acc_ref[...] = zeros

    # Hoisted layer-0 input projection for this chunk: one large MXU-efficient
    # bf16 matmul (f32 accumulation) with the bias folded in, stored to VMEM
    # scratch and read back per step inside the recurrence.
    xg0_ref[...] = (jnp.dot(x_ref[...], wih0_ref[...],
                            preferred_element_type=jnp.float32)
                    + b0_ref[...])

    # Hoisted bias broadcast (only 4 vregs; JAX does not CSE broadcast_in_dim
    # inside loops, so do it once here).
    b1b = jnp.broadcast_to(b1_ref[...], (Bp, 4 * Hp))

    def gate_act(gates, c):
        # Gate blocks are laid out [i | f | o | g] (reordered in the wrapper):
        # one tanh-form sigmoid over the 3 contiguous sigmoid gates + one tanh
        # for the candidate gate.  Hp is a multiple of 128 -> lane-aligned slices.
        sig = 0.5 * jnp.tanh(0.5 * gates[:, :3 * Hp]) + 0.5
        g = jnp.tanh(gates[:, 3 * Hp:])
        i = sig[:, 0 * Hp:1 * Hp]
        f = sig[:, 1 * Hp:2 * Hp]
        o = sig[:, 2 * Hp:3 * Hp]
        c_new = f * c + i * g
        h_new = o * jnp.tanh(c_new)
        return h_new, c_new

    def step(t, carry):
        h0, c0, h1, c1, acc = carry
        row = pl.multiple_of(t * Bp, Bp)
        # Layer 0: only the recurrent matmul is on the serial critical path.
        # Weights are re-read from VMEM each step (no large SSA values live
        # across the unrolled loop -> no vreg spills).
        g0 = xg0_ref[pl.ds(row, Bp), :] + jnp.dot(
            h0.astype(jnp.bfloat16), whh0_ref[...],
            preferred_element_type=jnp.float32)
        h0, c0 = gate_act(g0, c0)
        # Layer 1: two dots instead of concat([h0,h1]) @ W1 (avoids a per-step
        # (Bp, 2Hp) VMEM copy; MXU has plenty of slack for the extra push).
        g1 = (jnp.dot(h0.astype(jnp.bfloat16), wih1_ref[...],
                      preferred_element_type=jnp.float32)
              + jnp.dot(h1.astype(jnp.bfloat16), whh1_ref[...],
                        preferred_element_type=jnp.float32)
              + b1b)
        h1, c1 = gate_act(g1, c1)
        return (h0, c0, h1, c1, acc + h1)

    carry0 = (h0_ref[...], c0_ref[...], h1_ref[...], c1_ref[...], acc_ref[...])
    # Unrolled only within the (bounded) chunk: gives the scheduler the ~2-deep
    # visibility needed to overlap layer-1(t) with layer-0(t+1).
    h0, c0, h1, c1, acc = lax.fori_loop(0, Tc, step, carry0, unroll=True)

    h0_ref[...] = h0
    c0_ref[...] = c0
    h1_ref[...] = h1
    c1_ref[...] = c1
    acc_ref[...] = acc

    @pl.when(t_chunk == n_chunks - 1)
    def _():
        total_t = jnp.float32(Tc * n_chunks)
        out_ref[...] = acc * (1.0 / total_t)       # mean over time, top layer
        hn_ref[0] = h0
        hn_ref[1] = h1
        cn_ref[0] = c0
        cn_ref[1] = c1


def _round_up(x, m):
    return ((x + m - 1) // m) * m


def _prep_gate_cols(w, H, Hp):
    """(in_dim, 4H) in PyTorch gate order [i,f,g,o] -> (in_dim, 4*Hp) with the
    gate blocks reordered to [i,f,o,g] and each block zero-padded to Hp lanes."""
    blocks = [w[:, g * H:(g + 1) * H] for g in range(4)]        # i, f, g, o
    parts = [jnp.pad(blocks[g], ((0, 0), (0, Hp - H))) for g in (0, 1, 3, 2)]
    return jnp.concatenate(parts, axis=-1)


def _pick_time_chunk(T, Bp, Dp, Hp, max_unroll=16, budget_bytes=12 * 2 ** 20):
    """Largest divisor of T that is <= max_unroll and whose per-chunk
    activations (double-buffered bf16 x chunk + f32 xg0 scratch) fit budget."""
    best = 1
    for tc in range(1, min(T, max_unroll) + 1):
        if T % tc:
            continue
        per_chunk = tc * Bp * (2 * 2 * Dp + 4 * 4 * Hp)
        if per_chunk <= budget_bytes:
            best = tc
    return best


@jax.jit
def rnn_forward(x, params):
    """x: (B, T, D) float32 (PyTorch batch_first). Returns (out, (h_n, c_n))."""
    B, T, D = x.shape
    H = params["whh0"].shape[0]

    Bp = _round_up(max(B, 8), 8)        # sublane alignment
    Dp = _round_up(D, 128)              # lane alignment of input features
    Hp = _round_up(H, 128)              # lane alignment of hidden / gate blocks

    Tc = _pick_time_chunk(T, Bp, Dp, Hp)
    n_chunks = T // Tc

    # Time-major, padded, flattened activations, bf16 MXU operand: (T*Bp, Dp).
    x_tm = jnp.transpose(x, (1, 0, 2))
    x_tm = jnp.pad(x_tm, ((0, 0), (0, Bp - B), (0, Dp - D)))
    x2d = x_tm.reshape(T * Bp, Dp).astype(jnp.bfloat16)

    # Padded, gate-reordered weights in bf16 (zero padding keeps padded lanes
    # of h/c at exactly zero); biases stay f32 and are added post-accumulation.
    wih0 = jnp.pad(_prep_gate_cols(params["wih0"], H, Hp),
                   ((0, Dp - D), (0, 0))).astype(jnp.bfloat16)
    whh0 = jnp.pad(_prep_gate_cols(params["whh0"], H, Hp),
                   ((0, Hp - H), (0, 0))).astype(jnp.bfloat16)
    b0 = _prep_gate_cols(params["b0"], H, Hp)
    wih1 = jnp.pad(_prep_gate_cols(params["wih1"], H, Hp),
                   ((0, Hp - H), (0, 0))).astype(jnp.bfloat16)
    whh1 = jnp.pad(_prep_gate_cols(params["whh1"], H, Hp),
                   ((0, Hp - H), (0, 0))).astype(jnp.bfloat16)
    b1 = _prep_gate_cols(params["b1"], H, Hp)

    # VMEM budget estimate (double-buffered inputs/outputs + scratch).
    vmem_bytes = (2 * Tc * Bp * Dp * 2                 # x chunk (bf16, 2 bufs)
                  + 2 * (Dp + 3 * Hp) * 4 * Hp * 2     # weights (bf16, 2 bufs)
                  + 2 * 2 * 4 * Hp * 4                 # biases (f32)
                  + 2 * 5 * Bp * Hp * 4                # out + h_n + c_n (f32)
                  + Tc * Bp * 4 * Hp * 4               # xg0 scratch (f32)
                  + 5 * Bp * Hp * 4)                   # state scratch (f32)
    vmem_limit = int(min(48 * 2 ** 20, max(16 * 2 ** 20, 2 * vmem_bytes)))

    grid_spec = pltpu.PrefetchScalarGridSpec(
        num_scalar_prefetch=0,
        grid=(n_chunks,),
        in_specs=[
            pl.BlockSpec((Tc * Bp, Dp), lambda t: (t, 0)),      # x: streamed by chunk
            pl.BlockSpec((Dp, 4 * Hp), lambda t: (0, 0)),       # wih0 (resident)
            pl.BlockSpec((Hp, 4 * Hp), lambda t: (0, 0)),       # whh0
            pl.BlockSpec((1, 4 * Hp), lambda t: (0, 0)),        # b0
            pl.BlockSpec((Hp, 4 * Hp), lambda t: (0, 0)),       # wih1
            pl.BlockSpec((Hp, 4 * Hp), lambda t: (0, 0)),       # whh1
            pl.BlockSpec((1, 4 * Hp), lambda t: (0, 0)),        # b1
        ],
        out_specs=(
            pl.BlockSpec((Bp, Hp), lambda t: (0, 0)),           # mean output
            pl.BlockSpec((2, Bp, Hp), lambda t: (0, 0, 0)),     # h_n
            pl.BlockSpec((2, Bp, Hp), lambda t: (0, 0, 0)),     # c_n
        ),
        scratch_shapes=[
            pltpu.VMEM((Tc * Bp, 4 * Hp), jnp.float32),         # xg0 (per chunk)
            pltpu.VMEM((Bp, Hp), jnp.float32),                  # h0
            pltpu.VMEM((Bp, Hp), jnp.float32),                  # c0
            pltpu.VMEM((Bp, Hp), jnp.float32),                  # h1
            pltpu.VMEM((Bp, Hp), jnp.float32),                  # c1
            pltpu.VMEM((Bp, Hp), jnp.float32),                  # acc (mean)
        ],
    )

    out, hn, cn = pl.pallas_call(
        _lstm_mean_kernel,
        out_shape=(
            jax.ShapeDtypeStruct((Bp, Hp), jnp.float32),
            jax.ShapeDtypeStruct((2, Bp, Hp), jnp.float32),
            jax.ShapeDtypeStruct((2, Bp, Hp), jnp.float32),
        ),
        grid_spec=grid_spec,
        compiler_params=pltpu.CompilerParams(
            dimension_semantics=("arbitrary",),                 # time is sequential
            vmem_limit_bytes=vmem_limit),
    )(x2d, wih0, whh0, b0, wih1, whh1, b1)

    # Strip padding so shapes/semantics match the PyTorch module exactly.
    return out[:B, :H], (hn[:, :B, :H], cn[:, :B, :H])


def init_params(key, input_size, hidden_size):
    """Deterministic init mimicking PyTorch LSTM's U(-1/sqrt(H), 1/sqrt(H))."""
    H = hidden_size
    k = 1.0 / math.sqrt(H)
    ks = jax.random.split(key, 8)

    def u(k_, shape):
        return jax.random.uniform(k_, shape, jnp.float32, minval=-k, maxval=k)

    # Stored already transposed: (in_dim, 4H) / (H, 4H); biases combined (ih + hh).
    return {
        "wih0": u(ks[0], (input_size, 4 * H)),
        "whh0": u(ks[1], (H, 4 * H)),
        "b0": (u(ks[2], (1, 4 * H)) + u(ks[3], (1, 4 * H))),
        "wih1": u(ks[4], (H, 4 * H)),
        "whh1": u(ks[5], (H, 4 * H)),
        "b1": (u(ks[6], (1, 4 * H)) + u(ks[7], (1, 4 * H))),
    }


def rnn_forward_ref(x, params):
    """Pure-JAX f32 reference of the same stacked LSTM (PyTorch gate order)."""
    B, T, D = x.shape
    H = params["whh0"].shape[0]

    def cell(xt, h, c, wih, whh, b):
        g = xt @ wih + h @ whh + b
        i = jax.nn.sigmoid(g[:, 0:H])
        f = jax.nn.sigmoid(g[:, H:2 * H])
        gg = jnp.tanh(g[:, 2 * H:3 * H])
        o = jax.nn.sigmoid(g[:, 3 * H:4 * H])
        c = f * c + i * gg
        h = o * jnp.tanh(c)
        return h, c

    h0 = c0 = h1 = c1 = jnp.zeros((B, H), jnp.float32)
    outs = []
    for t in range(T):
        h0, c0 = cell(x[:, t, :], h0, c0, params["wih0"], params["whh0"], params["b0"])
        h1, c1 = cell(h0, h1, c1, params["wih1"], params["whh1"], params["b1"])
        outs.append(h1)
    rnn_out = jnp.stack(outs, axis=1)                     # (B, T, H)
    return jnp.mean(rnn_out, axis=1), (jnp.stack([h0, h1]), jnp.stack([c0, c1]))


if __name__ == "__main__":
    # Small shapes consistent with the module's forward: x is (batch, seq, features),
    # hidden_size == input_size == features, num_layers == 2.
    batch, seq, features = 2, 8, 32
    hidden = features

    key = jax.random.PRNGKey(0)
    k_x, k_p = jax.random.split(key)
    x = jax.random.normal(k_x, (batch, seq, features), jnp.float32)
    params = init_params(k_p, features, hidden)

    out, (h_n, c_n) = rnn_forward(x, params)
    jax.block_until_ready((out, h_n, c_n))

    out_ref, (h_ref, c_ref) = rnn_forward_ref(x, params)
    assert out.shape == (batch, hidden)
    assert h_n.shape == (2, batch, hidden) and c_n.shape == (2, batch, hidden)
    # Tolerance relaxed vs. pure-f32: matmul operands are bf16 (f32 accumulate).
    assert jnp.allclose(out, out_ref, atol=2e-2, rtol=2e-2)
    assert jnp.allclose(h_n, h_ref, atol=2e-2, rtol=2e-2)
    assert jnp.allclose(c_n, c_ref, atol=2e-2, rtol=2e-2)

    print("KERNEL_OK")
</pallas_src>

<mosaic_0001>
module attributes {stable_mosaic.version = 11 : i64} {
  func.func @_lstm_mean_kernel(%arg0: i32, %arg1: memref<64x128xbf16, #tpu.memory_space<vmem>>, %arg2: memref<128x512xbf16, #tpu.memory_space<vmem>>, %arg3: memref<128x512xbf16, #tpu.memory_space<vmem>>, %arg4: memref<1x512xf32, #tpu.memory_space<vmem>>, %arg5: memref<128x512xbf16, #tpu.memory_space<vmem>>, %arg6: memref<128x512xbf16, #tpu.memory_space<vmem>>, %arg7: memref<1x512xf32, #tpu.memory_space<vmem>>, %arg8: memref<8x128xf32, #tpu.memory_space<vmem>>, %arg9: memref<2x8x128xf32, #tpu.memory_space<vmem>>, %arg10: memref<2x8x128xf32, #tpu.memory_space<vmem>>, %arg11: memref<64x512xf32, #tpu.memory_space<vmem>>, %arg12: memref<8x128xf32, #tpu.memory_space<vmem>>, %arg13: memref<8x128xf32, #tpu.memory_space<vmem>>, %arg14: memref<8x128xf32, #tpu.memory_space<vmem>>, %arg15: memref<8x128xf32, #tpu.memory_space<vmem>>, %arg16: memref<8x128xf32, #tpu.memory_space<vmem>>) attributes {dimension_semantics = [#tpu.dimension_semantics<arbitrary>], iteration_bounds = array<i64: 1>, scalar_prefetch = 0 : i64, scratch_operands = 6 : i64, tpu.core_type = #tpu.core_type<tc>, window_params = [{transform_indices = @transform_0, window_bounds = array<i64: 64, 128>}, {pipeline_mode = #tpu.pipeline_mode<synchronous>, transform_indices = @transform_1, window_bounds = array<i64: 128, 512>}, {pipeline_mode = #tpu.pipeline_mode<synchronous>, transform_indices = @transform_2, window_bounds = array<i64: 128, 512>}, {pipeline_mode = #tpu.pipeline_mode<synchronous>, transform_indices = @transform_3, window_bounds = array<i64: 1, 512>}, {pipeline_mode = #tpu.pipeline_mode<synchronous>, transform_indices = @transform_4, window_bounds = array<i64: 128, 512>}, {pipeline_mode = #tpu.pipeline_mode<synchronous>, transform_indices = @transform_5, window_bounds = array<i64: 128, 512>}, {pipeline_mode = #tpu.pipeline_mode<synchronous>, transform_indices = @transform_6, window_bounds = array<i64: 1, 512>}, {pipeline_mode = #tpu.pipeline_mode<synchronous>, transform_indices = @transform_7, window_bounds = array<i64: 8, 128>}, {pipeline_mode = #tpu.pipeline_mode<synchronous>, transform_indices = @transform_8, window_bounds = array<i64: 2, 8, 128>}, {pipeline_mode = #tpu.pipeline_mode<synchronous>, transform_indices = @transform_9, window_bounds = array<i64: 2, 8, 128>}]} {
    %c0_i32 = arith.constant 0 : i32
    %0 = arith.cmpi eq, %arg0, %c0_i32 : i32
    %1 = arith.extui %0 : i1 to i32
    %c0_i32_0 = arith.constant 0 : i32
    %2 = arith.cmpi ne, %1, %c0_i32_0 : i32
    scf.if %2 {
      %cst_169 = arith.constant 0.000000e+00 : f32
      %450 = vector.broadcast %cst_169 : f32 to vector<8x128xf32>
      %c0_170 = arith.constant 0 : index
      %c0_171 = arith.constant 0 : index
      %451 = vector.load %arg12[%c0_170, %c0_171] : memref<8x128xf32, #tpu.memory_space<vmem>>, vector<8x128xf32>
      tpu.vector_store %arg12[%c0_170, %c0_171], %450 {strides = array<i32>} : memref<8x128xf32, #tpu.memory_space<vmem>>, vector<8x128xf32>,
      %c0_172 = arith.constant 0 : index
      %c0_173 = arith.constant 0 : index
      %452 = vector.load %arg13[%c0_172, %c0_173] : memref<8x128xf32, #tpu.memory_space<vmem>>, vector<8x128xf32>
      tpu.vector_store %arg13[%c0_172, %c0_173], %450 {strides = array<i32>} : memref<8x128xf32, #tpu.memory_space<vmem>>, vector<8x128xf32>,
      %c0_174 = arith.constant 0 : index
      %c0_175 = arith.constant 0 : index
      %453 = vector.load %arg14[%c0_174, %c0_175] : memref<8x128xf32, #tpu.memory_space<vmem>>, vector<8x128xf32>
      tpu.vector_store %arg14[%c0_174, %c0_175], %450 {strides = array<i32>} : memref<8x128xf32, #tpu.memory_space<vmem>>, vector<8x128xf32>,
      %c0_176 = arith.constant 0 : index
      %c0_177 = arith.constant 0 : index
      %454 = vector.load %arg15[%c0_176, %c0_177] : memref<8x128xf32, #tpu.memory_space<vmem>>, vector<8x128xf32>
      tpu.vector_store %arg15[%c0_176, %c0_177], %450 {strides = array<i32>} : memref<8x128xf32, #tpu.memory_space<vmem>>, vector<8x128xf32>,
      %c0_178 = arith.constant 0 : index
      %c0_179 = arith.constant 0 : index
      %455 = vector.load %arg16[%c0_178, %c0_179] : memref<8x128xf32, #tpu.memory_space<vmem>>, vector<8x128xf32>
      tpu.vector_store %arg16[%c0_178, %c0_179], %450 {strides = array<i32>} : memref<8x128xf32, #tpu.memory_space<vmem>>, vector<8x128xf32>,
    } else {
    }
    %c0 = arith.constant 0 : index
    %c0_1 = arith.constant 0 : index
    %3 = vector.load %arg1[%c0, %c0_1] : memref<64x128xbf16, #tpu.memory_space<vmem>>, vector<64x128xbf16>
    %c0_2 = arith.constant 0 : index
    %c0_3 = arith.constant 0 : index
    %4 = vector.load %arg2[%c0_2, %c0_3] : memref<128x512xbf16, #tpu.memory_space<vmem>>, vector<128x512xbf16>
    %cst = arith.constant dense<0.000000e+00> : vector<64x512xf32>
    %5 = tpu.matmul %3, %4, %cst {dimension_numbers = #tpu.dot_dimension_numbers<[1], [0], [0], [1], [0, 0, 1, 1], [], []>} : vector<64x128xbf16>, vector<128x512xbf16>, vector<64x512xf32> -> vector<64x512xf32>
    %c0_4 = arith.constant 0 : index
    %c0_5 = arith.constant 0 : index
    %6 = vector.load %arg4[%c0_4, %c0_5] : memref<1x512xf32, #tpu.memory_space<vmem>>, vector<1x512xf32>
    %7 = vector.broadcast %6 : vector<1x512xf32> to vector<64x512xf32>
    %8 = arith.addf %5, %7 : vector<64x512xf32>
    %c0_6 = arith.constant 0 : index
    %c0_7 = arith.constant 0 : index
    %9 = vector.load %arg11[%c0_6, %c0_7] : memref<64x512xf32, #tpu.memory_space<vmem>>, vector<64x512xf32>
    tpu.vector_store %arg11[%c0_6, %c0_7], %8 {strides = array<i32>} : memref<64x512xf32, #tpu.memory_space<vmem>>, vector<64x512xf32>,
    %c0_8 = arith.constant 0 : index
    %c0_9 = arith.constant 0 : index
    %10 = vector.load %arg7[%c0_8, %c0_9] : memref<1x512xf32, #tpu.memory_space<vmem>>, vector<1x512xf32>
    %11 = vector.shape_cast %10 : vector<1x512xf32> to vector<1x512xf32>
    %12 = vector.broadcast %11 : vector<1x512xf32> to vector<8x512xf32>
    %c0_10 = arith.constant 0 : index
    %c0_11 = arith.constant 0 : index
    %13 = vector.load %arg12[%c0_10, %c0_11] : memref<8x128xf32, #tpu.memory_space<vmem>>, vector<8x128xf32>
    %c0_12 = arith.constant 0 : index
    %c0_13 = arith.constant 0 : index
    %14 = vector.load %arg13[%c0_12, %c0_13] : memref<8x128xf32, #tpu.memory_space<vmem>>, vector<8x128xf32>
    %c0_14 = arith.constant 0 : index
    %c0_15 = arith.constant 0 : index
    %15 = vector.load %arg14[%c0_14, %c0_15] : memref<8x128xf32, #tpu.memory_space<vmem>>, vector<8x128xf32>
    %c0_16 = arith.constant 0 : index
    %c0_17 = arith.constant 0 : index
    %16 = vector.load %arg15[%c0_16, %c0_17] : memref<8x128xf32, #tpu.memory_space<vmem>>, vector<8x128xf32>
    %c0_18 = arith.constant 0 : index
    %c0_19 = arith.constant 0 : index
    %17 = vector.load %arg16[%c0_18, %c0_19] : memref<8x128xf32, #tpu.memory_space<vmem>>, vector<8x128xf32>
    %c0_i32_20 = arith.constant 0 : i32
    %c8_i32 = arith.constant 8 : i32
    %18 = arith.muli %c0_i32_20, %c8_i32 : i32
    %19 = tpu.assume_multiple %18, 8 : i32
    %20 = arith.index_cast %19 : i32 to index
    %c0_21 = arith.constant 0 : index
    %21 = vector.load %arg11[%20, %c0_21] : memref<64x512xf32, #tpu.memory_space<vmem>>, vector<8x512xf32>
    %22 = arith.truncf %13 : vector<8x128xf32> to vector<8x128xbf16>
    %c0_22 = arith.constant 0 : index
    %c0_23 = arith.constant 0 : index
    %23 = vector.load %arg3[%c0_22, %c0_23] : memref<128x512xbf16, #tpu.memory_space<vmem>>, vector<128x512xbf16>
    %cst_24 = arith.constant dense<0.000000e+00> : vector<8x512xf32>
    %24 = tpu.matmul %22, %23, %cst_24 {dimension_numbers = #tpu.dot_dimension_numbers<[1], [0], [0], [1], [0, 0, 1, 1], [], []>} : vector<8x128xbf16>, vector<128x512xbf16>, vector<8x512xf32> -> vector<8x512xf32>
    %25 = arith.addf %21, %24 : vector<8x512xf32>
    %26 = vector.extract_strided_slice %25 {offsets = [0, 0], sizes = [8, 384], strides = [1, 1]} : vector<8x512xf32> to vector<8x384xf32>
    %cst_25 = arith.constant 5.000000e-01 : f32
    %27 = vector.broadcast %cst_25 : f32 to vector<8x384xf32>
    %28 = arith.mulf %27, %26 : vector<8x384xf32>
    %29 = math.tanh %28 : vector<8x384xf32>
    %cst_26 = arith.constant 5.000000e-01 : f32
    %30 = vector.broadcast %cst_26 : f32 to vector<8x384xf32>
    %31 = arith.mulf %30, %29 : vector<8x384xf32>
    %cst_27 = arith.constant 5.000000e-01 : f32
    %32 = vector.broadcast %cst_27 : f32 to vector<8x384xf32>
    %33 = arith.addf %31, %32 : vector<8x384xf32>
    %34 = vector.extract_strided_slice %25 {offsets = [0, 384], sizes = [8, 128], strides = [1, 1]} : vector<8x512xf32> to vector<8x128xf32>
    %35 = math.tanh %34 : vector<8x128xf32>
    %36 = vector.extract_strided_slice %33 {offsets = [0, 0], sizes = [8, 128], strides = [1, 1]} : vector<8x384xf32> to vector<8x128xf32>
    %37 = vector.extract_strided_slice %33 {offsets = [0, 128], sizes = [8, 128], strides = [1, 1]} : vector<8x384xf32> to vector<8x128xf32>
    %38 = vector.extract_strided_slice %33 {offsets = [0, 256], sizes = [8, 128], strides = [1, 1]} : vector<8x384xf32> to vector<8x128xf32>
    %39 = arith.mulf %37, %14 : vector<8x128xf32>
    %40 = arith.mulf %36, %35 : vector<8x128xf32>
    %41 = arith.addf %39, %40 : vector<8x128xf32>
    %42 = math.tanh %41 : vector<8x128xf32>
    %43 = arith.mulf %38, %42 : vector<8x128xf32>
    %44 = arith.truncf %43 : vector<8x128xf32> to vector<8x128xbf16>
    %c0_28 = arith.constant 0 : index
    %c0_29 = arith.constant 0 : index
    %45 = vector.load %arg5[%c0_28, %c0_29] : memref<128x512xbf16, #tpu.memory_space<vmem>>, vector<128x512xbf16>
    %cst_30 = arith.constant dense<0.000000e+00> : vector<8x512xf32>
    %46 = tpu.matmul %44, %45, %cst_30 {dimension_numbers = #tpu.dot_dimension_numbers<[1], [0], [0], [1], [0, 0, 1, 1], [], []>} : vector<8x128xbf16>, vector<128x512xbf16>, vector<8x512xf32> -> vector<8x512xf32>
    %47 = arith.truncf %15 : vector<8x128xf32> to vector<8x128xbf16>
    %c0_31 = arith.constant 0 : index
    %c0_32 = arith.constant 0 : index
    %48 = vector.load %arg6[%c0_31, %c0_32] : memref<128x512xbf16, #tpu.memory_space<vmem>>, vector<128x512xbf16>
    %cst_33 = arith.constant dense<0.000000e+00> : vector<8x512xf32>
    %49 = tpu.matmul %47, %48, %cst_33 {dimension_numbers = #tpu.dot_dimension_numbers<[1], [0], [0], [1], [0, 0, 1, 1], [], []>} : vector<8x128xbf16>, vector<128x512xbf16>, vector<8x512xf32> -> vector<8x512xf32>
    %50 = arith.addf %46, %49 : vector<8x512xf32>
    %51 = arith.addf %50, %12 : vector<8x512xf32>
    %52 = vector.extract_strided_slice %51 {offsets = [0, 0], sizes = [8, 384], strides = [1, 1]} : vector<8x512xf32> to vector<8x384xf32>
    %cst_34 = arith.constant 5.000000e-01 : f32
    %53 = vector.broadcast %cst_34 : f32 to vector<8x384xf32>
    %54 = arith.mulf %53, %52 : vector<8x384xf32>
    %55 = math.tanh %54 : vector<8x384xf32>
    %cst_35 = arith.constant 5.000000e-01 : f32
    %56 = vector.broadcast %cst_35 : f32 to vector<8x384xf32>
    %57 = arith.mulf %56, %55 : vector<8x384xf32>
    %cst_36 = arith.constant 5.000000e-01 : f32
    %58 = vector.broadcast %cst_36 : f32 to vector<8x384xf32>
    %59 = arith.addf %57, %58 : vector<8x384xf32>
    %60 = vector.extract_strided_slice %51 {offsets = [0, 384], sizes = [8, 128], strides = [1, 1]} : vector<8x512xf32> to vector<8x128xf32>
    %61 = math.tanh %60 : vector<8x128xf32>
    %62 = vector.extract_strided_slice %59 {offsets = [0, 0], sizes = [8, 128], strides = [1, 1]} : vector<8x384xf32> to vector<8x128xf32>
    %63 = vector.extract_strided_slice %59 {offsets = [0, 128], sizes = [8, 128], strides = [1, 1]} : vector<8x384xf32> to vector<8x128xf32>
    %64 = vector.extract_strided_slice %59 {offsets = [0, 256], sizes = [8, 128], strides = [1, 1]} : vector<8x384xf32> to vector<8x128xf32>
    %65 = arith.mulf %63, %16 : vector<8x128xf32>
    %66 = arith.mulf %62, %61 : vector<8x128xf32>
    %67 = arith.addf %65, %66 : vector<8x128xf32>
    %68 = math.tanh %67 : vector<8x128xf32>
    %69 = arith.mulf %64, %68 : vector<8x128xf32>
    %70 = arith.addf %17, %69 : vector<8x128xf32>
    %c1_i32 = arith.constant 1 : i32
    %c8_i32_37 = arith.constant 8 : i32
    %71 = arith.muli %c1_i32, %c8_i32_37 : i32
    %72 = tpu.assume_multiple %71, 8 : i32
    %73 = arith.index_cast %72 : i32 to index
    %c0_38 = arith.constant 0 : index
    %74 = vector.load %arg11[%73, %c0_38] : memref<64x512xf32, #tpu.memory_space<vmem>>, vector<8x512xf32>
    %75 = arith.truncf %43 : vector<8x128xf32> to vector<8x128xbf16>
    %c0_39 = arith.constant 0 : index
    %c0_40 = arith.constant 0 : index
    %76 = vector.load %arg3[%c0_39, %c0_40] : memref<128x512xbf16, #tpu.memory_space<vmem>>, vector<128x512xbf16>
    %cst_41 = arith.constant dense<0.000000e+00> : vector<8x512xf32>
    %77 = tpu.matmul %75, %76, %cst_41 {dimension_numbers = #tpu.dot_dimension_numbers<[1], [0], [0], [1], [0, 0, 1, 1], [], []>} : vector<8x128xbf16>, vector<128x512xbf16>, vector<8x512xf32> -> vector<8x512xf32>
    %78 = arith.addf %74, %77 : vector<8x512xf32>
    %79 = vector.extract_strided_slice %78 {offsets = [0, 0], sizes = [8, 384], strides = [1, 1]} : vector<8x512xf32> to vector<8x384xf32>
    %cst_42 = arith.constant 5.000000e-01 : f32
    %80 = vector.broadcast %cst_42 : f32 to vector<8x384xf32>
    %81 = arith.mulf %80, %79 : vector<8x384xf32>
    %82 = math.tanh %81 : vector<8x384xf32>
    %cst_43 = arith.constant 5.000000e-01 : f32
    %83 = vector.broadcast %cst_43 : f32 to vector<8x384xf32>
    %84 = arith.mulf %83, %82 : vector<8x384xf32>
    %cst_44 = arith.constant 5.000000e-01 : f32
    %85 = vector.broadcast %cst_44 : f32 to vector<8x384xf32>
    %86 = arith.addf %84, %85 : vector<8x384xf32>
    %87 = vector.extract_strided_slice %78 {offsets = [0, 384], sizes = [8, 128], strides = [1, 1]} : vector<8x512xf32> to vector<8x128xf32>
    %88 = math.tanh %87 : vector<8x128xf32>
    %89 = vector.extract_strided_slice %86 {offsets = [0, 0], sizes = [8, 128], strides = [1, 1]} : vector<8x384xf32> to vector<8x128xf32>
    %90 = vector.extract_strided_slice %86 {offsets = [0, 128], sizes = [8, 128], strides = [1, 1]} : vector<8x384xf32> to vector<8x128xf32>
    %91 = vector.extract_strided_slice %86 {offsets = [0, 256], sizes = [8, 128], strides = [1, 1]} : vector<8x384xf32> to vector<8x128xf32>
    %92 = arith.mulf %90, %41 : vector<8x128xf32>
    %93 = arith.mulf %89, %88 : vector<8x128xf32>
    %94 = arith.addf %92, %93 : vector<8x128xf32>
    %95 = math.tanh %94 : vector<8x128xf32>
    %96 = arith.mulf %91, %95 : vector<8x128xf32>
    %97 = arith.truncf %96 : vector<8x128xf32> to vector<8x128xbf16>
    %c0_45 = arith.constant 0 : index
    %c0_46 = arith.constant 0 : index
    %98 = vector.load %arg5[%c0_45, %c0_46] : memref<128x512xbf16, #tpu.memory_space<vmem>>, vector<128x512xbf16>
    %cst_47 = arith.constant dense<0.000000e+00> : vector<8x512xf32>
    %99 = tpu.matmul %97, %98, %cst_47 {dimension_numbers = #tpu.dot_dimension_numbers<[1], [0], [0], [1], [0, 0, 1, 1], [], []>} : vector<8x128xbf16>, vector<128x512xbf16>, vector<8x512xf32> -> vector<8x512xf32>
    %100 = arith.truncf %69 : vector<8x128xf32> to vector<8x128xbf16>
    %c0_48 = arith.constant 0 : index
    %c0_49 = arith.constant 0 : index
    %101 = vector.load %arg6[%c0_48, %c0_49] : memref<128x512xbf16, #tpu.memory_space<vmem>>, vector<128x512xbf16>
    %cst_50 = arith.constant dense<0.000000e+00> : vector<8x512xf32>
    %102 = tpu.matmul %100, %101, %cst_50 {dimension_numbers = #tpu.dot_dimension_numbers<[1], [0], [0], [1], [0, 0, 1, 1], [], []>} : vector<8x128xbf16>, vector<128x512xbf16>, vector<8x512xf32> -> vector<8x512xf32>
    %103 = arith.addf %99, %102 : vector<8x512xf32>
    %104 = arith.addf %103, %12 : vector<8x512xf32>
    %105 = vector.extract_strided_slice %104 {offsets = [0, 0], sizes = [8, 384], strides = [1, 1]} : vector<8x512xf32> to vector<8x384xf32>
    %cst_51 = arith.constant 5.000000e-01 : f32
    %106 = vector.broadcast %cst_51 : f32 to vector<8x384xf32>
    %107 = arith.mulf %106, %105 : vector<8x384xf32>
    %108 = math.tanh %107 : vector<8x384xf32>
    %cst_52 = arith.constant 5.000000e-01 : f32
    %109 = vector.broadcast %cst_52 : f32 to vector<8x384xf32>
    %110 = arith.mulf %109, %108 : vector<8x384xf32>
    %cst_53 = arith.constant 5.000000e-01 : f32
    %111 = vector.broadcast %cst_53 : f32 to vector<8x384xf32>
    %112 = arith.addf %110, %111 : vector<8x384xf32>
    %113 = vector.extract_strided_slice %104 {offsets = [0, 384], sizes = [8, 128], strides = [1, 1]} : vector<8x512xf32> to vector<8x128xf32>
    %114 = math.tanh %113 : vector<8x128xf32>
    %115 = vector.extract_strided_slice %112 {offsets = [0, 0], sizes = [8, 128], strides = [1, 1]} : vector<8x384xf32> to vector<8x128xf32>
    %116 = vector.extract_strided_slice %112 {offsets = [0, 128], sizes = [8, 128], strides = [1, 1]} : vector<8x384xf32> to vector<8x128xf32>
    %117 = vector.extract_strided_slice %112 {offsets = [0, 256], sizes = [8, 128], strides = [1, 1]} : vector<8x384xf32> to vector<8x128xf32>
    %118 = arith.mulf %116, %67 : vector<8x128xf32>
    %119 = arith.mulf %115, %114 : vector<8x128xf32>
    %120 = arith.addf %118, %119 : vector<8x128xf32>
    %121 = math.tanh %120 : vector<8x128xf32>
    %122 = arith.mulf %117, %121 : vector<8x128xf32>
    %123 = arith.addf %70, %122 : vector<8x128xf32>
    %c2_i32 = arith.constant 2 : i32
    %c8_i32_54 = arith.constant 8 : i32
    %124 = arith.muli %c2_i32, %c8_i32_54 : i32
    %125 = tpu.assume_multiple %124, 8 : i32
    %126 = arith.index_cast %125 : i32 to index
    %c0_55 = arith.constant 0 : index
    %127 = vector.load %arg11[%126, %c0_55] : memref<64x512xf32, #tpu.memory_space<vmem>>, vector<8x512xf32>
    %128 = arith.truncf %96 : vector<8x128xf32> to vector<8x128xbf16>
    %c0_56 = arith.constant 0 : index
    %c0_57 = arith.constant 0 : index
    %129 = vector.load %arg3[%c0_56, %c0_57] : memref<128x512xbf16, #tpu.memory_space<vmem>>, vector<128x512xbf16>
    %cst_58 = arith.constant dense<0.000000e+00> : vector<8x512xf32>
    %130 = tpu.matmul %128, %129, %cst_58 {dimension_numbers = #tpu.dot_dimension_numbers<[1], [0], [0], [1], [0, 0, 1, 1], [], []>} : vector<8x128xbf16>, vector<128x512xbf16>, vector<8x512xf32> -> vector<8x512xf32>
    %131 = arith.addf %127, %130 : vector<8x512xf32>
    %132 = vector.extract_strided_slice %131 {offsets = [0, 0], sizes = [8, 384], strides = [1, 1]} : vector<8x512xf32> to vector<8x384xf32>
    %cst_59 = arith.constant 5.000000e-01 : f32
    %133 = vector.broadcast %cst_59 : f32 to vector<8x384xf32>
    %134 = arith.mulf %133, %132 : vector<8x384xf32>
    %135 = math.tanh %134 : vector<8x384xf32>
    %cst_60 = arith.constant 5.000000e-01 : f32
    %136 = vector.broadcast %cst_60 : f32 to vector<8x384xf32>
    %137 = arith.mulf %136, %135 : vector<8x384xf32>
    %cst_61 = arith.constant 5.000000e-01 : f32
    %138 = vector.broadcast %cst_61 : f32 to vector<8x384xf32>
    %139 = arith.addf %137, %138 : vector<8x384xf32>
    %140 = vector.extract_strided_slice %131 {offsets = [0, 384], sizes = [8, 128], strides = [1, 1]} : vector<8x512xf32> to vector<8x128xf32>
    %141 = math.tanh %140 : vector<8x128xf32>
    %142 = vector.extract_strided_slice %139 {offsets = [0, 0], sizes = [8, 128], strides = [1, 1]} : vector<8x384xf32> to vector<8x128xf32>
    %143 = vector.extract_strided_slice %139 {offsets = [0, 128], sizes = [8, 128], strides = [1, 1]} : vector<8x384xf32> to vector<8x128xf32>
    %144 = vector.extract_strided_slice %139 {offsets = [0, 256], sizes = [8, 128], strides = [1, 1]} : vector<8x384xf32> to vector<8x128xf32>
    %145 = arith.mulf %143, %94 : vector<8x128xf32>
    %146 = arith.mulf %142, %141 : vector<8x128xf32>
    %147 = arith.addf %145, %146 : vector<8x128xf32>
    %148 = math.tanh %147 : vector<8x128xf32>
    %149 = arith.mulf %144, %148 : vector<8x128xf32>
    %150 = arith.truncf %149 : vector<8x128xf32> to vector<8x128xbf16>
    %c0_62 = arith.constant 0 : index
    %c0_63 = arith.constant 0 : index
    %151 = vector.load %arg5[%c0_62, %c0_63] : memref<128x512xbf16, #tpu.memory_space<vmem>>, vector<128x512xbf16>
    %cst_64 = arith.constant dense<0.000000e+00> : vector<8x512xf32>
    %152 = tpu.matmul %150, %151, %cst_64 {dimension_numbers = #tpu.dot_dimension_numbers<[1], [0], [0], [1], [0, 0, 1, 1], [], []>} : vector<8x128xbf16>, vector<128x512xbf16>, vector<8x512xf32> -> vector<8x512xf32>
    %153 = arith.truncf %122 : vector<8x128xf32> to vector<8x128xbf16>
    %c0_65 = arith.constant 0 : index
    %c0_66 = arith.constant 0 : index
    %154 = vector.load %arg6[%c0_65, %c0_66] : memref<128x512xbf16, #tpu.memory_space<vmem>>, vector<128x512xbf16>
    %cst_67 = arith.constant dense<0.000000e+00> : vector<8x512xf32>
    %155 = tpu.matmul %153, %154, %cst_67 {dimension_numbers = #tpu.dot_dimension_numbers<[1], [0], [0], [1], [0, 0, 1, 1], [], []>} : vector<8x128xbf16>, vector<128x512xbf16>, vector<8x512xf32> -> vector<8x512xf32>
    %156 = arith.addf %152, %155 : vector<8x512xf32>
    %157 = arith.addf %156, %12 : vector<8x512xf32>
    %158 = vector.extract_strided_slice %157 {offsets = [0, 0], sizes = [8, 384], strides = [1, 1]} : vector<8x512xf32> to vector<8x384xf32>
    %cst_68 = arith.constant 5.000000e-01 : f32
    %159 = vector.broadcast %cst_68 : f32 to vector<8x384xf32>
    %160 = arith.mulf %159, %158 : vector<8x384xf32>
    %161 = math.tanh %160 : vector<8x384xf32>
    %cst_69 = arith.constant 5.000000e-01 : f32
    %162 = vector.broadcast %cst_69 : f32 to vector<8x384xf32>
    %163 = arith.mulf %162, %161 : vector<8x384xf32>
    %cst_70 = arith.constant 5.000000e-01 : f32
    %164 = vector.broadcast %cst_70 : f32 to vector<8x384xf32>
    %165 = arith.addf %163, %164 : vector<8x384xf32>
    %166 = vector.extract_strided_slice %157 {offsets = [0, 384], sizes = [8, 128], strides = [1, 1]} : vector<8x512xf32> to vector<8x128xf32>
    %167 = math.tanh %166 : vector<8x128xf32>
    %168 = vector.extract_strided_slice %165 {offsets = [0, 0], sizes = [8, 128], strides = [1, 1]} : vector<8x384xf32> to vector<8x128xf32>
    %169 = vector.extract_strided_slice %165 {offsets = [0, 128], sizes = [8, 128], strides = [1, 1]} : vector<8x384xf32> to vector<8x128xf32>
    %170 = vector.extract_strided_slice %165 {offsets = [0, 256], sizes = [8, 128], strides = [1, 1]} : vector<8x384xf32> to vector<8x128xf32>
    %171 = arith.mulf %169, %120 : vector<8x128xf32>
    %172 = arith.mulf %168, %167 : vector<8x128xf32>
    %173 = arith.addf %171, %172 : vector<8x128xf32>
    %174 = math.tanh %173 : vector<8x128xf32>
    %175 = arith.mulf %170, %174 : vector<8x128xf32>
    %176 = arith.addf %123, %175 : vector<8x128xf32>
    %c3_i32 = arith.constant 3 : i32
    %c8_i32_71 = arith.constant 8 : i32
    %177 = arith.muli %c3_i32, %c8_i32_71 : i32
    %178 = tpu.assume_multiple %177, 8 : i32
    %179 = arith.index_cast %178 : i32 to index
    %c0_72 = arith.constant 0 : index
    %180 = vector.load %arg11[%179, %c0_72] : memref<64x512xf32, #tpu.memory_space<vmem>>, vector<8x512xf32>
    %181 = arith.truncf %149 : vector<8x128xf32> to vector<8x128xbf16>
    %c0_73 = arith.constant 0 : index
    %c0_74 = arith.constant 0 : index
    %182 = vector.load %arg3[%c0_73, %c0_74] : memref<128x512xbf16, #tpu.memory_space<vmem>>, vector<128x512xbf16>
    %cst_75 = arith.constant dense<0.000000e+00> : vector<8x512xf32>
    %183 = tpu.matmul %181, %182, %cst_75 {dimension_numbers = #tpu.dot_dimension_numbers<[1], [0], [0], [1], [0, 0, 1, 1], [], []>} : vector<8x128xbf16>, vector<128x512xbf16>, vector<8x512xf32> -> vector<8x512xf32>
    %184 = arith.addf %180, %183 : vector<8x512xf32>
    %185 = vector.extract_strided_slice %184 {offsets = [0, 0], sizes = [8, 384], strides = [1, 1]} : vector<8x512xf32> to vector<8x384xf32>
    %cst_76 = arith.constant 5.000000e-01 : f32
    %186 = vector.broadcast %cst_76 : f32 to vector<8x384xf32>
    %187 = arith.mulf %186, %185 : vector<8x384xf32>
    %188 = math.tanh %187 : vector<8x384xf32>
    %cst_77 = arith.constant 5.000000e-01 : f32
    %189 = vector.broadcast %cst_77 : f32 to vector<8x384xf32>
    %190 = arith.mulf %189, %188 : vector<8x384xf32>
    %cst_78 = arith.constant 5.000000e-01 : f32
    %191 = vector.broadcast %cst_78 : f32 to vector<8x384xf32>
    %192 = arith.addf %190, %191 : vector<8x384xf32>
    %193 = vector.extract_strided_slice %184 {offsets = [0, 384], sizes = [8, 128], strides = [1, 1]} : vector<8x512xf32> to vector<8x128xf32>
    %194 = math.tanh %193 : vector<8x128xf32>
    %195 = vector.extract_strided_slice %192 {offsets = [0, 0], sizes = [8, 128], strides = [1, 1]} : vector<8x384xf32> to vector<8x128xf32>
    %196 = vector.extract_strided_slice %192 {offsets = [0, 128], sizes = [8, 128], strides = [1, 1]} : vector<8x384xf32> to vector<8x128xf32>
    %197 = vector.extract_strided_slice %192 {offsets = [0, 256], sizes = [8, 128], strides = [1, 1]} : vector<8x384xf32> to vector<8x128xf32>
    %198 = arith.mulf %196, %147 : vector<8x128xf32>
    %199 = arith.mulf %195, %194 : vector<8x128xf32>
    %200 = arith.addf %198, %199 : vector<8x128xf32>
    %201 = math.tanh %200 : vector<8x128xf32>
    %202 = arith.mulf %197, %201 : vector<8x128xf32>
    %203 = arith.truncf %202 : vector<8x128xf32> to vector<8x128xbf16>
    %c0_79 = arith.constant 0 : index
    %c0_80 = arith.constant 0 : index
    %204 = vector.load %arg5[%c0_79, %c0_80] : memref<128x512xbf16, #tpu.memory_space<vmem>>, vector<128x512xbf16>
    %cst_81 = arith.constant dense<0.000000e+00> : vector<8x512xf32>
    %205 = tpu.matmul %203, %204, %cst_81 {dimension_numbers = #tpu.dot_dimension_numbers<[1], [0], [0], [1], [0, 0, 1, 1], [], []>} : vector<8x128xbf16>, vector<128x512xbf16>, vector<8x512xf32> -> vector<8x512xf32>
    %206 = arith.truncf %175 : vector<8x128xf32> to vector<8x128xbf16>
    %c0_82 = arith.constant 0 : index
    %c0_83 = arith.constant 0 : index
    %207 = vector.load %arg6[%c0_82, %c0_83] : memref<128x512xbf16, #tpu.memory_space<vmem>>, vector<128x512xbf16>
    %cst_84 = arith.constant dense<0.000000e+00> : vector<8x512xf32>
    %208 = tpu.matmul %206, %207, %cst_84 {dimension_numbers = #tpu.dot_dimension_numbers<[1], [0], [0], [1], [0, 0, 1, 1], [], []>} : vector<8x128xbf16>, vector<128x512xbf16>, vector<8x512xf32> -> vector<8x512xf32>
    %209 = arith.addf %205, %208 : vector<8x512xf32>
    %210 = arith.addf %209, %12 : vector<8x512xf32>
    %211 = vector.extract_strided_slice %210 {offsets = [0, 0], sizes = [8, 384], strides = [1, 1]} : vector<8x512xf32> to vector<8x384xf32>
    %cst_85 = arith.constant 5.000000e-01 : f32
    %212 = vector.broadcast %cst_85 : f32 to vector<8x384xf32>
    %213 = arith.mulf %212, %211 : vector<8x384xf32>
    %214 = math.tanh %213 : vector<8x384xf32>
    %cst_86 = arith.constant 5.000000e-01 : f32
    %215 = vector.broadcast %cst_86 : f32 to vector<8x384xf32>
    %216 = arith.mulf %215, %214 : vector<8x384xf32>
    %cst_87 = arith.constant 5.000000e-01 : f32
    %217 = vector.broadcast %cst_87 : f32 to vector<8x384xf32>
    %218 = arith.addf %216, %217 : vector<8x384xf32>
    %219 = vector.extract_strided_slice %210 {offsets = [0, 384], sizes = [8, 128], strides = [1, 1]} : vector<8x512xf32> to vector<8x128xf32>
    %220 = math.tanh %219 : vector<8x128xf32>
    %221 = vector.extract_strided_slice %218 {offsets = [0, 0], sizes = [8, 128], strides = [1, 1]} : vector<8x384xf32> to vector<8x128xf32>
    %222 = vector.extract_strided_slice %218 {offsets = [0, 128], sizes = [8, 128], strides = [1, 1]} : vector<8x384xf32> to vector<8x128xf32>
    %223 = vector.extract_strided_slice %218 {offsets = [0, 256], sizes = [8, 128], strides = [1, 1]} : vector<8x384xf32> to vector<8x128xf32>
    %224 = arith.mulf %222, %173 : vector<8x128xf32>
    %225 = arith.mulf %221, %220 : vector<8x128xf32>
    %226 = arith.addf %224, %225 : vector<8x128xf32>
    %227 = math.tanh %226 : vector<8x128xf32>
    %228 = arith.mulf %223, %227 : vector<8x128xf32>
    %229 = arith.addf %176, %228 : vector<8x128xf32>
    %c4_i32 = arith.constant 4 : i32
    %c8_i32_88 = arith.constant 8 : i32
    %230 = arith.muli %c4_i32, %c8_i32_88 : i32
    %231 = tpu.assume_multiple %230, 8 : i32
    %232 = arith.index_cast %231 : i32 to index
    %c0_89 = arith.constant 0 : index
    %233 = vector.load %arg11[%232, %c0_89] : memref<64x512xf32, #tpu.memory_space<vmem>>, vector<8x512xf32>
    %234 = arith.truncf %202 : vector<8x128xf32> to vector<8x128xbf16>
    %c0_90 = arith.constant 0 : index
    %c0_91 = arith.constant 0 : index
    %235 = vector.load %arg3[%c0_90, %c0_91] : memref<128x512xbf16, #tpu.memory_space<vmem>>, vector<128x512xbf16>
    %cst_92 = arith.constant dense<0.000000e+00> : vector<8x512xf32>
    %236 = tpu.matmul %234, %235, %cst_92 {dimension_numbers = #tpu.dot_dimension_numbers<[1], [0], [0], [1], [0, 0, 1, 1], [], []>} : vector<8x128xbf16>, vector<128x512xbf16>, vector<8x512xf32> -> vector<8x512xf32>
    %237 = arith.addf %233, %236 : vector<8x512xf32>
    %238 = vector.extract_strided_slice %237 {offsets = [0, 0], sizes = [8, 384], strides = [1, 1]} : vector<8x512xf32> to vector<8x384xf32>
    %cst_93 = arith.constant 5.000000e-01 : f32
    %239 = vector.broadcast %cst_93 : f32 to vector<8x384xf32>
    %240 = arith.mulf %239, %238 : vector<8x384xf32>
    %241 = math.tanh %240 : vector<8x384xf32>
    %cst_94 = arith.constant 5.000000e-01 : f32
    %242 = vector.broadcast %cst_94 : f32 to vector<8x384xf32>
    %243 = arith.mulf %242, %241 : vector<8x384xf32>
    %cst_95 = arith.constant 5.000000e-01 : f32
    %244 = vector.broadcast %cst_95 : f32 to vector<8x384xf32>
    %245 = arith.addf %243, %244 : vector<8x384xf32>
    %246 = vector.extract_strided_slice %237 {offsets = [0, 384], sizes = [8, 128], strides = [1, 1]} : vector<8x512xf32> to vector<8x128xf32>
    %247 = math.tanh %246 : vector<8x128xf32>
    %248 = vector.extract_strided_slice %245 {offsets = [0, 0], sizes = [8, 128], strides = [1, 1]} : vector<8x384xf32> to vector<8x128xf32>
    %249 = vector.extract_strided_slice %245 {offsets = [0, 128], sizes = [8, 128], strides = [1, 1]} : vector<8x384xf32> to vector<8x128xf32>
    %250 = vector.extract_strided_slice %245 {offsets = [0, 256], sizes = [8, 128], strides = [1, 1]} : vector<8x384xf32> to vector<8x128xf32>
    %251 = arith.mulf %249, %200 : vector<8x128xf32>
    %252 = arith.mulf %248, %247 : vector<8x128xf32>
    %253 = arith.addf %251, %252 : vector<8x128xf32>
    %254 = math.tanh %253 : vector<8x128xf32>
    %255 = arith.mulf %250, %254 : vector<8x128xf32>
    %256 = arith.truncf %255 : vector<8x128xf32> to vector<8x128xbf16>
    %c0_96 = arith.constant 0 : index
    %c0_97 = arith.constant 0 : index
    %257 = vector.load %arg5[%c0_96, %c0_97] : memref<128x512xbf16, #tpu.memory_space<vmem>>, vector<128x512xbf16>
    %cst_98 = arith.constant dense<0.000000e+00> : vector<8x512xf32>
    %258 = tpu.matmul %256, %257, %cst_98 {dimension_numbers = #tpu.dot_dimension_numbers<[1], [0], [0], [1], [0, 0, 1, 1], [], []>} : vector<8x128xbf16>, vector<128x512xbf16>, vector<8x512xf32> -> vector<8x512xf32>
    %259 = arith.truncf %228 : vector<8x128xf32> to vector<8x128xbf16>
    %c0_99 = arith.constant 0 : index
    %c0_100 = arith.constant 0 : index
    %260 = vector.load %arg6[%c0_99, %c0_100] : memref<128x512xbf16, #tpu.memory_space<vmem>>, vector<128x512xbf16>
    %cst_101 = arith.constant dense<0.000000e+00> : vector<8x512xf32>
    %261 = tpu.matmul %259, %260, %cst_101 {dimension_numbers = #tpu.dot_dimension_numbers<[1], [0], [0], [1], [0, 0, 1, 1], [], []>} : vector<8x128xbf16>, vector<128x512xbf16>, vector<8x512xf32> -> vector<8x512xf32>
    %262 = arith.addf %258, %261 : vector<8x512xf32>
    %263 = arith.addf %262, %12 : vector<8x512xf32>
    %264 = vector.extract_strided_slice %263 {offsets = [0, 0], sizes = [8, 384], strides = [1, 1]} : vector<8x512xf32> to vector<8x384xf32>
    %cst_102 = arith.constant 5.000000e-01 : f32
    %265 = vector.broadcast %cst_102 : f32 to vector<8x384xf32>
    %266 = arith.mulf %265, %264 : vector<8x384xf32>
    %267 = math.tanh %266 : vector<8x384xf32>
    %cst_103 = arith.constant 5.000000e-01 : f32
    %268 = vector.broadcast %cst_103 : f32 to vector<8x384xf32>
    %269 = arith.mulf %268, %267 : vector<8x384xf32>
    %cst_104 = arith.constant 5.000000e-01 : f32
    %270 = vector.broadcast %cst_104 : f32 to vector<8x384xf32>
    %271 = arith.addf %269, %270 : vector<8x384xf32>
    %272 = vector.extract_strided_slice %263 {offsets = [0, 384], sizes = [8, 128], strides = [1, 1]} : vector<8x512xf32> to vector<8x128xf32>
    %273 = math.tanh %272 : vector<8x128xf32>
    %274 = vector.extract_strided_slice %271 {offsets = [0, 0], sizes = [8, 128], strides = [1, 1]} : vector<8x384xf32> to vector<8x128xf32>
    %275 = vector.extract_strided_slice %271 {offsets = [0, 128], sizes = [8, 128], strides = [1, 1]} : vector<8x384xf32> to vector<8x128xf32>
    %276 = vector.extract_strided_slice %271 {offsets = [0, 256], sizes = [8, 128], strides = [1, 1]} : vector<8x384xf32> to vector<8x128xf32>
    %277 = arith.mulf %275, %226 : vector<8x128xf32>
    %278 = arith.mulf %274, %273 : vector<8x128xf32>
    %279 = arith.addf %277, %278 : vector<8x128xf32>
    %280 = math.tanh %279 : vector<8x128xf32>
    %281 = arith.mulf %276, %280 : vector<8x128xf32>
    %282 = arith.addf %229, %281 : vector<8x128xf32>
    %c5_i32 = arith.constant 5 : i32
    %c8_i32_105 = arith.constant 8 : i32
    %283 = arith.muli %c5_i32, %c8_i32_105 : i32
    %284 = tpu.assume_multiple %283, 8 : i32
    %285 = arith.index_cast %284 : i32 to index
    %c0_106 = arith.constant 0 : index
    %286 = vector.load %arg11[%285, %c0_106] : memref<64x512xf32, #tpu.memory_space<vmem>>, vector<8x512xf32>
    %287 = arith.truncf %255 : vector<8x128xf32> to vector<8x128xbf16>
    %c0_107 = arith.constant 0 : index
    %c0_108 = arith.constant 0 : index
    %288 = vector.load %arg3[%c0_107, %c0_108] : memref<128x512xbf16, #tpu.memory_space<vmem>>, vector<128x512xbf16>
    %cst_109 = arith.constant dense<0.000000e+00> : vector<8x512xf32>
    %289 = tpu.matmul %287, %288, %cst_109 {dimension_numbers = #tpu.dot_dimension_numbers<[1], [0], [0], [1], [0, 0, 1, 1], [], []>} : vector<8x128xbf16>, vector<128x512xbf16>, vector<8x512xf32> -> vector<8x512xf32>
    %290 = arith.addf %286, %289 : vector<8x512xf32>
    %291 = vector.extract_strided_slice %290 {offsets = [0, 0], sizes = [8, 384], strides = [1, 1]} : vector<8x512xf32> to vector<8x384xf32>
    %cst_110 = arith.constant 5.000000e-01 : f32
    %292 = vector.broadcast %cst_110 : f32 to vector<8x384xf32>
    %293 = arith.mulf %292, %291 : vector<8x384xf32>
    %294 = math.tanh %293 : vector<8x384xf32>
    %cst_111 = arith.constant 5.000000e-01 : f32
    %295 = vector.broadcast %cst_111 : f32 to vector<8x384xf32>
    %296 = arith.mulf %295, %294 : vector<8x384xf32>
    %cst_112 = arith.constant 5.000000e-01 : f32
    %297 = vector.broadcast %cst_112 : f32 to vector<8x384xf32>
    %298 = arith.addf %296, %297 : vector<8x384xf32>
    %299 = vector.extract_strided_slice %290 {offsets = [0, 384], sizes = [8, 128], strides = [1, 1]} : vector<8x512xf32> to vector<8x128xf32>
    %300 = math.tanh %299 : vector<8x128xf32>
    %301 = vector.extract_strided_slice %298 {offsets = [0, 0], sizes = [8, 128], strides = [1, 1]} : vector<8x384xf32> to vector<8x128xf32>
    %302 = vector.extract_strided_slice %298 {offsets = [0, 128], sizes = [8, 128], strides = [1, 1]} : vector<8x384xf32> to vector<8x128xf32>
    %303 = vector.extract_strided_slice %298 {offsets = [0, 256], sizes = [8, 128], strides = [1, 1]} : vector<8x384xf32> to vector<8x128xf32>
    %304 = arith.mulf %302, %253 : vector<8x128xf32>
    %305 = arith.mulf %301, %300 : vector<8x128xf32>
    %306 = arith.addf %304, %305 : vector<8x128xf32>
    %307 = math.tanh %306 : vector<8x128xf32>
    %308 = arith.mulf %303, %307 : vector<8x128xf32>
    %309 = arith.truncf %308 : vector<8x128xf32> to vector<8x128xbf16>
    %c0_113 = arith.constant 0 : index
    %c0_114 = arith.constant 0 : index
    %310 = vector.load %arg5[%c0_113, %c0_114] : memref<128x512xbf16, #tpu.memory_space<vmem>>, vector<128x512xbf16>
    %cst_115 = arith.constant dense<0.000000e+00> : vector<8x512xf32>
    %311 = tpu.matmul %309, %310, %cst_115 {dimension_numbers = #tpu.dot_dimension_numbers<[1], [0], [0], [1], [0, 0, 1, 1], [], []>} : vector<8x128xbf16>, vector<128x512xbf16>, vector<8x512xf32> -> vector<8x512xf32>
    %312 = arith.truncf %281 : vector<8x128xf32> to vector<8x128xbf16>
    %c0_116 = arith.constant 0 : index
    %c0_117 = arith.constant 0 : index
    %313 = vector.load %arg6[%c0_116, %c0_117] : memref<128x512xbf16, #tpu.memory_space<vmem>>, vector<128x512xbf16>
    %cst_118 = arith.constant dense<0.000000e+00> : vector<8x512xf32>
    %314 = tpu.matmul %312, %313, %cst_118 {dimension_numbers = #tpu.dot_dimension_numbers<[1], [0], [0], [1], [0, 0, 1, 1], [], []>} : vector<8x128xbf16>, vector<128x512xbf16>, vector<8x512xf32> -> vector<8x512xf32>
    %315 = arith.addf %311, %314 : vector<8x512xf32>
    %316 = arith.addf %315, %12 : vector<8x512xf32>
    %317 = vector.extract_strided_slice %316 {offsets = [0, 0], sizes = [8, 384], strides = [1, 1]} : vector<8x512xf32> to vector<8x384xf32>
    %cst_119 = arith.constant 5.000000e-01 : f32
    %318 = vector.broadcast %cst_119 : f32 to vector<8x384xf32>
    %319 = arith.mulf %318, %317 : vector<8x384xf32>
    %320 = math.tanh %319 : vector<8x384xf32>
    %cst_120 = arith.constant 5.000000e-01 : f32
    %321 = vector.broadcast %cst_120 : f32 to vector<8x384xf32>
    %322 = arith.mulf %321, %320 : vector<8x384xf32>
    %cst_121 = arith.constant 5.000000e-01 : f32
    %323 = vector.broadcast %cst_121 : f32 to vector<8x384xf32>
    %324 = arith.addf %322, %323 : vector<8x384xf32>
    %325 = vector.extract_strided_slice %316 {offsets = [0, 384], sizes = [8, 128], strides = [1, 1]} : vector<8x512xf32> to vector<8x128xf32>
    %326 = math.tanh %325 : vector<8x128xf32>
    %327 = vector.extract_strided_slice %324 {offsets = [0, 0], sizes = [8, 128], strides = [1, 1]} : vector<8x384xf32> to vector<8x128xf32>
    %328 = vector.extract_strided_slice %324 {offsets = [0, 128], sizes = [8, 128], strides = [1, 1]} : vector<8x384xf32> to vector<8x128xf32>
    %329 = vector.extract_strided_slice %324 {offsets = [0, 256], sizes = [8, 128], strides = [1, 1]} : vector<8x384xf32> to vector<8x128xf32>
    %330 = arith.mulf %328, %279 : vector<8x128xf32>
    %331 = arith.mulf %327, %326 : vector<8x128xf32>
    %332 = arith.addf %330, %331 : vector<8x128xf32>
    %333 = math.tanh %332 : vector<8x128xf32>
    %334 = arith.mulf %329, %333 : vector<8x128xf32>
    %335 = arith.addf %282, %334 : vector<8x128xf32>
    %c6_i32 = arith.constant 6 : i32
    %c8_i32_122 = arith.constant 8 : i32
    %336 = arith.muli %c6_i32, %c8_i32_122 : i32
    %337 = tpu.assume_multiple %336, 8 : i32
    %338 = arith.index_cast %337 : i32 to index
    %c0_123 = arith.constant 0 : index
    %339 = vector.load %arg11[%338, %c0_123] : memref<64x512xf32, #tpu.memory_space<vmem>>, vector<8x512xf32>
    %340 = arith.truncf %308 : vector<8x128xf32> to vector<8x128xbf16>
    %c0_124 = arith.constant 0 : index
    %c0_125 = arith.constant 0 : index
    %341 = vector.load %arg3[%c0_124, %c0_125] : memref<128x512xbf16, #tpu.memory_space<vmem>>, vector<128x512xbf16>
    %cst_126 = arith.constant dense<0.000000e+00> : vector<8x512xf32>
    %342 = tpu.matmul %340, %341, %cst_126 {dimension_numbers = #tpu.dot_dimension_numbers<[1], [0], [0], [1], [0, 0, 1, 1], [], []>} : vector<8x128xbf16>, vector<128x512xbf16>, vector<8x512xf32> -> vector<8x512xf32>
    %343 = arith.addf %339, %342 : vector<8x512xf32>
    %344 = vector.extract_strided_slice %343 {offsets = [0, 0], sizes = [8, 384], strides = [1, 1]} : vector<8x512xf32> to vector<8x384xf32>
    %cst_127 = arith.constant 5.000000e-01 : f32
    %345 = vector.broadcast %cst_127 : f32 to vector<8x384xf32>
    %346 = arith.mulf %345, %344 : vector<8x384xf32>
    %347 = math.tanh %346 : vector<8x384xf32>
    %cst_128 = arith.constant 5.000000e-01 : f32
    %348 = vector.broadcast %cst_128 : f32 to vector<8x384xf32>
    %349 = arith.mulf %348, %347 : vector<8x384xf32>
    %cst_129 = arith.constant 5.000000e-01 : f32
    %350 = vector.broadcast %cst_129 : f32 to vector<8x384xf32>
    %351 = arith.addf %349, %350 : vector<8x384xf32>
    %352 = vector.extract_strided_slice %343 {offsets = [0, 384], sizes = [8, 128], strides = [1, 1]} : vector<8x512xf32> to vector<8x128xf32>
    %353 = math.tanh %352 : vector<8x128xf32>
    %354 = vector.extract_strided_slice %351 {offsets = [0, 0], sizes = [8, 128], strides = [1, 1]} : vector<8x384xf32> to vector<8x128xf32>
    %355 = vector.extract_strided_slice %351 {offsets = [0, 128], sizes = [8, 128], strides = [1, 1]} : vector<8x384xf32> to vector<8x128xf32>
    %356 = vector.extract_strided_slice %351 {offsets = [0, 256], sizes = [8, 128], strides = [1, 1]} : vector<8x384xf32> to vector<8x128xf32>
    %357 = arith.mulf %355, %306 : vector<8x128xf32>
    %358 = arith.mulf %354, %353 : vector<8x128xf32>
    %359 = arith.addf %357, %358 : vector<8x128xf32>
    %360 = math.tanh %359 : vector<8x128xf32>
    %361 = arith.mulf %356, %360 : vector<8x128xf32>
    %362 = arith.truncf %361 : vector<8x128xf32> to vector<8x128xbf16>
    %c0_130 = arith.constant 0 : index
    %c0_131 = arith.constant 0 : index
    %363 = vector.load %arg5[%c0_130, %c0_131] : memref<128x512xbf16, #tpu.memory_space<vmem>>, vector<128x512xbf16>
    %cst_132 = arith.constant dense<0.000000e+00> : vector<8x512xf32>
    %364 = tpu.matmul %362, %363, %cst_132 {dimension_numbers = #tpu.dot_dimension_numbers<[1], [0], [0], [1], [0, 0, 1, 1], [], []>} : vector<8x128xbf16>, vector<128x512xbf16>, vector<8x512xf32> -> vector<8x512xf32>
    %365 = arith.truncf %334 : vector<8x128xf32> to vector<8x128xbf16>
    %c0_133 = arith.constant 0 : index
    %c0_134 = arith.constant 0 : index
    %366 = vector.load %arg6[%c0_133, %c0_134] : memref<128x512xbf16, #tpu.memory_space<vmem>>, vector<128x512xbf16>
    %cst_135 = arith.constant dense<0.000000e+00> : vector<8x512xf32>
    %367 = tpu.matmul %365, %366, %cst_135 {dimension_numbers = #tpu.dot_dimension_numbers<[1], [0], [0], [1], [0, 0, 1, 1], [], []>} : vector<8x128xbf16>, vector<128x512xbf16>, vector<8x512xf32> -> vector<8x512xf32>
    %368 = arith.addf %364, %367 : vector<8x512xf32>
    %369 = arith.addf %368, %12 : vector<8x512xf32>
    %370 = vector.extract_strided_slice %369 {offsets = [0, 0], sizes = [8, 384], strides = [1, 1]} : vector<8x512xf32> to vector<8x384xf32>
    %cst_136 = arith.constant 5.000000e-01 : f32
    %371 = vector.broadcast %cst_136 : f32 to vector<8x384xf32>
    %372 = arith.mulf %371, %370 : vector<8x384xf32>
    %373 = math.tanh %372 : vector<8x384xf32>
    %cst_137 = arith.constant 5.000000e-01 : f32
    %374 = vector.broadcast %cst_137 : f32 to vector<8x384xf32>
    %375 = arith.mulf %374, %373 : vector<8x384xf32>
    %cst_138 = arith.constant 5.000000e-01 : f32
    %376 = vector.broadcast %cst_138 : f32 to vector<8x384xf32>
    %377 = arith.addf %375, %376 : vector<8x384xf32>
    %378 = vector.extract_strided_slice %369 {offsets = [0, 384], sizes = [8, 128], strides = [1, 1]} : vector<8x512xf32> to vector<8x128xf32>
    %379 = math.tanh %378 : vector<8x128xf32>
    %380 = vector.extract_strided_slice %377 {offsets = [0, 0], sizes = [8, 128], strides = [1, 1]} : vector<8x384xf32> to vector<8x128xf32>
    %381 = vector.extract_strided_slice %377 {offsets = [0, 128], sizes = [8, 128], strides = [1, 1]} : vector<8x384xf32> to vector<8x128xf32>
    %382 = vector.extract_strided_slice %377 {offsets = [0, 256], sizes = [8, 128], strides = [1, 1]} : vector<8x384xf32> to vector<8x128xf32>
    %383 = arith.mulf %381, %332 : vector<8x128xf32>
    %384 = arith.mulf %380, %379 : vector<8x128xf32>
    %385 = arith.addf %383, %384 : vector<8x128xf32>
    %386 = math.tanh %385 : vector<8x128xf32>
    %387 = arith.mulf %382, %386 : vector<8x128xf32>
    %388 = arith.addf %335, %387 : vector<8x128xf32>
    %c7_i32 = arith.constant 7 : i32
    %c8_i32_139 = arith.constant 8 : i32
    %389 = arith.muli %c7_i32, %c8_i32_139 : i32
    %390 = tpu.assume_multiple %389, 8 : i32
    %391 = arith.index_cast %390 : i32 to index
    %c0_140 = arith.constant 0 : index
    %392 = vector.load %arg11[%391, %c0_140] : memref<64x512xf32, #tpu.memory_space<vmem>>, vector<8x512xf32>
    %393 = arith.truncf %361 : vector<8x128xf32> to vector<8x128xbf16>
    %c0_141 = arith.constant 0 : index
    %c0_142 = arith.constant 0 : index
    %394 = vector.load %arg3[%c0_141, %c0_142] : memref<128x512xbf16, #tpu.memory_space<vmem>>, vector<128x512xbf16>
    %cst_143 = arith.constant dense<0.000000e+00> : vector<8x512xf32>
    %395 = tpu.matmul %393, %394, %cst_143 {dimension_numbers = #tpu.dot_dimension_numbers<[1], [0], [0], [1], [0, 0, 1, 1], [], []>} : vector<8x128xbf16>, vector<128x512xbf16>, vector<8x512xf32> -> vector<8x512xf32>
    %396 = arith.addf %392, %395 : vector<8x512xf32>
    %397 = vector.extract_strided_slice %396 {offsets = [0, 0], sizes = [8, 384], strides = [1, 1]} : vector<8x512xf32> to vector<8x384xf32>
    %cst_144 = arith.constant 5.000000e-01 : f32
    %398 = vector.broadcast %cst_144 : f32 to vector<8x384xf32>
    %399 = arith.mulf %398, %397 : vector<8x384xf32>
    %400 = math.tanh %399 : vector<8x384xf32>
    %cst_145 = arith.constant 5.000000e-01 : f32
    %401 = vector.broadcast %cst_145 : f32 to vector<8x384xf32>
    %402 = arith.mulf %401, %400 : vector<8x384xf32>
    %cst_146 = arith.constant 5.000000e-01 : f32
    %403 = vector.broadcast %cst_146 : f32 to vector<8x384xf32>
    %404 = arith.addf %402, %403 : vector<8x384xf32>
    %405 = vector.extract_strided_slice %396 {offsets = [0, 384], sizes = [8, 128], strides = [1, 1]} : vector<8x512xf32> to vector<8x128xf32>
    %406 = math.tanh %405 : vector<8x128xf32>
    %407 = vector.extract_strided_slice %404 {offsets = [0, 0], sizes = [8, 128], strides = [1, 1]} : vector<8x384xf32> to vector<8x128xf32>
    %408 = vector.extract_strided_slice %404 {offsets = [0, 128], sizes = [8, 128], strides = [1, 1]} : vector<8x384xf32> to vector<8x128xf32>
    %409 = vector.extract_strided_slice %404 {offsets = [0, 256], sizes = [8, 128], strides = [1, 1]} : vector<8x384xf32> to vector<8x128xf32>
    %410 = arith.mulf %408, %359 : vector<8x128xf32>
    %411 = arith.mulf %407, %406 : vector<8x128xf32>
    %412 = arith.addf %410, %411 : vector<8x128xf32>
    %413 = math.tanh %412 : vector<8x128xf32>
    %414 = arith.mulf %409, %413 : vector<8x128xf32>
    %415 = arith.truncf %414 : vector<8x128xf32> to vector<8x128xbf16>
    %c0_147 = arith.constant 0 : index
    %c0_148 = arith.constant 0 : index
    %416 = vector.load %arg5[%c0_147, %c0_148] : memref<128x512xbf16, #tpu.memory_space<vmem>>, vector<128x512xbf16>
    %cst_149 = arith.constant dense<0.000000e+00> : vector<8x512xf32>
    %417 = tpu.matmul %415, %416, %cst_149 {dimension_numbers = #tpu.dot_dimension_numbers<[1], [0], [0], [1], [0, 0, 1, 1], [], []>} : vector<8x128xbf16>, vector<128x512xbf16>, vector<8x512xf32> -> vector<8x512xf32>
    %418 = arith.truncf %387 : vector<8x128xf32> to vector<8x128xbf16>
    %c0_150 = arith.constant 0 : index
    %c0_151 = arith.constant 0 : index
    %419 = vector.load %arg6[%c0_150, %c0_151] : memref<128x512xbf16, #tpu.memory_space<vmem>>, vector<128x512xbf16>
    %cst_152 = arith.constant dense<0.000000e+00> : vector<8x512xf32>
    %420 = tpu.matmul %418, %419, %cst_152 {dimension_numbers = #tpu.dot_dimension_numbers<[1], [0], [0], [1], [0, 0, 1, 1], [], []>} : vector<8x128xbf16>, vector<128x512xbf16>, vector<8x512xf32> -> vector<8x512xf32>
    %421 = arith.addf %417, %420 : vector<8x512xf32>
    %422 = arith.addf %421, %12 : vector<8x512xf32>
    %423 = vector.extract_strided_slice %422 {offsets = [0, 0], sizes = [8, 384], strides = [1, 1]} : vector<8x512xf32> to vector<8x384xf32>
    %cst_153 = arith.constant 5.000000e-01 : f32
    %424 = vector.broadcast %cst_153 : f32 to vector<8x384xf32>
    %425 = arith.mulf %424, %423 : vector<8x384xf32>
    %426 = math.tanh %425 : vector<8x384xf32>
    %cst_154 = arith.constant 5.000000e-01 : f32
    %427 = vector.broadcast %cst_154 : f32 to vector<8x384xf32>
    %428 = arith.mulf %427, %426 : vector<8x384xf32>
    %cst_155 = arith.constant 5.000000e-01 : f32
    %429 = vector.broadcast %cst_155 : f32 to vector<8x384xf32>
    %430 = arith.addf %428, %429 : vector<8x384xf32>
    %431 = vector.extract_strided_slice %422 {offsets = [0, 384], sizes = [8, 128], strides = [1, 1]} : vector<8x512xf32> to vector<8x128xf32>
    %432 = math.tanh %431 : vector<8x128xf32>
    %433 = vector.extract_strided_slice %430 {offsets = [0, 0], sizes = [8, 128], strides = [1, 1]} : vector<8x384xf32> to vector<8x128xf32>
    %434 = vector.extract_strided_slice %430 {offsets = [0, 128], sizes = [8, 128], strides = [1, 1]} : vector<8x384xf32> to vector<8x128xf32>
    %435 = vector.extract_strided_slice %430 {offsets = [0, 256], sizes = [8, 128], strides = [1, 1]} : vector<8x384xf32> to vector<8x128xf32>
    %436 = arith.mulf %434, %385 : vector<8x128xf32>
    %437 = arith.mulf %433, %432 : vector<8x128xf32>
    %438 = arith.addf %436, %437 : vector<8x128xf32>
    %439 = math.tanh %438 : vector<8x128xf32>
    %440 = arith.mulf %435, %439 : vector<8x128xf32>
    %441 = arith.addf %388, %440 : vector<8x128xf32>
    %c8_i32_156 = arith.constant 8 : i32
    %c0_157 = arith.constant 0 : index
    %c0_158 = arith.constant 0 : index
    %442 = vector.load %arg12[%c0_157, %c0_158] : memref<8x128xf32, #tpu.memory_space<vmem>>, vector<8x128xf32>
    tpu.vector_store %arg12[%c0_157, %c0_158], %414 {strides = array<i32>} : memref<8x128xf32, #tpu.memory_space<vmem>>, vector<8x128xf32>,
    %c0_159 = arith.constant 0 : index
    %c0_160 = arith.constant 0 : index
    %443 = vector.load %arg13[%c0_159, %c0_160] : memref<8x128xf32, #tpu.memory_space<vmem>>, vector<8x128xf32>
    tpu.vector_store %arg13[%c0_159, %c0_160], %412 {strides = array<i32>} : memref<8x128xf32, #tpu.memory_space<vmem>>, vector<8x128xf32>,
    %c0_161 = arith.constant 0 : index
    %c0_162 = arith.constant 0 : index
    %444 = vector.load %arg14[%c0_161, %c0_162] : memref<8x128xf32, #tpu.memory_space<vmem>>, vector<8x128xf32>
    tpu.vector_store %arg14[%c0_161, %c0_162], %440 {strides = array<i32>} : memref<8x128xf32, #tpu.memory_space<vmem>>, vector<8x128xf32>,
    %c0_163 = arith.constant 0 : index
    %c0_164 = arith.constant 0 : index
    %445 = vector.load %arg15[%c0_163, %c0_164] : memref<8x128xf32, #tpu.memory_space<vmem>>, vector<8x128xf32>
    tpu.vector_store %arg15[%c0_163, %c0_164], %438 {strides = array<i32>} : memref<8x128xf32, #tpu.memory_space<vmem>>, vector<8x128xf32>,
    %c0_165 = arith.constant 0 : index
    %c0_166 = arith.constant 0 : index
    %446 = vector.load %arg16[%c0_165, %c0_166] : memref<8x128xf32, #tpu.memory_space<vmem>>, vector<8x128xf32>
    tpu.vector_store %arg16[%c0_165, %c0_166], %441 {strides = array<i32>} : memref<8x128xf32, #tpu.memory_space<vmem>>, vector<8x128xf32>,
    %c0_i32_167 = arith.constant 0 : i32
    %447 = arith.cmpi eq, %arg0, %c0_i32_167 : i32
    %448 = arith.extui %447 : i1 to i32
    %c0_i32_168 = arith.constant 0 : i32
    %449 = arith.cmpi ne, %448, %c0_i32_168 : i32
    scf.if %449 {
      %cst_169 = arith.constant 1.000000e+00 : f32
      %cst_170 = arith.constant 8.000000e+00 : f32
      %450 = arith.divf %cst_169, %cst_170 : f32
      %451 = vector.broadcast %450 : f32 to vector<8x128xf32>
      %452 = arith.mulf %441, %451 : vector<8x128xf32>
      %c0_171 = arith.constant 0 : index
      %c0_172 = arith.constant 0 : index
      %453 = vector.load %arg8[%c0_171, %c0_172] : memref<8x128xf32, #tpu.memory_space<vmem>>, vector<8x128xf32>
      tpu.vector_store %arg8[%c0_171, %c0_172], %452 {strides = array<i32>} : memref<8x128xf32, #tpu.memory_space<vmem>>, vector<8x128xf32>,
      %c0_173 = arith.constant 0 : index
      %c0_174 = arith.constant 0 : index
      %c0_175 = arith.constant 0 : index
      %454 = vector.load %arg9[%c0_173, %c0_174, %c0_175] : memref<2x8x128xf32, #tpu.memory_space<vmem>>, vector<1x8x128xf32>
      %455 = vector.shape_cast %454 : vector<1x8x128xf32> to vector<8x128xf32>
      %456 = vector.shape_cast %414 : vector<8x128xf32> to vector<1x8x128xf32>
      tpu.vector_store %arg9[%c0_173, %c0_174, %c0_175], %456 {strides = array<i32>} : memref<2x8x128xf32, #tpu.memory_space<vmem>>, vector<1x8x128xf32>,
      %c1 = arith.constant 1 : index
      %c0_176 = arith.constant 0 : index
      %c0_177 = arith.constant 0 : index
      %457 = vector.load %arg9[%c1, %c0_176, %c0_177] : memref<2x8x128xf32, #tpu.memory_space<vmem>>, vector<1x8x128xf32>
      %458 = vector.shape_cast %457 : vector<1x8x128xf32> to vector<8x128xf32>
      %459 = vector.shape_cast %440 : vector<8x128xf32> to vector<1x8x128xf32>
      tpu.vector_store %arg9[%c1, %c0_176, %c0_177], %459 {strides = array<i32>} : memref<2x8x128xf32, #tpu.memory_space<vmem>>, vector<1x8x128xf32>,
      %c0_178 = arith.constant 0 : index
      %c0_179 = arith.constant 0 : index
      %c0_180 = arith.constant 0 : index
      %460 = vector.load %arg10[%c0_178, %c0_179, %c0_180] : memref<2x8x128xf32, #tpu.memory_space<vmem>>, vector<1x8x128xf32>
      %461 = vector.shape_cast %460 : vector<1x8x128xf32> to vector<8x128xf32>
      %462 = vector.shape_cast %412 : vector<8x128xf32> to vector<1x8x128xf32>
      tpu.vector_store %arg10[%c0_178, %c0_179, %c0_180], %462 {strides = array<i32>} : memref<2x8x128xf32, #tpu.memory_space<vmem>>, vector<1x8x128xf32>,
      %c1_181 = arith.constant 1 : index
      %c0_182 = arith.constant 0 : index
      %c0_183 = arith.constant 0 : index
      %463 = vector.load %arg10[%c1_181, %c0_182, %c0_183] : memref<2x8x128xf32, #tpu.memory_space<vmem>>, vector<1x8x128xf32>
      %464 = vector.shape_cast %463 : vector<1x8x128xf32> to vector<8x128xf32>
      %465 = vector.shape_cast %438 : vector<8x128xf32> to vector<1x8x128xf32>
      tpu.vector_store %arg10[%c1_181, %c0_182, %c0_183], %465 {strides = array<i32>} : memref<2x8x128xf32, #tpu.memory_space<vmem>>, vector<1x8x128xf32>,
    } else {
    }
    return
  }
  func.func @transform_0(%arg0: i32) -> (i32, i32) {
    %c0_i32 = arith.constant 0 : i32
    %c0_i32_0 = arith.constant 0 : i32
    return %arg0, %c0_i32 : i32, i32
  }
  func.func @transform_1(%arg0: i32) -> (i32, i32) {
    %c0_i32 = arith.constant 0 : i32
    %c0_i32_0 = arith.constant 0 : i32
    %c0_i32_1 = arith.constant 0 : i32
    return %c0_i32, %c0_i32_0 : i32, i32
  }
  func.func @transform_2(%arg0: i32) -> (i32, i32) {
    %c0_i32 = arith.constant 0 : i32
    %c0_i32_0 = arith.constant 0 : i32
    %c0_i32_1 = arith.constant 0 : i32
    return %c0_i32, %c0_i32_0 : i32, i32
  }
  func.func @transform_3(%arg0: i32) -> (i32, i32) {
    %c0_i32 = arith.constant 0 : i32
    %c0_i32_0 = arith.constant 0 : i32
    %c0_i32_1 = arith.constant 0 : i32
    return %c0_i32, %c0_i32_0 : i32, i32
  }
  func.func @transform_4(%arg0: i32) -> (i32, i32) {
    %c0_i32 = arith.constant 0 : i32
    %c0_i32_0 = arith.constant 0 : i32
    %c0_i32_1 = arith.constant 0 : i32
    return %c0_i32, %c0_i32_0 : i32, i32
  }
  func.func @transform_5(%arg0: i32) -> (i32, i32) {
    %c0_i32 = arith.constant 0 : i32
    %c0_i32_0 = arith.constant 0 : i32
    %c0_i32_1 = arith.constant 0 : i32
    return %c0_i32, %c0_i32_0 : i32, i32
  }
  func.func @transform_6(%arg0: i32) -> (i32, i32) {
    %c0_i32 = arith.constant 0 : i32
    %c0_i32_0 = arith.constant 0 : i32
    %c0_i32_1 = arith.constant 0 : i32
    return %c0_i32, %c0_i32_0 : i32, i32
  }
  func.func @transform_7(%arg0: i32) -> (i32, i32) {
    %c0_i32 = arith.constant 0 : i32
    %c0_i32_0 = arith.constant 0 : i32
    %c0_i32_1 = arith.constant 0 : i32
    return %c0_i32, %c0_i32_0 : i32, i32
  }
  func.func @transform_8(%arg0: i32) -> (i32, i32, i32) {
    %c0_i32 = arith.constant 0 : i32
    %c0_i32_0 = arith.constant 0 : i32
    %c0_i32_1 = arith.constant 0 : i32
    %c0_i32_2 = arith.constant 0 : i32
    return %c0_i32, %c0_i32_0, %c0_i32_1 : i32, i32, i32
  }
  func.func @transform_9(%arg0: i32) -> (i32, i32, i32) {
    %c0_i32 = arith.constant 0 : i32
    %c0_i32_0 = arith.constant 0 : i32
    %c0_i32_1 = arith.constant 0 : i32
    %c0_i32_2 = arith.constant 0 : i32
    return %c0_i32, %c0_i32_0, %c0_i32_1 : i32, i32, i32
  }
}

</mosaic_0001>

<bundles_post_ra>
// kernel: rnn_forward.1
= control target key start
LH: loop header
LB: loop body
LE: loop exit
PB: predicated region body
PF: predicated region fallthrough
CT: control target
= control target key end

     0   :  { %v6916_v1 = vmov 0   ;;  %s6906_s1 = inlined_call_operand.vmem [shape: bf16[128,512], index: 1, kind: input, shape index: {}]   ;;  %s6907_s0 = inlined_call_operand.vmem [shape: bf16[64,128], index: 0, kind: input, shape index: {}]   ;;  %s6908_s2 = inlined_call_operand.vmem [shape: bf16[128,512], index: 2, kind: input, shape index: {}]   ;;  %s6909_s5 = inlined_call_operand.vmem [shape: bf16[128,512], index: 5, kind: input, shape index: {}]   ;;  %s6910_s4 = inlined_call_operand.vmem [shape: bf16[128,512], index: 4, kind: input, shape index: {}]   ;;  %s6911_s3 = inlined_call_operand.vmem [shape: f32[1,512], index: 3, kind: input, shape index: {}]   ;;  %s6912_s6 = inlined_call_operand.vmem [shape: f32[1,512], index: 6, kind: input, shape index: {}]   ;;  %s6913_s9 = inlined_call_operand.vmem [shape: f32[2,8,128], index: 9, kind: output, shape index: {2}]   ;;  %s6914_s8 = inlined_call_operand.vmem [shape: f32[2,8,128], index: 8, kind: output, shape index: {1}]   ;;  %s6915_s7 = inlined_call_operand.vmem [shape: f32[8,128], index: 7, kind: output, shape index: {0}]  }
   0x1   :  { %v3638_v0 = vld [vmem:[%s6906_s1 + $0xe4] ss:$16 sps:$4 sm:$0xff]   ;;  %317 = vmatprep.mubr.bf16.mxu0 %v6916_v1  ;;  %390 = vmatprep.mubr.bf16.mxu1 %v6916_v1  ;;  %v3640_v2 = vld [vmem:[%s6906_s1 + $0xec] ss:$16 sps:$4 sm:$0xff]   ;;  %v3642_v3 = vld [vmem:[%s6906_s1 + $0xe0] ss:$16 sps:$4 sm:$0xff]  }
   0x2   :  { %285 = vmatprep.subr.bf16.mxu0 %v3638_v0  ;;  %v3643_v4 = vld [vmem:[%s6906_s1 + $0xe8] ss:$16 sps:$4 sm:$0xff]   ;;  %358 = vmatprep.subr.bf16.mxu1 %v3640_v2  ;;  %v3644_v5 = vld [vmem:[%s6906_s1 + $0xc4] ss:$16 sps:$4 sm:$0xff]   ;;  %v3646_v6 = vld [vmem:[%s6906_s1 + $0xcc] ss:$16 sps:$4 sm:$0xff]  }
   0x3   :  { %286 = vmatpush1.bf16.msra.mxu0 %v3642_v3  ;;  %359 = vmatpush1.bf16.msra.mxu1 %v3643_v4  ;;  %v3648_v7 = vld [vmem:[%s6906_s1 + $0xc0] ss:$16 sps:$4 sm:$0xff]   ;;  %v3649_v8 = vld [vmem:[%s6906_s1 + $0xc8] ss:$16 sps:$4 sm:$0xff]   ;;  %v3650_v9 = vld [vmem:[%s6906_s1 + $0xa4] ss:$16 sps:$4 sm:$0xff]  }
   0x4   :  { %287 = vmatprep.subr.bf16.mxu0 %v3644_v5  ;;  %360 = vmatprep.subr.bf16.mxu1 %v3646_v6  ;;  %v3652_v10 = vld [vmem:[%s6906_s1 + $0xac] ss:$16 sps:$4 sm:$0xff]   ;;  %v3654_v11 = vld [vmem:[%s6906_s1 + $0xa0] ss:$16 sps:$4 sm:$0xff]   ;;  %v3655_v12 = vld [vmem:[%s6906_s1 + $0xa8] ss:$16 sps:$4 sm:$0xff]  }
   0x5   :  { %v3656_v13 = vld [vmem:[%s6906_s1 + $0x84] ss:$16 sps:$4 sm:$0xff]   ;;  %v3658_v14 = vld [vmem:[%s6906_s1 + $0x8c] ss:$16 sps:$4 sm:$0xff]   ;;  %v3660_v15 = vld [vmem:[%s6906_s1 + $0x80] ss:$16 sps:$4 sm:$0xff]  }
   0x6   :  { %v3661_v16 = vld [vmem:[%s6906_s1 + $0x88] ss:$16 sps:$4 sm:$0xff]   ;;  %v3662_v17 = vld [vmem:[%s6906_s1 + $0x64] ss:$16 sps:$4 sm:$0xff]   ;;  %v3664_v18 = vld [vmem:[%s6906_s1 + $0x6c] ss:$16 sps:$4 sm:$0xff]  }
   0x7   :  { %288 = vmatpush1.bf16.msra.mxu0 %v3648_v7  ;;  %361 = vmatpush1.bf16.msra.mxu1 %v3649_v8  ;;  %v3666_v19 = vld [vmem:[%s6906_s1 + $0x60] ss:$16 sps:$4 sm:$0xff]   ;;  %v3667_v20 = vld [vmem:[%s6906_s1 + $0x68] ss:$16 sps:$4 sm:$0xff]   ;;  %v3668_v21 = vld [vmem:[%s6906_s1 + $0x44] ss:$16 sps:$4 sm:$0xff]  }
   0x8   :  { %289 = vmatprep.subr.bf16.mxu0 %v3650_v9  ;;  %362 = vmatprep.subr.bf16.mxu1 %v3652_v10  ;;  %v3670_v22 = vld [vmem:[%s6906_s1 + $0x4c] ss:$16 sps:$4 sm:$0xff]   ;;  %v3672_v23 = vld [vmem:[%s6906_s1 + $0x40] ss:$16 sps:$4 sm:$0xff]   ;;  %v3673_v24 = vld [vmem:[%s6906_s1 + $0x48] ss:$16 sps:$4 sm:$0xff]  }
   0x9   :  { %v3674_v25 = vld [vmem:[%s6906_s1 + $0x24] ss:$16 sps:$4 sm:$0xff]   ;;  %v3676_v26 = vld [vmem:[%s6906_s1 + $0x2c] ss:$16 sps:$4 sm:$0xff]   ;;  %v3678_v27 = vld [vmem:[%s6906_s1 + $0x20] ss:$16 sps:$4 sm:$0xff]  }
   0xa   :  { %v3679_v28 = vld [vmem:[%s6906_s1 + $0x28] ss:$16 sps:$4 sm:$0xff]   ;;  %v3680_v29 = vld [vmem:[%s6906_s1 + $0x4] ss:$16 sps:$4 sm:$0xff]   ;;  %v3682_v30 = vld [vmem:[%s6906_s1 + $0xc] ss:$16 sps:$4 sm:$0xff]  }
   0xb   :  { %290 = vmatpush1.bf16.msra.mxu0 %v3654_v11  ;;  %363 = vmatpush1.bf16.msra.mxu1 %v3655_v12  ;;  %v3684_v31 = vld [vmem:[%s6906_s1] ss:$16 sps:$4 sm:$0xff]   ;;  %v3685_v32 = vld [vmem:[%s6906_s1 + $0x8] ss:$16 sps:$4 sm:$0xff]   ;;  %v4339_v33 = vld [vmem:[%s6908_s2 + $0xe4] ss:$16 sps:$4 sm:$0xff]  }
   0xc   :  { %291 = vmatprep.subr.bf16.mxu0 %v3656_v13  ;;  %364 = vmatprep.subr.bf16.mxu1 %v3658_v14  ;;  %v4344_v34 = vld [vmem:[%s6908_s2 + $0xec] ss:$16 sps:$4 sm:$0xff]   ;;  %v3686_v35 = vld [vmem:[%s6907_s0] sm:$0xff]   ;;  %v4357_v37 = vld [vmem:[%s6908_s2 + $0xe8] ss:$16 sps:$4 sm:$0xff]   ;;  %v6918_v6 = vmov 0.0|0.0  }
   0xd   :  { %v4352_v36 = vld [vmem:[%s6908_s2 + $0xe0] ss:$16 sps:$4 sm:$0xff]   ;;  %v4364_v38 = vld [vmem:[%s6908_s2 + $0xc4] ss:$16 sps:$4 sm:$0xff]   ;;  %v4369_v39 = vld [vmem:[%s6908_s2 + $0xcc] ss:$16 sps:$4 sm:$0xff]  }
   0xe   :  { %v4374_v40 = vld [vmem:[%s6908_s2 + $0xc0] ss:$16 sps:$4 sm:$0xff]   ;;  %v4381_v41 = vld [vmem:[%s6908_s2 + $0xc8] ss:$16 sps:$4 sm:$0xff]   ;;  %v4388_v42 = vld [vmem:[%s6908_s2 + $0xa4] ss:$16 sps:$4 sm:$0xff]  }
   0xf   :  { %292 = vmatpush1.bf16.msra.mxu0 %v3660_v15  ;;  %365 = vmatpush1.bf16.msra.mxu1 %v3661_v16  ;;  %v4393_v43 = vld [vmem:[%s6908_s2 + $0xac] ss:$16 sps:$4 sm:$0xff]   ;;  %v4403_v45 = vld [vmem:[%s6908_s2 + $0xa0] ss:$16 sps:$4 sm:$0xff]   ;;  %v4408_v46 = vld [vmem:[%s6908_s2 + $0xa8] ss:$16 sps:$4 sm:$0xff]  }
  0x10   :  { %293 = vmatprep.subr.bf16.mxu0 %v3662_v17  ;;  %366 = vmatprep.subr.bf16.mxu1 %v3664_v18  ;;  %v3699_v44 = vld [vmem:[%s6907_s0 + $0x8] sm:$0xff]   ;;  %v4415_v47 = vld [vmem:[%s6908_s2 + $0x84] ss:$16 sps:$4 sm:$0xff]   ;;  %v4427_v49 = vld [vmem:[%s6908_s2 + $0x80] ss:$16 sps:$4 sm:$0xff]  }
  0x11   :  { %v4422_v48 = vld [vmem:[%s6908_s2 + $0x8c] ss:$16 sps:$4 sm:$0xff]   ;;  %v4432_v50 = vld [vmem:[%s6908_s2 + $0x88] ss:$16 sps:$4 sm:$0xff]   ;;  %v4439_v51 = vld [vmem:[%s6908_s2 + $0x64] ss:$16 sps:$4 sm:$0xff]  }
  0x12   :  { %v4446_v52 = vld [vmem:[%s6908_s2 + $0x6c] ss:$16 sps:$4 sm:$0xff]   ;;  %v3712_v53 = vld [vmem:[%s6907_s0 + $0x10] sm:$0xff]   ;;  %v4463_v55 = vld [vmem:[%s6908_s2 + $0x68] ss:$16 sps:$4 sm:$0xff]  }
  0x13   :  { %294 = vmatpush1.bf16.msra.mxu0 %v3666_v19  ;;  %367 = vmatpush1.bf16.msra.mxu1 %v3667_v20  ;;  %v4458_v54 = vld [vmem:[%s6908_s2 + $0x60] ss:$16 sps:$4 sm:$0xff]   ;;  %v4470_v56 = vld [vmem:[%s6908_s2 + $0x44] ss:$16 sps:$4 sm:$0xff]   ;;  %v4475_v57 = vld [vmem:[%s6908_s2 + $0x4c] ss:$16 sps:$4 sm:$0xff]  }
  0x14   :  { %295 = vmatprep.subr.bf16.mxu0 %v3668_v21  ;;  %368 = vmatprep.subr.bf16.mxu1 %v3670_v22  ;;  %v4482_v58 = vld [vmem:[%s6908_s2 + $0x40] ss:$16 sps:$4 sm:$0xff]   ;;  %v4487_v59 = vld [vmem:[%s6908_s2 + $0x48] ss:$16 sps:$4 sm:$0xff]   ;;  %v4494_v60 = vld [vmem:[%s6908_s2 + $0x24] ss:$16 sps:$4 sm:$0xff]  }
  0x15   :  { %v4499_v61 = vld [vmem:[%s6908_s2 + $0x2c] ss:$16 sps:$4 sm:$0xff]   ;;  %v4511_v63 = vld [vmem:[%s6908_s2 + $0x20] ss:$16 sps:$4 sm:$0xff]   ;;  %v4516_v0 = vld [vmem:[%s6908_s2 + $0x28] ss:$16 sps:$4 sm:$0xff]  }
  0x16   :  { %v3725_v62 = vld [vmem:[%s6907_s0 + $0x18] sm:$0xff]   ;;  %v4523_v2 = vld [vmem:[%s6908_s2 + $0x4] ss:$16 sps:$4 sm:$0xff]   ;;  %v4535_v4 = vld [vmem:[%s6908_s2] ss:$16 sps:$4 sm:$0xff]  }
  0x17   :  { %296 = vmatpush1.bf16.msra.mxu0 %v3672_v23  ;;  %369 = vmatpush1.bf16.msra.mxu1 %v3673_v24  ;;  %v4528_v3 = vld [vmem:[%s6908_s2 + $0xc] ss:$16 sps:$4 sm:$0xff]   ;;  %v4540_v5 = vld [vmem:[%s6908_s2 + $0x8] ss:$16 sps:$4 sm:$0xff]   ;;  %v4555_v7 = vld [vmem:[%s6909_s5 + $0xe4] ss:$16 sps:$4 sm:$0xff]  }
  0x18   :  { %297 = vmatprep.subr.bf16.mxu0 %v3674_v25  ;;  %370 = vmatprep.subr.bf16.mxu1 %v3676_v26  ;;  %v4560_v8 = vld [vmem:[%s6909_s5 + $0xe0] ss:$16 sps:$4 sm:$0xff]   ;;  %v4567_v9 = vld [vmem:[%s6909_s5 + $0xec] ss:$16 sps:$4 sm:$0xff]   ;;  %v4572_v10 = vld [vmem:[%s6909_s5 + $0xc4] ss:$16 sps:$4 sm:$0xff]  }
  0x19   :  { %v4577_v11 = vld [vmem:[%s6909_s5 + $0xe8] ss:$16 sps:$4 sm:$0xff]   ;;  %v4582_v12 = vld [vmem:[%s6909_s5 + $0xc0] ss:$16 sps:$4 sm:$0xff]   ;;  %v4591_v13 = vld [vmem:[%s6909_s5 + $0xcc] ss:$16 sps:$4 sm:$0xff]  }
  0x1a   :  { %v4596_v14 = vld [vmem:[%s6909_s5 + $0xa4] ss:$16 sps:$4 sm:$0xff]   ;;  %v4601_v15 = vld [vmem:[%s6909_s5 + $0xc8] ss:$16 sps:$4 sm:$0xff]   ;;  %v4606_v16 = vld [vmem:[%s6909_s5 + $0xa0] ss:$16 sps:$4 sm:$0xff]  }
  0x1b   :  { %298 = vmatpush1.bf16.msra.mxu0 %v3678_v27  ;;  %371 = vmatpush1.bf16.msra.mxu1 %v3679_v28  ;;  %7185 = vst [vmem:[#allocation8_spill] sm:$0xff] %v4606_v16  ;;  %v4615_v17 = vld [vmem:[%s6909_s5 + $0xac] ss:$16 sps:$4 sm:$0xff]   ;;  %v4620_v18 = vld [vmem:[%s6909_s5 + $0x84] ss:$16 sps:$4 sm:$0xff]  }
  0x1c   :  { %299 = vmatprep.subr.bf16.mxu0 %v3680_v29  ;;  %372 = vmatprep.subr.bf16.mxu1 %v3682_v30  ;;  %7186 = vst [vmem:[#allocation9_spill] sm:$0xff] %v4615_v17  ;;  %7187 = vst [vmem:[#allocation10_spill] sm:$0xff] %v4620_v18  ;;  %v4625_v19 = vld [vmem:[%s6909_s5 + $0xa8] ss:$16 sps:$4 sm:$0xff]   ;;  %v4630_v20 = vld [vmem:[%s6909_s5 + $0x80] ss:$16 sps:$4 sm:$0xff]  }
  0x1d   :  { %7188 = vst [vmem:[#allocation11_spill] sm:$0xff] %v4625_v19  ;;  %7189 = vst [vmem:[#allocation12_spill] sm:$0xff] %v4630_v20  ;;  %v4639_v21 = vld [vmem:[%s6909_s5 + $0x8c] ss:$16 sps:$4 sm:$0xff]   ;;  %v4644_v22 = vld [vmem:[%s6909_s5 + $0x64] ss:$16 sps:$4 sm:$0xff]  }
  0x1e   :  { %7190 = vst [vmem:[#allocation13_spill] sm:$0xff] %v4639_v21  ;;  %7191 = vst [vmem:[#allocation14_spill] sm:$0xff] %v4644_v22  ;;  %v4649_v23 = vld [vmem:[%s6909_s5 + $0x88] ss:$16 sps:$4 sm:$0xff]   ;;  %v4654_v24 = vld [vmem:[%s6909_s5 + $0x60] ss:$16 sps:$4 sm:$0xff]  }
  0x1f   :  { %300 = vmatpush1.bf16.msra.mxu0 %v3684_v31  ;;  %373 = vmatpush1.bf16.msra.mxu1 %v3685_v32  ;;  %7192 = vst [vmem:[#allocation15_spill] sm:$0xff] %v4649_v23  ;;  %7193 = vst [vmem:[#allocation16_spill] sm:$0xff] %v4654_v24  ;;  %v4663_v25 = vld [vmem:[%s6909_s5 + $0x6c] ss:$16 sps:$4 sm:$0xff]   ;;  %v4668_v26 = vld [vmem:[%s6909_s5 + $0x44] ss:$16 sps:$4 sm:$0xff]  }
  0x20   :  { %690 = vmatprep.subr.bf16.mxu0 %v4339_v33  ;;  %731 = vmatprep.subr.bf16.mxu1 %v4344_v34  ;;  %7194 = vst [vmem:[#allocation17_spill] sm:$0xff] %v4663_v25  ;;  %7195 = vst [vmem:[#allocation18_spill] sm:$0xff] %v4668_v26  ;;  %v4673_v27 = vld [vmem:[%s6909_s5 + $0x68] ss:$16 sps:$4 sm:$0xff]   ;;  %v4680_v28 = vld [vmem:[%s6909_s5 + $0x40] ss:$16 sps:$4 sm:$0xff]  }
  0x21   :  { %7196 = vst [vmem:[#allocation19_spill] sm:$0xff] %v4673_v27  ;;  %7197 = vst [vmem:[#allocation20_spill] sm:$0xff] %v4680_v28  ;;  %v4687_v29 = vld [vmem:[%s6909_s5 + $0x4c] ss:$16 sps:$4 sm:$0xff]   ;;  %v4692_v30 = vld [vmem:[%s6909_s5 + $0x24] ss:$16 sps:$4 sm:$0xff]  }
  0x22   :  { %318 = vmatmul.mubr.bf16.vlgmr.msra.gmra.mxu0 %v3686_v35  ;;  %391 = vmatmul.mubr.bf16.vlgmr.msra.gmra.mxu1 %v3686_v35  ;;  %7198 = vst [vmem:[#allocation21_spill] sm:$0xff] %v4687_v29  ;;  %7199 = vst [vmem:[#allocation22_spill] sm:$0xff] %v4692_v30  ;;  %v4697_v31 = vld [vmem:[%s6909_s5 + $0x48] ss:$16 sps:$4 sm:$0xff]   ;;  %v4702_v32 = vld [vmem:[%s6909_s5 + $0x20] ss:$16 sps:$4 sm:$0xff]  }
  0x23   :  { %691 = vmatpush1.bf16.msra.mxu0 %v4352_v36  ;;  %732 = vmatpush1.bf16.msra.mxu1 %v4357_v37  ;;  %7200 = vst [vmem:[#allocation23_spill] sm:$0xff] %v4697_v31  ;;  %7201 = vst [vmem:[#allocation24_spill] sm:$0xff] %v4702_v32  ;;  %v4711_v35 = vld [vmem:[%s6909_s5 + $0x2c] ss:$16 sps:$4 sm:$0xff]  }
  0x24   :  { %692 = vmatprep.subr.bf16.mxu0 %v4364_v38  ;;  %733 = vmatprep.subr.bf16.mxu1 %v4369_v39  ;;  %7202 = vst [vmem:[#allocation25_spill] sm:$0xff] %v4711_v35 }
  0x25   :  { %327 = vmatprep.mubr.bf16.mxu0 %v6916_v1  ;;  %400 = vmatprep.mubr.bf16.mxu1 %v6916_v1 }
  0x27   :  { %693 = vmatpush1.bf16.msra.mxu0 %v4374_v40  ;;  %734 = vmatpush1.bf16.msra.mxu1 %v4381_v41 }
  0x28   :  { %694 = vmatprep.subr.bf16.mxu0 %v4388_v42  ;;  %735 = vmatprep.subr.bf16.mxu1 %v4393_v43 }
  0x2a   :  { %328 = vmatmul.mubr.bf16.gmra.mxu0 %v3699_v44  ;;  %401 = vmatmul.mubr.bf16.gmra.mxu1 %v3699_v44  ;;  %v4716_v44 = vld [vmem:[%s6909_s5 + $0x4] ss:$16 sps:$4 sm:$0xff]  }
  0x2b   :  { %695 = vmatpush1.bf16.msra.mxu0 %v4403_v45  ;;  %736 = vmatpush1.bf16.msra.mxu1 %v4408_v46  ;;  %7203 = vst [vmem:[#allocation26_spill] sm:$0xff] %v4716_v44 }
  0x2c   :  { %696 = vmatprep.subr.bf16.mxu0 %v4415_v47  ;;  %737 = vmatprep.subr.bf16.mxu1 %v4422_v48 }
  0x2d   :  { %337 = vmatprep.mubr.bf16.mxu0 %v6916_v1  ;;  %410 = vmatprep.mubr.bf16.mxu1 %v6916_v1 }
  0x2f   :  { %697 = vmatpush1.bf16.msra.mxu0 %v4427_v49  ;;  %738 = vmatpush1.bf16.msra.mxu1 %v4432_v50 }
  0x30   :  { %698 = vmatprep.subr.bf16.mxu0 %v4439_v51  ;;  %739 = vmatprep.subr.bf16.mxu1 %v4446_v52 }
  0x32   :  { %338 = vmatmul.mubr.bf16.gmra.mxu0 %v3712_v53  ;;  %411 = vmatmul.mubr.bf16.gmra.mxu1 %v3712_v53  ;;  %v4721_v53 = vld [vmem:[%s6909_s5 + $0x28] ss:$16 sps:$4 sm:$0xff]  }
  0x33   :  { %699 = vmatpush1.bf16.msra.mxu0 %v4458_v54  ;;  %740 = vmatpush1.bf16.msra.mxu1 %v4463_v55  ;;  %7204 = vst [vmem:[#allocation27_spill] sm:$0xff] %v4721_v53 }
  0x34   :  { %700 = vmatprep.subr.bf16.mxu0 %v4470_v56  ;;  %741 = vmatprep.subr.bf16.mxu1 %v4475_v57 }
  0x35   :  { %347 = vmatprep.mubr.bf16.mxu0 %v6916_v1  ;;  %420 = vmatprep.mubr.bf16.mxu1 %v6916_v1 }
  0x37   :  { %701 = vmatpush1.bf16.msra.mxu0 %v4482_v58  ;;  %742 = vmatpush1.bf16.msra.mxu1 %v4487_v59 }
  0x38   :  { %702 = vmatprep.subr.bf16.mxu0 %v4494_v60  ;;  %743 = vmatprep.subr.bf16.mxu1 %v4499_v61 }
  0x3a   :  { %348 = vmatmul.mubr.bf16.gmra.mxu0 %v3725_v62  ;;  %421 = vmatmul.mubr.bf16.gmra.mxu1 %v3725_v62  ;;  %v4726_v62 = vld [vmem:[%s6909_s5] ss:$16 sps:$4 sm:$0xff]  }
  0x3b   :  { %703 = vmatpush1.bf16.msra.mxu0 %v4511_v63  ;;  %744 = vmatpush1.bf16.msra.mxu1 %v4516_v0  ;;  %7205 = vst [vmem:[#allocation28_spill] sm:$0xff] %v4726_v62 }
  0x3c   :  { %704 = vmatprep.subr.bf16.mxu0 %v4523_v2  ;;  %745 = vmatprep.subr.bf16.mxu1 %v4528_v3 }
  0x3d   :  { %722 = vmatprep.mubr.bf16.mxu0 %v6916_v1  ;;  %763 = vmatprep.mubr.bf16.mxu1 %v6916_v1 }
  0x3f   :  { %705 = vmatpush1.bf16.msra.mxu0 %v4535_v4  ;;  %746 = vmatpush1.bf16.msra.mxu1 %v4540_v5 }
  0x40   :  { %1020 = vmatprep.subr.bf16.mxu0 %v4555_v7  ;;  %1061 = vmatprep.subr.bf16.mxu1 %v4567_v9 }
  0x42   :  { %723 = vmatmul.mubr.bf16.vlgmr.msra.gmra.mxu0 %v6918_v6  ;;  %764 = vmatmul.mubr.bf16.vlgmr.msra.gmra.mxu1 %v6918_v6  ;;  %v4740_v6 = vld [vmem:[%s6909_s5 + $0x8] ss:$16 sps:$4 sm:$0xff]  }
  0x43   :  { %1052 = vmatprep.mubr.bf16.mxu0 %v6916_v1  ;;  %1093 = vmatprep.mubr.bf16.mxu1 %v6916_v1  ;;  %v4735_v1 = vld [vmem:[%s6909_s5 + $0xc] ss:$16 sps:$4 sm:$0xff]   ;;  %7207 = vst [vmem:[#allocation30_spill] sm:$0xff] %v4740_v6 }
  0x44   :  { %1021 = vmatpush1.bf16.msra.mxu0 %v4560_v8  ;;  %1062 = vmatpush1.bf16.msra.mxu1 %v4577_v11  ;;  %7206 = vst [vmem:[#allocation29_spill] sm:$0xff] %v4735_v1 }
  0x45   :  { %1022 = vmatprep.subr.bf16.mxu0 %v4572_v10  ;;  %1063 = vmatprep.subr.bf16.mxu1 %v4591_v13 }
  0x48   :  { %1023 = vmatpush1.bf16.msra.mxu0 %v4582_v12  ;;  %1064 = vmatpush1.bf16.msra.mxu1 %v4601_v15 }
  0x49   :  { %1024 = vmatprep.subr.bf16.mxu0 %v4596_v14  ;;  %1065 = vmatprep.subr.bf16.mxu1 %v4615_v17 }
  0x4c   :  { %1025 = vmatpush1.bf16.msra.mxu0 %v4606_v16  ;;  %1066 = vmatpush1.bf16.msra.mxu1 %v4625_v19 }
  0x4d   :  { %1026 = vmatprep.subr.bf16.mxu0 %v4620_v18  ;;  %1067 = vmatprep.subr.bf16.mxu1 %v4639_v21 }
  0x50   :  { %1027 = vmatpush1.bf16.msra.mxu0 %v4630_v20  ;;  %1068 = vmatpush1.bf16.msra.mxu1 %v4649_v23 }
  0x51   :  { %1028 = vmatprep.subr.bf16.mxu0 %v4644_v22  ;;  %1069 = vmatprep.subr.bf16.mxu1 %v4663_v25 }
  0x54   :  { %1029 = vmatpush1.bf16.msra.mxu0 %v4654_v24  ;;  %1070 = vmatpush1.bf16.msra.mxu1 %v4673_v27 }
  0x55   :  { %1030 = vmatprep.subr.bf16.mxu0 %v4668_v26  ;;  %1071 = vmatprep.subr.bf16.mxu1 %v4687_v29 }
  0x58   :  { %1031 = vmatpush1.bf16.msra.mxu0 %v4680_v28  ;;  %1072 = vmatpush1.bf16.msra.mxu1 %v4697_v31 }
  0x59   :  { %1032 = vmatprep.subr.bf16.mxu0 %v4692_v30  ;;  %1073 = vmatprep.subr.bf16.mxu1 %v4711_v35  ;;  %v4804_v35 = vld [vmem:[%s6910_s4 + $0xac] ss:$16 sps:$4 sm:$0xff]   ;;  %v4867_v30 = vld [vmem:[%s6910_s4 + $0x44] ss:$16 sps:$4 sm:$0xff]  }
  0x5a   :  { %7219 = vst [vmem:[#allocation40_spill] sm:$0xff] %v4804_v35  ;;  %7230 = vst [vmem:[#allocation51_spill] sm:$0xff] %v4867_v30 }
  0x5c   :  { %1033 = vmatpush1.bf16.msra.mxu0 %v4702_v32  ;;  %1074 = vmatpush1.bf16.msra.mxu1 %v4721_v53  ;;  %v7208_v32 = vmov 0.0|0.0   ;;  %v4754_v53 = vld [vmem:[%s6910_s4 + $0xec] ss:$16 sps:$4 sm:$0xff]  }
  0x5d   :  { %1034 = vmatprep.subr.bf16.mxu0 %v4716_v44  ;;  %1075 = vmatprep.subr.bf16.mxu1 %v4735_v1  ;;  %v7209_v44 = vmov 0   ;;  %7211 = vst [vmem:[#allocation32_spill] sm:$0xff] %v4754_v53  ;;  %v4766_v1 = vld [vmem:[%s6910_s4 + $0xe8] ss:$16 sps:$4 sm:$0xff]  }
  0x5e   :  { %7213 = vst [vmem:[#allocation34_spill] sm:$0xff] %v4766_v1 }
  0x60   :  { %1035 = vmatpush1.bf16.msra.mxu0 %v4726_v62  ;;  %1076 = vmatpush1.bf16.msra.mxu1 %v4740_v6  ;;  %v4749_v62 = vld [vmem:[%s6910_s4 + $0xe4] ss:$16 sps:$4 sm:$0xff]   ;;  %v4761_v6 = vld [vmem:[%s6910_s4 + $0xe0] ss:$16 sps:$4 sm:$0xff]  }
  0x61   :  { %7210 = vst [vmem:[#allocation31_spill] sm:$0xff] %v4749_v62  ;;  %1262 = vmatprep.subr.bf16.mxu0 %v4749_v62  ;;  %7212 = vst [vmem:[#allocation33_spill] sm:$0xff] %v4761_v6  ;;  %1303 = vmatprep.subr.bf16.mxu1 %v4754_v53  ;;  %v4780_v62 = vld [vmem:[%s6910_s4 + $0xcc] ss:$16 sps:$4 sm:$0xff]   ;;  %v4785_v53 = vld [vmem:[%s6910_s4 + $0xc0] ss:$16 sps:$4 sm:$0xff]  }
  0x62   :  { %7215 = vst [vmem:[#allocation36_spill] sm:$0xff] %v4780_v62  ;;  %7216 = vst [vmem:[#allocation37_spill] sm:$0xff] %v4785_v53 }
  0x63   :  { %1053 = vmatmul.mubr.bf16.vlgmr.msra.gmra.mxu0 %v7208_v32  ;;  %1094 = vmatmul.mubr.bf16.vlgmr.msra.gmra.mxu1 %v7208_v32  ;;  %v4775_v32 = vld [vmem:[%s6910_s4 + $0xc4] ss:$16 sps:$4 sm:$0xff]  }
  0x64   :  { %1294 = vmatprep.mubr.bf16.mxu0 %v7209_v44  ;;  %1335 = vmatprep.mubr.bf16.mxu1 %v7209_v44  ;;  %7214 = vst [vmem:[#allocation35_spill] sm:$0xff] %v4775_v32 }
  0x65   :  { %1263 = vmatpush1.bf16.msra.mxu0 %v4761_v6  ;;  %1304 = vmatpush1.bf16.msra.mxu1 %v4766_v1  ;;  %v4790_v6 = vld [vmem:[%s6910_s4 + $0xc8] ss:$16 sps:$4 sm:$0xff]   ;;  %v4799_v1 = vld [vmem:[%s6910_s4 + $0xa4] ss:$16 sps:$4 sm:$0xff]  }
  0x66   :  { %7217 = vst [vmem:[#allocation38_spill] sm:$0xff] %v4790_v6  ;;  %1264 = vmatprep.subr.bf16.mxu0 %v4775_v32  ;;  %1305 = vmatprep.subr.bf16.mxu1 %v4780_v62  ;;  %7218 = vst [vmem:[#allocation39_spill] sm:$0xff] %v4799_v1  ;;  %v4809_v32 = vld [vmem:[%s6910_s4 + $0xa0] ss:$16 sps:$4 sm:$0xff]   ;;  %v4828_v62 = vld [vmem:[%s6910_s4 + $0x8c] ss:$16 sps:$4 sm:$0xff]  }
  0x67   :  { %7220 = vst [vmem:[#allocation41_spill] sm:$0xff] %v4809_v32  ;;  %7223 = vst [vmem:[#allocation44_spill] sm:$0xff] %v4828_v62 }
  0x69   :  { %1265 = vmatpush1.bf16.msra.mxu0 %v4785_v53  ;;  %1306 = vmatpush1.bf16.msra.mxu1 %v4790_v6  ;;  %v4814_v53 = vld [vmem:[%s6910_s4 + $0xa8] ss:$16 sps:$4 sm:$0xff]   ;;  %v4823_v6 = vld [vmem:[%s6910_s4 + $0x84] ss:$16 sps:$4 sm:$0xff]  }
  0x6a   :  { %7221 = vst [vmem:[#allocation42_spill] sm:$0xff] %v4814_v53  ;;  %1266 = vmatprep.subr.bf16.mxu0 %v4799_v1  ;;  %1307 = vmatprep.subr.bf16.mxu1 %v4804_v35  ;;  %7222 = vst [vmem:[#allocation43_spill] sm:$0xff] %v4823_v6  ;;  %v4833_v1 = vld [vmem:[%s6910_s4 + $0x80] ss:$16 sps:$4 sm:$0xff]   ;;  %v4850_v35 = vld [vmem:[%s6910_s4 + $0x6c] ss:$16 sps:$4 sm:$0xff]  }
  0x6b   :  { %7224 = vst [vmem:[#allocation45_spill] sm:$0xff] %v4833_v1  ;;  %7227 = vst [vmem:[#allocation48_spill] sm:$0xff] %v4850_v35 }
  0x6d   :  { %1267 = vmatpush1.bf16.msra.mxu0 %v4809_v32  ;;  %1308 = vmatpush1.bf16.msra.mxu1 %v4814_v53  ;;  %v4838_v32 = vld [vmem:[%s6910_s4 + $0x88] ss:$16 sps:$4 sm:$0xff]   ;;  %v4845_v53 = vld [vmem:[%s6910_s4 + $0x64] ss:$16 sps:$4 sm:$0xff]  }
  0x6e   :  { %7225 = vst [vmem:[#allocation46_spill] sm:$0xff] %v4838_v32  ;;  %1268 = vmatprep.subr.bf16.mxu0 %v4823_v6  ;;  %1309 = vmatprep.subr.bf16.mxu1 %v4828_v62  ;;  %7226 = vst [vmem:[#allocation47_spill] sm:$0xff] %v4845_v53  ;;  %v4857_v6 = vld [vmem:[%s6910_s4 + $0x60] ss:$16 sps:$4 sm:$0xff]   ;;  %v4862_v62 = vld [vmem:[%s6910_s4 + $0x68] ss:$16 sps:$4 sm:$0xff]  }
  0x6f   :  { %7228 = vst [vmem:[#allocation49_spill] sm:$0xff] %v4857_v6  ;;  %7229 = vst [vmem:[#allocation50_spill] sm:$0xff] %v4862_v62 }
  0x71   :  { %1269 = vmatpush1.bf16.msra.mxu0 %v4833_v1  ;;  %1310 = vmatpush1.bf16.msra.mxu1 %v4838_v32  ;;  %v4874_v32 = vld [vmem:[%s6910_s4 + $0x4c] ss:$16 sps:$4 sm:$0xff]   ;;  %v4881_v1 = vld [vmem:[%s6910_s4 + $0x40] ss:$16 sps:$4 sm:$0xff]  }
  0x72   :  { %1270 = vmatprep.subr.bf16.mxu0 %v4845_v53  ;;  %1311 = vmatprep.subr.bf16.mxu1 %v4850_v35  ;;  %7231 = vst [vmem:[#allocation52_spill] sm:$0xff] %v4874_v32  ;;  %7232 = vst [vmem:[#allocation53_spill] sm:$0xff] %v4881_v1  ;;  %v4886_v53 = vld [vmem:[%s6910_s4 + $0x48] ss:$16 sps:$4 sm:$0xff]  }
  0x73   :  { %7233 = vst [vmem:[#allocation54_spill] sm:$0xff] %v4886_v53 }
  0x75   :  { %1271 = vmatpush1.bf16.msra.mxu0 %v4857_v6  ;;  %1312 = vmatpush1.bf16.msra.mxu1 %v4862_v62  ;;  %v4893_v6 = vld [vmem:[%s6910_s4 + $0x24] ss:$16 sps:$4 sm:$0xff]   ;;  %v4898_v62 = vld [vmem:[%s6910_s4 + $0x2c] ss:$16 sps:$4 sm:$0xff]  }
  0x76   :  { %1272 = vmatprep.subr.bf16.mxu0 %v4867_v30  ;;  %1313 = vmatprep.subr.bf16.mxu1 %v4874_v32  ;;  %7234 = vst [vmem:[#allocation55_spill] sm:$0xff] %v4893_v6  ;;  %7235 = vst [vmem:[#allocation56_spill] sm:$0xff] %v4898_v62  ;;  %v4905_v30 = vld [vmem:[%s6910_s4 + $0x20] ss:$16 sps:$4 sm:$0xff]   ;;  %v4910_v32 = vld [vmem:[%s6910_s4 + $0x28] ss:$16 sps:$4 sm:$0xff]  }
  0x77   :  { %7236 = vst [vmem:[#allocation57_spill] sm:$0xff] %v4905_v30  ;;  %7237 = vst [vmem:[#allocation58_spill] sm:$0xff] %v4910_v32 }
  0x79   :  { %1273 = vmatpush1.bf16.msra.mxu0 %v4881_v1  ;;  %1314 = vmatpush1.bf16.msra.mxu1 %v4886_v53  ;;  %v4917_v1 = vld [vmem:[%s6910_s4 + $0x4] ss:$16 sps:$4 sm:$0xff]   ;;  %v4922_v53 = vld [vmem:[%s6910_s4 + $0xc] ss:$16 sps:$4 sm:$0xff]  }
  0x7a   :  { %1274 = vmatprep.subr.bf16.mxu0 %v4893_v6  ;;  %1315 = vmatprep.subr.bf16.mxu1 %v4898_v62  ;;  %7238 = vst [vmem:[#allocation59_spill] sm:$0xff] %v4917_v1  ;;  %7239 = vst [vmem:[#allocation60_spill] sm:$0xff] %v4922_v53  ;;  %v4929_v6 = vld [vmem:[%s6910_s4] ss:$16 sps:$4 sm:$0xff]   ;;  %v4934_v62 = vld [vmem:[%s6910_s4 + $0x8] ss:$16 sps:$4 sm:$0xff]  }
  0x7b   :  { %7240 = vst [vmem:[#allocation61_spill] sm:$0xff] %v4929_v6  ;;  %7241 = vst [vmem:[#allocation62_spill] sm:$0xff] %v4934_v62 }
  0x7d   :  { %1275 = vmatpush1.bf16.msra.mxu0 %v4905_v30  ;;  %1316 = vmatpush1.bf16.msra.mxu1 %v4910_v32  ;;  %v81_v32 = vlaneseq }
  0x7e   :  { %1276 = vmatprep.subr.bf16.mxu0 %v4917_v1  ;;  %1317 = vmatprep.subr.bf16.mxu1 %v4922_v53  ;;  %v79_v53 = vld [vmem:[%s6911_s3] sm:$0xf] }
  0x7f   :  { %v4942_v30 = vshrl.u32 %v81_v32, 7 }
  0x81   :  { %1277 = vmatpush1.bf16.msra.mxu0 %v4929_v6  ;;  %1318 = vmatpush1.bf16.msra.mxu1 %v4934_v62  ;;  %7242 = vst [vmem:[#allocation63_spill] sm:$0xff] %v4942_v30  ;;  %v6994_v35 = vsub.s32 2, %v4942_v30  ;;  %v7003_v31 = vsub.s32 0, %v4942_v30  ;;  %v7243_v29 = vsub.s32 3, %v4942_v30 }
  0x82   :  { %1374 = vmatprep.subr.bf16.mxu0 %v4339_v33  ;;  %1415 = vmatprep.subr.bf16.mxu1 %v4344_v34  ;;  %v7008_v34 = vsub.s32 1, %v4942_v30 }
  0x83   :  { %v4956_v33 = vrot.slane %v79_v53, %v6994_v35  ;;  %v84_v28 = vrot.slane %v79_v53, %v7003_v31  ;;  %v4967_v26 = vrot.slane %v79_v53, %v7243_v29 }
  0x84   :  { %v88_v25 = vrot.slane %v79_v53, %v7008_v34 }
  0xe2   :  { %v4950_v6 = vpop.f32.mrf.mxu0  ;;  %v4952_v62 = vpop.f32.mrf.mxu1 }
  0xe4   :  { %v4959_v32 = vpop.f32.mrf.mxu0  ;;  %v4961_v1 = vpop.f32.mrf.mxu1 }
  0xe5   :  { %v395_v17 = vadd.f32 %v4961_v1, %v4967_v26 }
  0xe6   :  { %v323_v27 = vpop.f32.mrf.mxu0  ;;  %v396_v24 = vpop.f32.mrf.mxu1 }
  0xe7   :  { %v4971_v35 = vadd.f32 %v323_v27, %v84_v28  ;;  %v4974_v22 = vadd.f32 %v396_v24, %v4956_v33 }
  0xe8   :  { %v325_v23 = vpop.f32.mrf.mxu0  ;;  %v398_v20 = vpop.f32.mrf.mxu1 }
  0xe9   :  { %7244 = vst [vmem:[#allocation64_spill] sm:$0xff] %v4971_v35  ;;  %7245 = vst [vmem:[#allocation65_spill] sm:$0xff] %v4974_v22  ;;  %v4976_v21 = vadd.f32 %v325_v23, %v88_v25  ;;  %v4979_v31 = vadd.f32 %v398_v20, %v4967_v26 }
  0xea   :  { %v329_v18 = vpop.f32.mrf.mxu0  ;;  %v402_v29 = vpop.f32.mrf.mxu1 }
  0xeb   :  { %7246 = vst [vmem:[#allocation66_spill] sm:$0xff] %v4976_v21  ;;  %7247 = vst [vmem:[#allocation67_spill] sm:$0xff] %v4979_v31  ;;  %v4981_v19 = vadd.f32 %v329_v18, %v84_v28  ;;  %v4984_v16 = vadd.f32 %v402_v29, %v4956_v33 }
  0xec   :  { %v331_v53 = vpop.f32.mrf.mxu0  ;;  %v404_v27 = vpop.f32.mrf.mxu1 }
  0xed   :  { %7248 = vst [vmem:[#allocation68_spill] sm:$0xff] %v4981_v19  ;;  %7249 = vst [vmem:[#allocation69_spill] sm:$0xff] %v4984_v16  ;;  %v4986_v34 = vadd.f32 %v331_v53, %v88_v25  ;;  %v4989_v24 = vadd.f32 %v404_v27, %v4967_v26 }
  0xee   :  { %v333_v22 = vpop.f32.mrf.mxu0  ;;  %v406_v23 = vpop.f32.mrf.mxu1 }
  0xef   :  { %7250 = vst [vmem:[#allocation70_spill] sm:$0xff] %v4986_v34  ;;  %7251 = vst [vmem:[#allocation71_spill] sm:$0xff] %v4989_v24  ;;  %v4991_v21 = vadd.f32 %v333_v22, %v84_v28  ;;  %v4994_v20 = vadd.f32 %v406_v23, %v4956_v33 }
  0xf0   :  { %v335_v31 = vpop.f32.mrf.mxu0  ;;  %v408_v18 = vpop.f32.mrf.mxu1 }
  0xf1   :  { %7252 = vst [vmem:[#allocation72_spill] sm:$0xff] %v4991_v21  ;;  %7253 = vst [vmem:[#allocation73_spill] sm:$0xff] %v4994_v20  ;;  %v4996_v19 = vadd.f32 %v335_v31, %v88_v25  ;;  %v4999_v29 = vadd.f32 %v408_v18, %v4967_v26 }
  0xf2   :  { %v339_v16 = vpop.f32.mrf.mxu0  ;;  %v412_v53 = vpop.f32.mrf.mxu1 }
  0xf3   :  { %7254 = vst [vmem:[#allocation74_spill] sm:$0xff] %v4996_v19  ;;  %7255 = vst [vmem:[#allocation75_spill] sm:$0xff] %v4999_v29  ;;  %v5001_v34 = vadd.f32 %v339_v16, %v84_v28  ;;  %v5004_v27 = vadd.f32 %v412_v53, %v4956_v33 }
  0xf4   :  { %v341_v24 = vpop.f32.mrf.mxu0  ;;  %v414_v22 = vpop.f32.mrf.mxu1 }
  0xf5   :  { %7256 = vst [vmem:[#allocation76_spill] sm:$0xff] %v5001_v34  ;;  %7257 = vst [vmem:[#allocation77_spill] sm:$0xff] %v5004_v27  ;;  %v5006_v21 = vadd.f32 %v341_v24, %v88_v25  ;;  %v5009_v23 = vadd.f32 %v414_v22, %v4967_v26 }
  0xf6   :  { %v343_v20 = vpop.f32.mrf.mxu0  ;;  %v416_v31 = vpop.f32.mrf.mxu1 }
  0xf7   :  { %7258 = vst [vmem:[#allocation78_spill] sm:$0xff] %v5006_v21  ;;  %7259 = vst [vmem:[#allocation79_spill] sm:$0xff] %v5009_v23  ;;  %v5011_v19 = vadd.f32 %v343_v20, %v84_v28  ;;  %v5014_v18 = vadd.f32 %v416_v31, %v4956_v33 }
  0xf8   :  { %v345_v29 = vpop.f32.mrf.mxu0  ;;  %v418_v16 = vpop.f32.mrf.mxu1 }
  0xf9   :  { %7260 = vst [vmem:[#allocation80_spill] sm:$0xff] %v5011_v19  ;;  %7261 = vst [vmem:[#allocation81_spill] sm:$0xff] %v5014_v18  ;;  %v5016_v34 = vadd.f32 %v345_v29, %v88_v25  ;;  %v5019_v53 = vadd.f32 %v418_v16, %v4967_v26 }
  0xfa   :  { %v349_v27 = vpop.f32.mrf.mxu0  ;;  %v422_v24 = vpop.f32.mrf.mxu1 }
  0xfb   :  { %7262 = vst [vmem:[#allocation82_spill] sm:$0xff] %v5016_v34  ;;  %7263 = vst [vmem:[#allocation83_spill] sm:$0xff] %v5019_v53  ;;  %v5021_v21 = vadd.f32 %v349_v27, %v84_v28  ;;  %v5024_v22 = vadd.f32 %v422_v24, %v4956_v33 }
  0xfc   :  { %v351_v23 = vpop.f32.mrf.mxu0  ;;  %v424_v20 = vpop.f32.mrf.mxu1 }
  0xfd   :  { %7264 = vst [vmem:[#allocation84_spill] sm:$0xff] %v5021_v21  ;;  %7265 = vst [vmem:[#allocation85_spill] sm:$0xff] %v5024_v22  ;;  %v5026_v19 = vadd.f32 %v351_v23, %v88_v25  ;;  %v5029_v31 = vadd.f32 %v424_v20, %v4967_v26  ;;  %v320_v21 = vadd.f32 %v4950_v6, %v84_v28 }
  0xfe   :  { %v353_v18 = vpop.f32.mrf.mxu0  ;;  %v426_v29 = vpop.f32.mrf.mxu1  ;;  %v322_v20 = vadd.f32 %v4959_v32, %v88_v25 }
  0xff   :  { %7266 = vst [vmem:[#allocation86_spill] sm:$0xff] %v5026_v19  ;;  %7267 = vst [vmem:[#allocation87_spill] sm:$0xff] %v5029_v31  ;;  %v5031_v34 = vadd.f32 %v353_v18, %v84_v28  ;;  %v5034_v16 = vadd.f32 %v426_v29, %v4956_v33 }
 0x100   :  { %v355_v53 = vpop.f32.mrf.mxu0  ;;  %v428_v27 = vpop.f32.mrf.mxu1 }
 0x101   :  { %7268 = vst [vmem:[#allocation88_spill] sm:$0xff] %v5031_v34  ;;  %7269 = vst [vmem:[#allocation89_spill] sm:$0xff] %v5034_v16  ;;  %v5037_v24 = vadd.f32 %v355_v53, %v88_v25  ;;  %v5040_v22 = vadd.f32 %v428_v27, %v4967_v26 }
 0x102   :  { %v724_v23 = vpop.f32.mrf.mxu0  ;;  %v765_v19 = vpop.f32.mrf.mxu1 }
 0x103   :  { %7270 = vst [vmem:[#allocation90_spill] sm:$0xff] %v5037_v24  ;;  %7271 = vst [vmem:[#allocation91_spill] sm:$0xff] %v5040_v22  ;;  %v772_v31 = vadd.f32 %v724_v23, %v320_v21  ;;  %v393_v22 = vadd.f32 %v4952_v62, %v4956_v33  ;;  %v5323_v24 = vld [vmem:[%s6908_s2 + $0x4c] ss:$16 sps:$4 sm:$0xff]  }
 0x104   :  { %v726_v35 = vpop.f32.mrf.mxu0  ;;  %v767_v18 = vpop.f32.mrf.mxu1 }
 0x105   :  { %v776_v34 = vmul.f32 0.5, %v772_v31  ;;  %v773_v30 = vadd.f32 %v726_v35, %v322_v20  ;;  %v775_v27 = vadd.f32 %v767_v18, %v395_v17  ;;  %v774_v21 = vadd.f32 %v765_v19, %v393_v22 }
 0x106   :  { %v728_v29 = vpop.f32.mrf.mxu0  ;;  %v769_v16 = vpop.f32.mrf.mxu1 }
 0x107   :  { %3834 = vtanh.f32 %v776_v34  ;;  %v777_v6 = vmul.f32 0.5, %v773_v30  ;;  %v778_v25 = vmul.f32 0.5, %v774_v21 }
 0x108   :  { %v729_v28 = vpop.f32.mrf.mxu0  ;;  %v770_v53 = vpop.f32.mrf.mxu1 }
 0x109   :  { %3836 = vtanh.f32 %v777_v6 }
 0x10a   :  { %3838 = vtanh.f32 %v775_v27 }
 0x10b   :  { %3840 = vtanh.f32 %v778_v25 }
 0x114   :  { %v3835_v32 = vpop.eup %3834 }
 0x115   :  { %v782_v31 = vmul.f32 0.5, %v3835_v32 }
 0x116   :  { %v3837_v35 = vpop.eup %3836 }
 0x117   :  { %v785_v23 = vadd.f32 0.5, %v782_v31  ;;  %v783_v16 = vmul.f32 0.5, %v3837_v35  ;;  %v3839_v1 = vpop.eup %3838 }
 0x118   :  { %v3841_v17 = vpop.eup %3840 }
 0x119   :  { %v786_v20 = vadd.f32 0.5, %v783_v16  ;;  %v790_v30 = vmul.f32 %v3839_v1, %v785_v23  ;;  %v784_v18 = vmul.f32 0.5, %v3841_v17 }
 0x11b   :  { %v789_v26 = vmul.f32 0.0, %v786_v20  ;;  %v787_v62 = vadd.f32 0.5, %v784_v18 }
 0x11d   :  { %v5047_v34 = vadd.f32 %v790_v30, %v789_v26 }
 0x11f   :  { %3842 = vtanh.f32 %v5047_v34 }
 0x12c   :  { %v3843_v33 = vpop.eup %3842 }
 0x12d   :  { %v793_v19 = vmul.f32 %v3843_v33, %v787_v62 }
 0x12f   :  { %v794_v22 = vpack.c.bf16 %v793_v19, %v793_v19 }
 0x131   :  { %1295 = vmatmul.mubr.bf16.vlgmr.msra.gmra.mxu0 %v794_v22  ;;  %1336 = vmatmul.mubr.bf16.vlgmr.msra.gmra.mxu1 %v794_v22 }
 0x132   :  { %1375 = vmatpush1.bf16.msra.mxu0 %v4352_v36  ;;  %1416 = vmatpush1.bf16.msra.mxu1 %v4357_v37  ;;  %v1054_v36 = vpop.f32.mrf.mxu0 }
 0x133   :  { %1376 = vmatprep.subr.bf16.mxu0 %v4364_v38  ;;  %1417 = vmatprep.subr.bf16.mxu1 %v4369_v39  ;;  %v1095_v39 = vpop.f32.mrf.mxu1 }
 0x134   :  { %1406 = vmatprep.mubr.bf16.mxu0 %v7209_v44  ;;  %1447 = vmatprep.mubr.bf16.mxu1 %v7209_v44  ;;  %v1056_v37 = vpop.f32.mrf.mxu0 }
 0x136   :  { %1377 = vmatpush1.bf16.msra.mxu0 %v4374_v40  ;;  %1418 = vmatpush1.bf16.msra.mxu1 %v4381_v41  ;;  %v1058_v38 = vpop.f32.mrf.mxu0  ;;  %v1097_v41 = vpop.f32.mrf.mxu1 }
 0x137   :  { %1378 = vmatprep.subr.bf16.mxu0 %v4388_v42  ;;  %1419 = vmatprep.subr.bf16.mxu1 %v4393_v43  ;;  %v7272_v43 = vld [vmem:[#allocation9_spill] sm:$0xff] }
 0x138   :  { %v1059_v40 = vpop.f32.mrf.mxu0  ;;  %v1099_v42 = vpop.f32.mrf.mxu1 }
 0x13a   :  { %1379 = vmatpush1.bf16.msra.mxu0 %v4403_v45  ;;  %1420 = vmatpush1.bf16.msra.mxu1 %v4408_v46  ;;  %v1100_v45 = vpop.f32.mrf.mxu1  ;;  %v7273_v46 = vld [vmem:[#allocation8_spill] sm:$0xff] }
 0x13b   :  { %1380 = vmatprep.subr.bf16.mxu0 %v4415_v47  ;;  %1421 = vmatprep.subr.bf16.mxu1 %v4422_v48  ;;  %v7274_v47 = vld [vmem:[#allocation11_spill] sm:$0xff]  ;;  %v7275_v48 = vld [vmem:[#allocation10_spill] sm:$0xff] }
 0x13e   :  { %1381 = vmatpush1.bf16.msra.mxu0 %v4427_v49  ;;  %1422 = vmatpush1.bf16.msra.mxu1 %v4432_v50  ;;  %v7276_v49 = vld [vmem:[#allocation13_spill] sm:$0xff]  ;;  %v7277_v50 = vld [vmem:[#allocation12_spill] sm:$0xff] }
 0x13f   :  { %1382 = vmatprep.subr.bf16.mxu0 %v4439_v51  ;;  %1423 = vmatprep.subr.bf16.mxu1 %v4446_v52  ;;  %v7278_v51 = vld [vmem:[#allocation15_spill] sm:$0xff]  ;;  %v7279_v52 = vld [vmem:[#allocation14_spill] sm:$0xff]  ;;  %7341 = vst [vmem:[#allocation12_spill] sm:$0xff] %v5323_v24 }
 0x142   :  { %1383 = vmatpush1.bf16.msra.mxu0 %v4458_v54  ;;  %1424 = vmatpush1.bf16.msra.mxu1 %v4463_v55  ;;  %v7280_v54 = vld [vmem:[#allocation17_spill] sm:$0xff]  ;;  %v7281_v55 = vld [vmem:[#allocation16_spill] sm:$0xff] }
 0x143   :  { %1384 = vmatprep.subr.bf16.mxu0 %v4470_v56  ;;  %1425 = vmatprep.subr.bf16.mxu1 %v4475_v57  ;;  %v7282_v56 = vld [vmem:[#allocation19_spill] sm:$0xff]  ;;  %v7283_v57 = vld [vmem:[#allocation18_spill] sm:$0xff] }
 0x146   :  { %1385 = vmatpush1.bf16.msra.mxu0 %v4482_v58  ;;  %1426 = vmatpush1.bf16.msra.mxu1 %v4487_v59  ;;  %v7284_v58 = vld [vmem:[#allocation21_spill] sm:$0xff]  ;;  %v7285_v59 = vld [vmem:[#allocation20_spill] sm:$0xff] }
 0x147   :  { %1386 = vmatprep.subr.bf16.mxu0 %v4494_v60  ;;  %1427 = vmatprep.subr.bf16.mxu1 %v4499_v61  ;;  %v7286_v60 = vld [vmem:[#allocation23_spill] sm:$0xff]  ;;  %v7287_v61 = vld [vmem:[#allocation22_spill] sm:$0xff] }
 0x14a   :  { %1387 = vmatpush1.bf16.msra.mxu0 %v4511_v63  ;;  %1428 = vmatpush1.bf16.msra.mxu1 %v4516_v0  ;;  %v7288_v63 = vld [vmem:[#allocation25_spill] sm:$0xff]  ;;  %v7289_v0 = vld [vmem:[#allocation24_spill] sm:$0xff] }
 0x14b   :  { %1388 = vmatprep.subr.bf16.mxu0 %v4523_v2  ;;  %1429 = vmatprep.subr.bf16.mxu1 %v4528_v3  ;;  %v7290_v2 = vld [vmem:[#allocation27_spill] sm:$0xff]  ;;  %v7291_v3 = vld [vmem:[#allocation26_spill] sm:$0xff] }
 0x14e   :  { %1389 = vmatpush1.bf16.msra.mxu0 %v4535_v4  ;;  %1430 = vmatpush1.bf16.msra.mxu1 %v4540_v5  ;;  %v7292_v4 = vld [vmem:[#allocation29_spill] sm:$0xff]  ;;  %v7293_v5 = vld [vmem:[#allocation28_spill] sm:$0xff] }
 0x14f   :  { %1480 = vmatprep.subr.bf16.mxu0 %v4555_v7  ;;  %1521 = vmatprep.subr.bf16.mxu1 %v4567_v9  ;;  %v7294_v7 = vld [vmem:[#allocation30_spill] sm:$0xff]  ;;  %v7296_v9 = vld [vmem:[#allocation32_spill] sm:$0xff] }
 0x151   :  { %1407 = vmatmul.mubr.bf16.vlgmr.msra.gmra.mxu0 %v794_v22  ;;  %1448 = vmatmul.mubr.bf16.vlgmr.msra.gmra.mxu1 %v794_v22 }
 0x152   :  { %1481 = vmatpush1.bf16.msra.mxu0 %v4560_v8  ;;  %1522 = vmatpush1.bf16.msra.mxu1 %v4577_v11  ;;  %v7295_v8 = vld [vmem:[#allocation31_spill] sm:$0xff] }
 0x153   :  { %1482 = vmatprep.subr.bf16.mxu0 %v4572_v10  ;;  %1523 = vmatprep.subr.bf16.mxu1 %v4591_v13  ;;  %v463_v10 = vld [vmem:[%s6912_s6] sm:$0xf]  ;;  %v7297_v11 = vld [vmem:[#allocation63_spill] sm:$0xff] }
 0x154   :  { %1512 = vmatprep.mubr.bf16.mxu0 %v7209_v44  ;;  %1553 = vmatprep.mubr.bf16.mxu1 %v7209_v44  ;;  %v7299_v6 = vsub.s32 1, %v7297_v11  ;;  %v7300_v16 = vsub.s32 3, %v7297_v11  ;;  %v7301_v62 = vsub.s32 2, %v7297_v11 }
 0x156   :  { %1483 = vmatpush1.bf16.msra.mxu0 %v4582_v12  ;;  %1524 = vmatpush1.bf16.msra.mxu1 %v4601_v15  ;;  %v7298_v12 = vsub.s32 0, %v7297_v11  ;;  %v5127_v28 = vrot.slane %v463_v10, %v7299_v6  ;;  %v5133_v20 = vrot.slane %v463_v10, %v7300_v16  ;;  %v5138_v33 = vrot.slane %v463_v10, %v7301_v62  ;;  %v7302_v11 = vld [vmem:[#allocation64_spill] sm:$0xff]  ;;  %v7305_v62 = vld [vmem:[#allocation65_spill] sm:$0xff] }
 0x157   :  { %1484 = vmatprep.subr.bf16.mxu0 %v4596_v14  ;;  %1525 = vmatprep.subr.bf16.mxu1 %v7272_v43 }
 0x158   :  { %v5123_v13 = vrot.slane %v463_v10, %v7298_v12 }
 0x15a   :  { %1485 = vmatpush1.bf16.msra.mxu0 %v7273_v46  ;;  %1526 = vmatpush1.bf16.msra.mxu1 %v7274_v47 }
 0x15b   :  { %1486 = vmatprep.subr.bf16.mxu0 %v7275_v48  ;;  %1527 = vmatprep.subr.bf16.mxu1 %v7276_v49 }
 0x15e   :  { %1487 = vmatpush1.bf16.msra.mxu0 %v7277_v50  ;;  %1528 = vmatpush1.bf16.msra.mxu1 %v7278_v51 }
 0x15f   :  { %1488 = vmatprep.subr.bf16.mxu0 %v7279_v52  ;;  %1529 = vmatprep.subr.bf16.mxu1 %v7280_v54 }
 0x162   :  { %1489 = vmatpush1.bf16.msra.mxu0 %v7281_v55  ;;  %1530 = vmatpush1.bf16.msra.mxu1 %v7282_v56 }
 0x163   :  { %1490 = vmatprep.subr.bf16.mxu0 %v7283_v57  ;;  %1531 = vmatprep.subr.bf16.mxu1 %v7284_v58 }
 0x166   :  { %1491 = vmatpush1.bf16.msra.mxu0 %v7285_v59  ;;  %1532 = vmatpush1.bf16.msra.mxu1 %v7286_v60 }
 0x167   :  { %1492 = vmatprep.subr.bf16.mxu0 %v7287_v61  ;;  %1533 = vmatprep.subr.bf16.mxu1 %v7288_v63 }
 0x16a   :  { %1493 = vmatpush1.bf16.msra.mxu0 %v7289_v0  ;;  %1534 = vmatpush1.bf16.msra.mxu1 %v7290_v2 }
 0x16b   :  { %1494 = vmatprep.subr.bf16.mxu0 %v7291_v3  ;;  %1535 = vmatprep.subr.bf16.mxu1 %v7292_v4 }
 0x16e   :  { %1495 = vmatpush1.bf16.msra.mxu0 %v7293_v5  ;;  %1536 = vmatpush1.bf16.msra.mxu1 %v7294_v7 }
 0x16f   :  { %1562 = vmatprep.subr.bf16.mxu0 %v7295_v8  ;;  %1603 = vmatprep.subr.bf16.mxu1 %v7296_v9 }
 0x1f1   :  { %v1296_v14 = vpop.f32.mrf.mxu0  ;;  %v1337_v15 = vpop.f32.mrf.mxu1 }
 0x1f2   :  { %v1297_v29 = vadd.f32 %v1296_v14, %v1054_v36  ;;  %v1338_v19 = vadd.f32 %v1337_v15, %v1095_v39 }
 0x1f3   :  { %v1298_v53 = vpop.f32.mrf.mxu0  ;;  %v1339_v27 = vpop.f32.mrf.mxu1 }
 0x1f4   :  { %v1344_v21 = vadd.f32 %v1297_v29, %v5123_v13  ;;  %v1299_v25 = vadd.f32 %v1298_v53, %v1056_v37  ;;  %v1340_v1 = vadd.f32 %v1339_v27, %v1097_v41  ;;  %v1346_v22 = vadd.f32 %v1338_v19, %v5138_v33  ;;  %v7303_v27 = vld [vmem:[#allocation66_spill] sm:$0xff] }
 0x1f5   :  { %v1300_v32 = vpop.f32.mrf.mxu0  ;;  %v1341_v31 = vpop.f32.mrf.mxu1 }
 0x1f6   :  { %v1348_v35 = vmul.f32 0.5, %v1344_v21  ;;  %v1345_v23 = vadd.f32 %v1299_v25, %v5127_v28  ;;  %v1347_v18 = vadd.f32 %v1340_v1, %v5133_v20  ;;  %v1350_v36 = vmul.f32 0.5, %v1346_v22 }
 0x1f7   :  { %v1301_v26 = vpop.f32.mrf.mxu0  ;;  %v1342_v30 = vpop.f32.mrf.mxu1 }
 0x1f8   :  { %3844 = vtanh.f32 %v1348_v35  ;;  %v1349_v17 = vmul.f32 0.5, %v1345_v23  ;;  %v7304_v23 = vld [vmem:[#allocation67_spill] sm:$0xff] }
 0x1fa   :  { %3846 = vtanh.f32 %v1349_v17 }
 0x1fb   :  { %3848 = vtanh.f32 %v1347_v18 }
 0x1fc   :  { %3850 = vtanh.f32 %v1350_v36 }
 0x205   :  { %v3845_v37 = vpop.eup %3844 }
 0x206   :  { %v1354_v38 = vmul.f32 0.5, %v3845_v37 }
 0x207   :  { %v3847_v40 = vpop.eup %3846 }
 0x208   :  { %v1357_v41 = vadd.f32 0.5, %v1354_v38  ;;  %v1355_v42 = vmul.f32 0.5, %v3847_v40  ;;  %v3849_v46 = vpop.eup %3848  ;;  %v7307_v40 = vld [vmem:[#allocation33_spill] sm:$0xff] }
 0x209   :  { %v3851_v25 = vpop.eup %3850 }
 0x20a   :  { %v1358_v45 = vadd.f32 0.5, %v1355_v42  ;;  %v1362_v12 = vmul.f32 %v3849_v46, %v1357_v41  ;;  %v1356_v30 = vmul.f32 0.5, %v3851_v25  ;;  %v7308_v41 = vld [vmem:[#allocation34_spill] sm:$0xff]  ;;  %v7310_v46 = vld [vmem:[#allocation36_spill] sm:$0xff]  ;;  %v7315_v25 = vld [vmem:[#allocation41_spill] sm:$0xff] }
 0x20c   :  { %v1361_v48 = vmul.f32 0.0, %v1358_v45  ;;  %v1359_v17 = vadd.f32 0.5, %v1356_v30  ;;  %v7309_v45 = vld [vmem:[#allocation35_spill] sm:$0xff]  ;;  %v7322_v30 = vld [vmem:[#allocation48_spill] sm:$0xff] }
 0x20e   :  { %v5141_v14 = vadd.f32 %v1362_v12, %v1361_v48 }
 0x210   :  { %3852 = vtanh.f32 %v5141_v14 }
 0x211   :  { %v1408_v10 = vpop.f32.mrf.mxu0  ;;  %v1449_v39 = vpop.f32.mrf.mxu1 }
 0x212   :  { %v1456_v15 = vadd.f32 %v1408_v10, %v7302_v11  ;;  %v1458_v19 = vadd.f32 %v1449_v39, %v7305_v62  ;;  %v7311_v11 = vld [vmem:[#allocation37_spill] sm:$0xff]  ;;  %v7325_v62 = vld [vmem:[#allocation51_spill] sm:$0xff] }
 0x213   :  { %v1410_v29 = vpop.f32.mrf.mxu0  ;;  %v1451_v6 = vpop.f32.mrf.mxu1 }
 0x214   :  { %v1460_v53 = vmul.f32 0.5, %v1456_v15  ;;  %v1457_v21 = vadd.f32 %v1410_v29, %v7303_v27  ;;  %v1459_v16 = vadd.f32 %v1451_v6, %v7304_v23  ;;  %v1462_v37 = vmul.f32 0.5, %v1458_v19  ;;  %v7312_v15 = vld [vmem:[#allocation38_spill] sm:$0xff]  ;;  %v7314_v27 = vld [vmem:[#allocation40_spill] sm:$0xff] }
 0x215   :  { %v1412_v32 = vpop.f32.mrf.mxu0  ;;  %v1453_v31 = vpop.f32.mrf.mxu1  ;;  %v7318_v23 = vld [vmem:[#allocation44_spill] sm:$0xff] }
 0x216   :  { %3854 = vtanh.f32 %v1460_v53  ;;  %v1461_v35 = vmul.f32 0.5, %v1457_v21  ;;  %v7313_v53 = vld [vmem:[#allocation39_spill] sm:$0xff]  ;;  %v7316_v32 = vld [vmem:[#allocation42_spill] sm:$0xff]  ;;  %v7326_v19 = vld [vmem:[#allocation52_spill] sm:$0xff] }
 0x217   :  { %v1413_v1 = vpop.f32.mrf.mxu0  ;;  %v1454_v26 = vpop.f32.mrf.mxu1 }
 0x218   :  { %3856 = vtanh.f32 %v1461_v35  ;;  %v7317_v35 = vld [vmem:[#allocation43_spill] sm:$0xff]  ;;  %v7320_v1 = vld [vmem:[#allocation46_spill] sm:$0xff] }
 0x219   :  { %3858 = vtanh.f32 %v1459_v16  ;;  %v7319_v16 = vld [vmem:[#allocation45_spill] sm:$0xff]  ;;  %v7321_v26 = vld [vmem:[#allocation47_spill] sm:$0xff] }
 0x21a   :  { %3860 = vtanh.f32 %v1462_v37  ;;  %v7327_v37 = vld [vmem:[#allocation53_spill] sm:$0xff] }
 0x21d   :  { %v3853_v18 = vpop.eup %3852 }
 0x21e   :  { %v5148_v22 = vmul.f32 %v3853_v18, %v1359_v17  ;;  %v7323_v17 = vld [vmem:[#allocation49_spill] sm:$0xff]  ;;  %v7324_v18 = vld [vmem:[#allocation50_spill] sm:$0xff] }
 0x220   :  { %7306 = vst [vmem:[#allocation9_spill] sm:$0xff] %v5148_v22  ;;  %v1479_v36 = vpack.c.bf16 %v5148_v22, %v5148_v22  ;;  %v5329_v22 = vld [vmem:[%s6908_s2 + $0x40] ss:$16 sps:$4 sm:$0xff]  }
 0x221   :  { %7342 = vst [vmem:[#allocation15_spill] sm:$0xff] %v5329_v22 }
 0x222   :  { %1513 = vmatmul.mubr.bf16.vlgmr.msra.gmra.mxu0 %v1479_v36  ;;  %1554 = vmatmul.mubr.bf16.vlgmr.msra.gmra.mxu1 %v1479_v36 }
 0x223   :  { %v3855_v38 = vpop.eup %3854  ;;  %1563 = vmatpush1.bf16.msra.mxu0 %v7307_v40  ;;  %1604 = vmatpush1.bf16.msra.mxu1 %v7308_v41  ;;  %v7329_v40 = vld [vmem:[#allocation55_spill] sm:$0xff]  ;;  %v7330_v41 = vld [vmem:[#allocation56_spill] sm:$0xff] }
 0x224   :  { %v1466_v42 = vmul.f32 0.5, %v3855_v38  ;;  %1564 = vmatprep.subr.bf16.mxu0 %v7309_v45  ;;  %1605 = vmatprep.subr.bf16.mxu1 %v7310_v46  ;;  %v7328_v38 = vld [vmem:[#allocation54_spill] sm:$0xff]  ;;  %v7331_v46 = vld [vmem:[#allocation57_spill] sm:$0xff] }
 0x225   :  { %v3857_v48 = vpop.eup %3856  ;;  %1594 = vmatprep.mubr.bf16.mxu0 %v7209_v44  ;;  %1635 = vmatprep.mubr.bf16.mxu1 %v7209_v44 }
 0x226   :  { %v1469_v12 = vadd.f32 0.5, %v1466_v42  ;;  %v1467_v10 = vmul.f32 0.5, %v3857_v48  ;;  %v3859_v39 = vpop.eup %3858  ;;  %v7332_v48 = vld [vmem:[#allocation58_spill] sm:$0xff] }
 0x227   :  { %1565 = vmatpush1.bf16.msra.mxu0 %v7311_v11  ;;  %1606 = vmatpush1.bf16.msra.mxu1 %v7312_v15  ;;  %v7335_v11 = vld [vmem:[#allocation61_spill] sm:$0xff]  ;;  %v7336_v15 = vld [vmem:[#allocation62_spill] sm:$0xff] }
 0x228   :  { %v1470_v29 = vadd.f32 0.5, %v1467_v10  ;;  %v1474_v6 = vmul.f32 %v3859_v39, %v1469_v12  ;;  %1566 = vmatprep.subr.bf16.mxu0 %v7313_v53  ;;  %1607 = vmatprep.subr.bf16.mxu1 %v7314_v27  ;;  %v7333_v12 = vld [vmem:[#allocation59_spill] sm:$0xff]  ;;  %v7334_v10 = vld [vmem:[#allocation60_spill] sm:$0xff] }
 0x229   :  { %v5199_v53 = vld [vmem:[%s6908_s2 + $0xec] ss:$16 sps:$4 sm:$0xff]   ;;  %v5207_v27 = vld [vmem:[%s6908_s2 + $0xe0] ss:$16 sps:$4 sm:$0xff]  }
 0x22a   :  { %v1473_v21 = vmul.f32 %v1470_v29, %v5047_v34  ;;  %v3861_v34 = vpop.eup %3860 }
 0x22b   :  { %1567 = vmatpush1.bf16.msra.mxu0 %v7315_v25  ;;  %1608 = vmatpush1.bf16.msra.mxu1 %v7316_v32  ;;  %v1468_v36 = vmul.f32 0.5, %v3861_v34  ;;  %v5219_v25 = vld [vmem:[%s6908_s2 + $0xc4] ss:$16 sps:$4 sm:$0xff]   ;;  %v5225_v32 = vld [vmem:[%s6908_s2 + $0xcc] ss:$16 sps:$4 sm:$0xff]  }
 0x22c   :  { %v5165_v31 = vadd.f32 %v1474_v6, %v1473_v21  ;;  %1568 = vmatprep.subr.bf16.mxu0 %v7317_v35  ;;  %1609 = vmatprep.subr.bf16.mxu1 %v7318_v23  ;;  %v5193_v6 = vld [vmem:[%s6908_s2 + $0xe4] ss:$16 sps:$4 sm:$0xff]   ;;  %v5213_v21 = vld [vmem:[%s6908_s2 + $0xe8] ss:$16 sps:$4 sm:$0xff]   ;;  %v5233_v35 = vld [vmem:[%s6908_s2 + $0xc0] ss:$16 sps:$4 sm:$0xff]  }
 0x22d   :  { %v1471_v42 = vadd.f32 0.5, %v1468_v36  ;;  %v5239_v23 = vld [vmem:[%s6908_s2 + $0xc8] ss:$16 sps:$4 sm:$0xff]   ;;  %v5269_v34 = vld [vmem:[%s6908_s2 + $0x84] ss:$16 sps:$4 sm:$0xff]  }
 0x22e   :  { %3862 = vtanh.f32 %v5165_v31  ;;  %v5299_v36 = vld [vmem:[%s6908_s2 + $0x6c] ss:$16 sps:$4 sm:$0xff]  }
 0x22f   :  { %1569 = vmatpush1.bf16.msra.mxu0 %v7319_v16  ;;  %1610 = vmatpush1.bf16.msra.mxu1 %v7320_v1  ;;  %v5245_v16 = vld [vmem:[%s6908_s2 + $0xa4] ss:$16 sps:$4 sm:$0xff]   ;;  %v5251_v1 = vld [vmem:[%s6908_s2 + $0xac] ss:$16 sps:$4 sm:$0xff]   ;;  %7337 = vst [vmem:[#allocation8_spill] sm:$0xff] %v5299_v36 }
 0x230   :  { %1570 = vmatprep.subr.bf16.mxu0 %v7321_v26  ;;  %1611 = vmatprep.subr.bf16.mxu1 %v7322_v30  ;;  %v5257_v26 = vld [vmem:[%s6908_s2 + $0xa0] ss:$16 sps:$4 sm:$0xff]   ;;  %v5263_v30 = vld [vmem:[%s6908_s2 + $0xa8] ss:$16 sps:$4 sm:$0xff]  }
 0x233   :  { %1571 = vmatpush1.bf16.msra.mxu0 %v7323_v17  ;;  %1612 = vmatpush1.bf16.msra.mxu1 %v7324_v18  ;;  %v5275_v17 = vld [vmem:[%s6908_s2 + $0x8c] ss:$16 sps:$4 sm:$0xff]   ;;  %v5281_v18 = vld [vmem:[%s6908_s2 + $0x80] ss:$16 sps:$4 sm:$0xff]  }
 0x234   :  { %1572 = vmatprep.subr.bf16.mxu0 %v7325_v62  ;;  %1613 = vmatprep.subr.bf16.mxu1 %v7326_v19  ;;  %v5287_v62 = vld [vmem:[%s6908_s2 + $0x88] ss:$16 sps:$4 sm:$0xff]   ;;  %v5293_v19 = vld [vmem:[%s6908_s2 + $0x64] ss:$16 sps:$4 sm:$0xff]  }
 0x237   :  { %1573 = vmatpush1.bf16.msra.mxu0 %v7327_v37  ;;  %1614 = vmatpush1.bf16.msra.mxu1 %v7328_v38 }
 0x238   :  { %1574 = vmatprep.subr.bf16.mxu0 %v7329_v40  ;;  %1615 = vmatprep.subr.bf16.mxu1 %v7330_v41 }
 0x23b   :  { %v3863_v45 = vpop.eup %3862  ;;  %1575 = vmatpush1.bf16.msra.mxu0 %v7331_v46  ;;  %1616 = vmatpush1.bf16.msra.mxu1 %v7332_v48 }
 0x23c   :  { %1576 = vmatprep.subr.bf16.mxu0 %v7333_v12  ;;  %1617 = vmatprep.subr.bf16.mxu1 %v7334_v10  ;;  %v1477_v39 = vmul.f32 %v3863_v45, %v1471_v42  ;;  %v5305_v42 = vld [vmem:[%s6908_s2 + $0x60] ss:$16 sps:$4 sm:$0xff]   ;;  %v5311_v45 = vld [vmem:[%s6908_s2 + $0x68] ss:$16 sps:$4 sm:$0xff]  }
 0x23d   :  { %7338 = vst [vmem:[#allocation11_spill] sm:$0xff] %v5305_v42  ;;  %7339 = vst [vmem:[#allocation10_spill] sm:$0xff] %v5311_v45 }
 0x23e   :  { %v5188_v29 = vpack.c.bf16 %v1477_v39, %v1477_v39  ;;  %v5317_v39 = vld [vmem:[%s6908_s2 + $0x44] ss:$16 sps:$4 sm:$0xff]  }
 0x23f   :  { %1577 = vmatpush1.bf16.msra.mxu0 %v7335_v11  ;;  %1618 = vmatpush1.bf16.msra.mxu1 %v7336_v15  ;;  %7340 = vst [vmem:[#allocation13_spill] sm:$0xff] %v5317_v39 }
 0x240   :  { %1674 = vmatprep.subr.bf16.mxu0 %v5193_v6  ;;  %1715 = vmatprep.subr.bf16.mxu1 %v5199_v53 }
 0x242   :  { %1595 = vmatmul.mubr.bf16.vlgmr.msra.gmra.mxu0 %v5188_v29  ;;  %1636 = vmatmul.mubr.bf16.vlgmr.msra.gmra.mxu1 %v5188_v29 }
 0x243   :  { %1675 = vmatpush1.bf16.msra.mxu0 %v5207_v27  ;;  %1716 = vmatpush1.bf16.msra.mxu1 %v5213_v21 }
 0x244   :  { %1676 = vmatprep.subr.bf16.mxu0 %v5219_v25  ;;  %1717 = vmatprep.subr.bf16.mxu1 %v5225_v32 }
 0x245   :  { %1706 = vmatprep.mubr.bf16.mxu0 %v7209_v44  ;;  %1747 = vmatprep.mubr.bf16.mxu1 %v7209_v44 }
 0x247   :  { %1677 = vmatpush1.bf16.msra.mxu0 %v5233_v35  ;;  %1718 = vmatpush1.bf16.msra.mxu1 %v5239_v23 }
 0x248   :  { %1678 = vmatprep.subr.bf16.mxu0 %v5245_v16  ;;  %1719 = vmatprep.subr.bf16.mxu1 %v5251_v1 }
 0x24b   :  { %1679 = vmatpush1.bf16.msra.mxu0 %v5257_v26  ;;  %1720 = vmatpush1.bf16.msra.mxu1 %v5263_v30 }
 0x24c   :  { %1680 = vmatprep.subr.bf16.mxu0 %v5269_v34  ;;  %1721 = vmatprep.subr.bf16.mxu1 %v5275_v17 }
 0x24f   :  { %1681 = vmatpush1.bf16.msra.mxu0 %v5281_v18  ;;  %1722 = vmatpush1.bf16.msra.mxu1 %v5287_v62 }
 0x250   :  { %1682 = vmatprep.subr.bf16.mxu0 %v5293_v19  ;;  %1723 = vmatprep.subr.bf16.mxu1 %v5299_v36 }
 0x253   :  { %1683 = vmatpush1.bf16.msra.mxu0 %v5305_v42  ;;  %1724 = vmatpush1.bf16.msra.mxu1 %v5311_v45  ;;  %v5335_v45 = vld [vmem:[%s6908_s2 + $0x48] ss:$16 sps:$4 sm:$0xff]  }
 0x254   :  { %1684 = vmatprep.subr.bf16.mxu0 %v5317_v39  ;;  %1725 = vmatprep.subr.bf16.mxu1 %v5323_v24  ;;  %7343 = vst [vmem:[#allocation14_spill] sm:$0xff] %v5335_v45  ;;  %v5341_v39 = vld [vmem:[%s6908_s2 + $0x24] ss:$16 sps:$4 sm:$0xff]   ;;  %v5347_v24 = vld [vmem:[%s6908_s2 + $0x2c] ss:$16 sps:$4 sm:$0xff]  }
 0x255   :  { %7344 = vst [vmem:[#allocation17_spill] sm:$0xff] %v5341_v39  ;;  %7345 = vst [vmem:[#allocation16_spill] sm:$0xff] %v5347_v24 }
 0x257   :  { %1685 = vmatpush1.bf16.msra.mxu0 %v5329_v22  ;;  %1726 = vmatpush1.bf16.msra.mxu1 %v5335_v45  ;;  %v5353_v22 = vld [vmem:[%s6908_s2 + $0x20] ss:$16 sps:$4 sm:$0xff]   ;;  %v5359_v45 = vld [vmem:[%s6908_s2 + $0x28] ss:$16 sps:$4 sm:$0xff]  }
 0x258   :  { %1686 = vmatprep.subr.bf16.mxu0 %v5341_v39  ;;  %1727 = vmatprep.subr.bf16.mxu1 %v5347_v24  ;;  %7346 = vst [vmem:[#allocation19_spill] sm:$0xff] %v5353_v22  ;;  %7347 = vst [vmem:[#allocation18_spill] sm:$0xff] %v5359_v45  ;;  %v5365_v39 = vld [vmem:[%s6908_s2 + $0x4] ss:$16 sps:$4 sm:$0xff]   ;;  %v5371_v24 = vld [vmem:[%s6908_s2 + $0xc] ss:$16 sps:$4 sm:$0xff]  }
 0x259   :  { %7348 = vst [vmem:[#allocation21_spill] sm:$0xff] %v5365_v39  ;;  %7349 = vst [vmem:[#allocation20_spill] sm:$0xff] %v5371_v24 }
 0x25b   :  { %1687 = vmatpush1.bf16.msra.mxu0 %v5353_v22  ;;  %1728 = vmatpush1.bf16.msra.mxu1 %v5359_v45  ;;  %v5377_v22 = vld [vmem:[%s6908_s2] ss:$16 sps:$4 sm:$0xff]   ;;  %v5383_v45 = vld [vmem:[%s6908_s2 + $0x8] ss:$16 sps:$4 sm:$0xff]  }
 0x25c   :  { %1688 = vmatprep.subr.bf16.mxu0 %v5365_v39  ;;  %1729 = vmatprep.subr.bf16.mxu1 %v5371_v24  ;;  %7350 = vst [vmem:[#allocation23_spill] sm:$0xff] %v5377_v22  ;;  %7351 = vst [vmem:[#allocation22_spill] sm:$0xff] %v5383_v45  ;;  %v5389_v39 = vld [vmem:[%s6909_s5 + $0xe4] ss:$16 sps:$4 sm:$0xff]   ;;  %v5395_v24 = vld [vmem:[%s6909_s5 + $0xec] ss:$16 sps:$4 sm:$0xff]  }
 0x25d   :  { %7352 = vst [vmem:[#allocation25_spill] sm:$0xff] %v5389_v39  ;;  %7353 = vst [vmem:[#allocation24_spill] sm:$0xff] %v5395_v24 }
 0x25f   :  { %1689 = vmatpush1.bf16.msra.mxu0 %v5377_v22  ;;  %1730 = vmatpush1.bf16.msra.mxu1 %v5383_v45  ;;  %v5403_v45 = vld [vmem:[%s6909_s5 + $0xe0] ss:$16 sps:$4 sm:$0xff]  }
 0x260   :  { %1780 = vmatprep.subr.bf16.mxu0 %v5389_v39  ;;  %1821 = vmatprep.subr.bf16.mxu1 %v5395_v24  ;;  %7354 = vst [vmem:[#allocation27_spill] sm:$0xff] %v5403_v45  ;;  %v5409_v39 = vld [vmem:[%s6909_s5 + $0xe8] ss:$16 sps:$4 sm:$0xff]   ;;  %v5415_v24 = vld [vmem:[%s6909_s5 + $0xc4] ss:$16 sps:$4 sm:$0xff]  }
 0x261   :  { %7355 = vst [vmem:[#allocation26_spill] sm:$0xff] %v5409_v39  ;;  %7356 = vst [vmem:[#allocation29_spill] sm:$0xff] %v5415_v24 }
 0x262   :  { %1707 = vmatmul.mubr.bf16.vlgmr.msra.gmra.mxu0 %v5188_v29  ;;  %1748 = vmatmul.mubr.bf16.vlgmr.msra.gmra.mxu1 %v5188_v29  ;;  %v5421_v29 = vld [vmem:[%s6909_s5 + $0xcc] ss:$16 sps:$4 sm:$0xff]  }
 0x263   :  { %1781 = vmatpush1.bf16.msra.mxu0 %v5403_v45  ;;  %1822 = vmatpush1.bf16.msra.mxu1 %v5409_v39  ;;  %7357 = vst [vmem:[#allocation28_spill] sm:$0xff] %v5421_v29  ;;  %v5429_v39 = vld [vmem:[%s6909_s5 + $0xc0] ss:$16 sps:$4 sm:$0xff]  }
 0x264   :  { %1782 = vmatprep.subr.bf16.mxu0 %v5415_v24  ;;  %1823 = vmatprep.subr.bf16.mxu1 %v5421_v29  ;;  %7358 = vst [vmem:[#allocation30_spill] sm:$0xff] %v5429_v39  ;;  %v5435_v24 = vld [vmem:[%s6909_s5 + $0xc8] ss:$16 sps:$4 sm:$0xff]   ;;  %v5441_v29 = vld [vmem:[%s6909_s5 + $0xa4] ss:$16 sps:$4 sm:$0xff]  }
 0x265   :  { %1812 = vmatprep.mubr.bf16.mxu0 %v7209_v44  ;;  %1853 = vmatprep.mubr.bf16.mxu1 %v7209_v44  ;;  %7359 = vst [vmem:[#allocation31_spill] sm:$0xff] %v5435_v24  ;;  %7360 = vst [vmem:[#allocation32_spill] sm:$0xff] %v5441_v29 }
 0x267   :  { %1783 = vmatpush1.bf16.msra.mxu0 %v5429_v39  ;;  %1824 = vmatpush1.bf16.msra.mxu1 %v5435_v24  ;;  %v5448_v39 = vld [vmem:[%s6909_s5 + $0xa0] ss:$16 sps:$4 sm:$0xff]   ;;  %v5455_v24 = vld [vmem:[%s6909_s5 + $0x84] ss:$16 sps:$4 sm:$0xff]  }
 0x268   :  { %1784 = vmatprep.subr.bf16.mxu0 %v5441_v29  ;;  %1825 = vmatprep.subr.bf16.mxu1 %v7272_v43  ;;  %7361 = vst [vmem:[#allocation63_spill] sm:$0xff] %v5448_v39  ;;  %7362 = vst [vmem:[#allocation64_spill] sm:$0xff] %v5455_v24 }
 0x26b   :  { %1785 = vmatpush1.bf16.msra.mxu0 %v5448_v39  ;;  %1826 = vmatpush1.bf16.msra.mxu1 %v7274_v47 }
 0x26c   :  { %1786 = vmatprep.subr.bf16.mxu0 %v5455_v24  ;;  %1827 = vmatprep.subr.bf16.mxu1 %v7276_v49 }
 0x26f   :  { %1787 = vmatpush1.bf16.msra.mxu0 %v7277_v50  ;;  %1828 = vmatpush1.bf16.msra.mxu1 %v7278_v51 }
 0x270   :  { %1788 = vmatprep.subr.bf16.mxu0 %v7279_v52  ;;  %1829 = vmatprep.subr.bf16.mxu1 %v7280_v54 }
 0x273   :  { %1789 = vmatpush1.bf16.msra.mxu0 %v7281_v55  ;;  %1830 = vmatpush1.bf16.msra.mxu1 %v7282_v56 }
 0x274   :  { %1790 = vmatprep.subr.bf16.mxu0 %v7283_v57  ;;  %1831 = vmatprep.subr.bf16.mxu1 %v7284_v58 }
 0x277   :  { %1791 = vmatpush1.bf16.msra.mxu0 %v7285_v59  ;;  %1832 = vmatpush1.bf16.msra.mxu1 %v7286_v60 }
 0x278   :  { %1792 = vmatprep.subr.bf16.mxu0 %v7287_v61  ;;  %1833 = vmatprep.subr.bf16.mxu1 %v7288_v63 }
 0x27b   :  { %1793 = vmatpush1.bf16.msra.mxu0 %v7289_v0  ;;  %1834 = vmatpush1.bf16.msra.mxu1 %v7290_v2 }
 0x27c   :  { %1794 = vmatprep.subr.bf16.mxu0 %v7291_v3  ;;  %1835 = vmatprep.subr.bf16.mxu1 %v7292_v4 }
 0x27f   :  { %1795 = vmatpush1.bf16.msra.mxu0 %v7293_v5  ;;  %1836 = vmatpush1.bf16.msra.mxu1 %v7294_v7 }
 0x280   :  { %1862 = vmatprep.subr.bf16.mxu0 %v7295_v8  ;;  %1903 = vmatprep.subr.bf16.mxu1 %v7296_v9 }
 0x2e2   :  { %v1514_v43 = vpop.f32.mrf.mxu0  ;;  %v1555_v47 = vpop.f32.mrf.mxu1 }
 0x2e4   :  { %v1516_v49 = vpop.f32.mrf.mxu0  ;;  %v1557_v50 = vpop.f32.mrf.mxu1 }
 0x2e6   :  { %v1518_v51 = vpop.f32.mrf.mxu0  ;;  %v1559_v52 = vpop.f32.mrf.mxu1 }
 0x2e8   :  { %v1519_v54 = vpop.f32.mrf.mxu0  ;;  %v1560_v55 = vpop.f32.mrf.mxu1 }
 0x302   :  { %v1596_v56 = vpop.f32.mrf.mxu0  ;;  %v1637_v57 = vpop.f32.mrf.mxu1 }
 0x303   :  { %v1597_v58 = vadd.f32 %v1596_v56, %v1514_v43  ;;  %v1638_v52 = vadd.f32 %v1637_v57, %v1555_v47 }
 0x304   :  { %v1598_v59 = vpop.f32.mrf.mxu0  ;;  %v1639_v60 = vpop.f32.mrf.mxu1 }
 0x305   :  { %v1644_v61 = vadd.f32 %v1597_v58, %v5123_v13  ;;  %v1599_v63 = vadd.f32 %v1598_v59, %v1516_v49  ;;  %v1640_v5 = vadd.f32 %v1639_v60, %v1557_v50  ;;  %v1646_v43 = vadd.f32 %v1638_v52, %v5138_v33 }
 0x306   :  { %v1600_v0 = vpop.f32.mrf.mxu0  ;;  %v1641_v2 = vpop.f32.mrf.mxu1 }
 0x307   :  { %v1648_v3 = vmul.f32 0.5, %v1644_v61  ;;  %v1645_v4 = vadd.f32 %v1599_v63, %v5127_v28  ;;  %v1647_v51 = vadd.f32 %v1640_v5, %v5133_v20  ;;  %v1650_v54 = vmul.f32 0.5, %v1646_v43  ;;  %v7363_v2 = vld [vmem:[#allocation68_spill] sm:$0xff] }
 0x308   :  { %v1601_v7 = vpop.f32.mrf.mxu0  ;;  %v1642_v8 = vpop.f32.mrf.mxu1 }
 0x309   :  { %3864 = vtanh.f32 %v1648_v3  ;;  %v1649_v9 = vmul.f32 0.5, %v1645_v4  ;;  %v7364_v8 = vld [vmem:[#allocation70_spill] sm:$0xff] }
 0x30b   :  { %3866 = vtanh.f32 %v1649_v9 }
 0x30c   :  { %3868 = vtanh.f32 %v1647_v51 }
 0x30d   :  { %3870 = vtanh.f32 %v1650_v54 }
 0x316   :  { %v3865_v55 = vpop.eup %3864 }
 0x317   :  { %v1654_v49 = vmul.f32 0.5, %v3865_v55 }
 0x318   :  { %v3867_v56 = vpop.eup %3866 }
 0x319   :  { %v1657_v58 = vadd.f32 0.5, %v1654_v49  ;;  %v1655_v59 = vmul.f32 0.5, %v3867_v56  ;;  %v3869_v50 = vpop.eup %3868 }
 0x31a   :  { %v3871_v51 = vpop.eup %3870 }
 0x31b   :  { %v1658_v61 = vadd.f32 0.5, %v1655_v59  ;;  %v1662_v63 = vmul.f32 %v3869_v50, %v1657_v58  ;;  %v1656_v58 = vmul.f32 0.5, %v3871_v51  ;;  %v7366_v50 = vld [vmem:[#allocation69_spill] sm:$0xff] }
 0x31d   :  { %v1661_v60 = vmul.f32 %v1658_v61, %v5141_v14  ;;  %v7365_v14 = vld [vmem:[#allocation71_spill] sm:$0xff]  ;;  %v1659_v59 = vadd.f32 0.5, %v1656_v58 }
 0x31e   :  { %v5542_v58 = vld [vmem:[%s6910_s4 + $0xac] ss:$16 sps:$4 sm:$0xff]  }
 0x31f   :  { %v5484_v0 = vadd.f32 %v1662_v63, %v1661_v60 }
 0x321   :  { %3872 = vtanh.f32 %v5484_v0 }
 0x322   :  { %v1708_v47 = vpop.f32.mrf.mxu0  ;;  %v1749_v57 = vpop.f32.mrf.mxu1 }
 0x323   :  { %v1756_v3 = vadd.f32 %v1708_v47, %v7363_v2  ;;  %v1758_v60 = vadd.f32 %v1749_v57, %v7366_v50  ;;  %v5504_v57 = vld [vmem:[%s6910_s4 + $0xe8] ss:$16 sps:$4 sm:$0xff]  }
 0x324   :  { %v1710_v4 = vpop.f32.mrf.mxu0  ;;  %v1751_v5 = vpop.f32.mrf.mxu1  ;;  %v5555_v50 = vld [vmem:[%s6910_s4 + $0xa8] ss:$16 sps:$4 sm:$0xff]  }
 0x325   :  { %v1760_v7 = vmul.f32 0.5, %v1756_v3  ;;  %v1757_v9 = vadd.f32 %v1710_v4, %v7364_v8  ;;  %v1759_v55 = vadd.f32 %v1751_v5, %v7365_v14  ;;  %v1762_v2 = vmul.f32 0.5, %v1758_v60  ;;  %v5498_v4 = vld [vmem:[%s6910_s4 + $0xe0] ss:$16 sps:$4 sm:$0xff]   ;;  %v5516_v8 = vld [vmem:[%s6910_s4 + $0xcc] ss:$16 sps:$4 sm:$0xff]  }
 0x326   :  { %v1712_v52 = vpop.f32.mrf.mxu0  ;;  %v1753_v43 = vpop.f32.mrf.mxu1  ;;  %v5530_v14 = vld [vmem:[%s6910_s4 + $0xc8] ss:$16 sps:$4 sm:$0xff]  }
 0x327   :  { %3874 = vtanh.f32 %v1760_v7  ;;  %v1761_v54 = vmul.f32 0.5, %v1757_v9  ;;  %v5510_v7 = vld [vmem:[%s6910_s4 + $0xc4] ss:$16 sps:$4 sm:$0xff]  }
 0x328   :  { %v1713_v49 = vpop.f32.mrf.mxu0  ;;  %v1754_v56 = vpop.f32.mrf.mxu1 }
 0x329   :  { %3876 = vtanh.f32 %v1761_v54  ;;  %v5524_v54 = vld [vmem:[%s6910_s4 + $0xc0] ss:$16 sps:$4 sm:$0xff]   ;;  %v5536_v56 = vld [vmem:[%s6910_s4 + $0xa4] ss:$16 sps:$4 sm:$0xff]  }
 0x32a   :  { %3878 = vtanh.f32 %v1759_v55 }
 0x32b   :  { %3880 = vtanh.f32 %v1762_v2  ;;  %v5576_v2 = vld [vmem:[%s6910_s4 + $0x80] ss:$16 sps:$4 sm:$0xff]  }
 0x32e   :  { %v3873_v61 = vpop.eup %3872 }
 0x32f   :  { %v5491_v63 = vmul.f32 %v3873_v61, %v1659_v59  ;;  %v5549_v61 = vld [vmem:[%s6910_s4 + $0xa0] ss:$16 sps:$4 sm:$0xff]  }
 0x331   :  { %v1779_v47 = vpack.c.bf16 %v5491_v63, %v5491_v63 }
 0x333   :  { %1813 = vmatmul.mubr.bf16.vlgmr.msra.gmra.mxu0 %v1779_v47  ;;  %1854 = vmatmul.mubr.bf16.vlgmr.msra.gmra.mxu1 %v1779_v47  ;;  %v5569_v47 = vld [vmem:[%s6910_s4 + $0x8c] ss:$16 sps:$4 sm:$0xff]  }
 0x334   :  { %v3875_v3 = vpop.eup %3874  ;;  %1863 = vmatpush1.bf16.msra.mxu0 %v5498_v4  ;;  %1904 = vmatpush1.bf16.msra.mxu1 %v5504_v57 }
 0x335   :  { %v1766_v5 = vmul.f32 0.5, %v3875_v3  ;;  %1864 = vmatprep.subr.bf16.mxu0 %v5510_v7  ;;  %1905 = vmatprep.subr.bf16.mxu1 %v5516_v8  ;;  %v5582_v3 = vld [vmem:[%s6910_s4 + $0x88] ss:$16 sps:$4 sm:$0xff]  }
 0x336   :  { %v3877_v9 = vpop.eup %3876  ;;  %1894 = vmatprep.mubr.bf16.mxu0 %v7209_v44  ;;  %1935 = vmatprep.mubr.bf16.mxu1 %v7209_v44 }
 0x337   :  { %v1769_v51 = vadd.f32 0.5, %v1766_v5  ;;  %v1767_v52 = vmul.f32 0.5, %v3877_v9  ;;  %v3879_v43 = vpop.eup %3878  ;;  %v5588_v5 = vld [vmem:[%s6910_s4 + $0x64] ss:$16 sps:$4 sm:$0xff]   ;;  %v5594_v9 = vld [vmem:[%s6910_s4 + $0x6c] ss:$16 sps:$4 sm:$0xff]  }
 0x338   :  { %1865 = vmatpush1.bf16.msra.mxu0 %v5524_v54  ;;  %1906 = vmatpush1.bf16.msra.mxu1 %v5530_v14 }
 0x339   :  { %v1770_v55 = vadd.f32 0.5, %v1767_v52  ;;  %v1774_v49 = vmul.f32 %v3879_v43, %v1769_v51  ;;  %1866 = vmatprep.subr.bf16.mxu0 %v5536_v56  ;;  %1907 = vmatprep.subr.bf16.mxu1 %v5542_v58  ;;  %v3881_v51 = vpop.eup %3880  ;;  %v5600_v52 = vld [vmem:[%s6910_s4 + $0x60] ss:$16 sps:$4 sm:$0xff]   ;;  %v5606_v43 = vld [vmem:[%s6910_s4 + $0x68] ss:$16 sps:$4 sm:$0xff]  }
 0x33a   :  { %7367 = vst [vmem:[#allocation66_spill] sm:$0xff] %v5600_v52  ;;  %7368 = vst [vmem:[#allocation67_spill] sm:$0xff] %v5606_v43 }
 0x33b   :  { %v1773_v59 = vmul.f32 %v1770_v55, %v5165_v31  ;;  %v5563_v31 = vld [vmem:[%s6910_s4 + $0x84] ss:$16 sps:$4 sm:$0xff]  }
 0x33c   :  { %1867 = vmatpush1.bf16.msra.mxu0 %v5549_v61  ;;  %1908 = vmatpush1.bf16.msra.mxu1 %v5555_v50  ;;  %v5612_v55 = vld [vmem:[%s6910_s4 + $0x44] ss:$16 sps:$4 sm:$0xff]  }
 0x33d   :  { %v5558_v60 = vadd.f32 %v1774_v49, %v1773_v59  ;;  %1868 = vmatprep.subr.bf16.mxu0 %v5563_v31  ;;  %1909 = vmatprep.subr.bf16.mxu1 %v5569_v47  ;;  %v5618_v49 = vld [vmem:[%s6910_s4 + $0x4c] ss:$16 sps:$4 sm:$0xff]   ;;  %v1768_v59 = vmul.f32 0.5, %v3881_v51 }
 0x33e   :  { %7369 = vst [vmem:[#allocation65_spill] sm:$0xff] %v5618_v49 }
 0x33f   :  { %3882 = vtanh.f32 %v5558_v60 }
 0x340   :  { %1869 = vmatpush1.bf16.msra.mxu0 %v5576_v2  ;;  %1910 = vmatpush1.bf16.msra.mxu1 %v5582_v3 }
 0x341   :  { %1870 = vmatprep.subr.bf16.mxu0 %v5588_v5  ;;  %1911 = vmatprep.subr.bf16.mxu1 %v5594_v9 }
 0x344   :  { %1871 = vmatpush1.bf16.msra.mxu0 %v5600_v52  ;;  %1912 = vmatpush1.bf16.msra.mxu1 %v5606_v43  ;;  %v1771_v43 = vadd.f32 0.5, %v1768_v59  ;;  %v7383_v59 = vld [vmem:[#allocation24_spill] sm:$0xff] }
 0x345   :  { %1872 = vmatprep.subr.bf16.mxu0 %v5612_v55  ;;  %1913 = vmatprep.subr.bf16.mxu1 %v5618_v49 }
 0x348   :  { %1873 = vmatpush1.bf16.msra.mxu0 %v7327_v37  ;;  %1914 = vmatpush1.bf16.msra.mxu1 %v7328_v38  ;;  %v7370_v37 = vld [vmem:[#allocation10_spill] sm:$0xff]  ;;  %v7371_v38 = vld [vmem:[#allocation13_spill] sm:$0xff] }
 0x349   :  { %1874 = vmatprep.subr.bf16.mxu0 %v7329_v40  ;;  %1915 = vmatprep.subr.bf16.mxu1 %v7330_v41  ;;  %v7372_v40 = vld [vmem:[#allocation12_spill] sm:$0xff]  ;;  %v7373_v41 = vld [vmem:[#allocation15_spill] sm:$0xff] }
 0x34c   :  { %v3883_v52 = vpop.eup %3882  ;;  %1875 = vmatpush1.bf16.msra.mxu0 %v7331_v46  ;;  %1916 = vmatpush1.bf16.msra.mxu1 %v7332_v48  ;;  %v7374_v46 = vld [vmem:[#allocation14_spill] sm:$0xff]  ;;  %v7375_v48 = vld [vmem:[#allocation17_spill] sm:$0xff] }
 0x34d   :  { %1876 = vmatprep.subr.bf16.mxu0 %v7333_v12  ;;  %1917 = vmatprep.subr.bf16.mxu1 %v7334_v10  ;;  %v1777_v49 = vmul.f32 %v3883_v52, %v1771_v43  ;;  %v7376_v12 = vld [vmem:[#allocation16_spill] sm:$0xff]  ;;  %v7377_v10 = vld [vmem:[#allocation19_spill] sm:$0xff]  ;;  %v7381_v43 = vld [vmem:[#allocation22_spill] sm:$0xff] }
 0x34e   :  { %v7380_v52 = vld [vmem:[#allocation20_spill] sm:$0xff] }
 0x34f   :  { %v1778_v51 = vpack.c.bf16 %v1777_v49, %v1777_v49  ;;  %v7382_v49 = vld [vmem:[#allocation25_spill] sm:$0xff] }
 0x350   :  { %1877 = vmatpush1.bf16.msra.mxu0 %v7335_v11  ;;  %1918 = vmatpush1.bf16.msra.mxu1 %v7336_v15  ;;  %v7378_v11 = vld [vmem:[#allocation18_spill] sm:$0xff]  ;;  %v7379_v15 = vld [vmem:[#allocation21_spill] sm:$0xff] }
 0x351   :  { %1974 = vmatprep.subr.bf16.mxu0 %v5193_v6  ;;  %2015 = vmatprep.subr.bf16.mxu1 %v5199_v53 }
 0x353   :  { %1895 = vmatmul.mubr.bf16.vlgmr.msra.gmra.mxu0 %v1778_v51  ;;  %1936 = vmatmul.mubr.bf16.vlgmr.msra.gmra.mxu1 %v1778_v51 }
 0x354   :  { %1975 = vmatpush1.bf16.msra.mxu0 %v5207_v27  ;;  %2016 = vmatpush1.bf16.msra.mxu1 %v5213_v21 }
 0x355   :  { %1976 = vmatprep.subr.bf16.mxu0 %v5219_v25  ;;  %2017 = vmatprep.subr.bf16.mxu1 %v5225_v32 }
 0x356   :  { %2006 = vmatprep.mubr.bf16.mxu0 %v7209_v44  ;;  %2047 = vmatprep.mubr.bf16.mxu1 %v7209_v44 }
 0x358   :  { %1977 = vmatpush1.bf16.msra.mxu0 %v5233_v35  ;;  %2018 = vmatpush1.bf16.msra.mxu1 %v5239_v23 }
 0x359   :  { %1978 = vmatprep.subr.bf16.mxu0 %v5245_v16  ;;  %2019 = vmatprep.subr.bf16.mxu1 %v5251_v1 }
 0x35c   :  { %1979 = vmatpush1.bf16.msra.mxu0 %v5257_v26  ;;  %2020 = vmatpush1.bf16.msra.mxu1 %v5263_v30 }
 0x35d   :  { %1980 = vmatprep.subr.bf16.mxu0 %v5269_v34  ;;  %2021 = vmatprep.subr.bf16.mxu1 %v5275_v17 }
 0x360   :  { %1981 = vmatpush1.bf16.msra.mxu0 %v5281_v18  ;;  %2022 = vmatpush1.bf16.msra.mxu1 %v5287_v62 }
 0x361   :  { %1982 = vmatprep.subr.bf16.mxu0 %v5293_v19  ;;  %2023 = vmatprep.subr.bf16.mxu1 %v5299_v36 }
 0x364   :  { %1983 = vmatpush1.bf16.msra.mxu0 %v5305_v42  ;;  %2024 = vmatpush1.bf16.msra.mxu1 %v7370_v37 }
 0x365   :  { %1984 = vmatprep.subr.bf16.mxu0 %v7371_v38  ;;  %2025 = vmatprep.subr.bf16.mxu1 %v7372_v40 }
 0x368   :  { %1985 = vmatpush1.bf16.msra.mxu0 %v7373_v41  ;;  %2026 = vmatpush1.bf16.msra.mxu1 %v7374_v46 }
 0x369   :  { %1986 = vmatprep.subr.bf16.mxu0 %v7375_v48  ;;  %2027 = vmatprep.subr.bf16.mxu1 %v7376_v12  ;;  %v7384_v12 = vld [vmem:[#allocation26_spill] sm:$0xff] }
 0x36c   :  { %1987 = vmatpush1.bf16.msra.mxu0 %v7377_v10  ;;  %2028 = vmatpush1.bf16.msra.mxu1 %v7378_v11  ;;  %v7385_v10 = vld [vmem:[#allocation29_spill] sm:$0xff]  ;;  %v7386_v11 = vld [vmem:[#allocation28_spill] sm:$0xff] }
 0x36d   :  { %1988 = vmatprep.subr.bf16.mxu0 %v7379_v15  ;;  %2029 = vmatprep.subr.bf16.mxu1 %v7380_v52 }
 0x370   :  { %1989 = vmatpush1.bf16.msra.mxu0 %v5377_v22  ;;  %2030 = vmatpush1.bf16.msra.mxu1 %v7381_v43  ;;  %v7387_v22 = vld [vmem:[#allocation30_spill] sm:$0xff]  ;;  %v7388_v43 = vld [vmem:[#allocation31_spill] sm:$0xff] }
 0x371   :  { %2080 = vmatprep.subr.bf16.mxu0 %v7382_v49  ;;  %2121 = vmatprep.subr.bf16.mxu1 %v7383_v59 }
 0x373   :  { %2007 = vmatmul.mubr.bf16.vlgmr.msra.gmra.mxu0 %v1778_v51  ;;  %2048 = vmatmul.mubr.bf16.vlgmr.msra.gmra.mxu1 %v1778_v51  ;;  %v5679_v51 = vld [vmem:[%s6909_s5 + $0xac] ss:$16 sps:$4 sm:$0xff]  }
 0x374   :  { %2081 = vmatpush1.bf16.msra.mxu0 %v5403_v45  ;;  %2122 = vmatpush1.bf16.msra.mxu1 %v7384_v12  ;;  %7389 = vst [vmem:[#allocation33_spill] sm:$0xff] %v5679_v51 }
 0x375   :  { %2082 = vmatprep.subr.bf16.mxu0 %v7385_v10  ;;  %2123 = vmatprep.subr.bf16.mxu1 %v7386_v11  ;;  %v5686_v11 = vld [vmem:[%s6909_s5 + $0xa8] ss:$16 sps:$4 sm:$0xff]  }
 0x376   :  { %2112 = vmatprep.mubr.bf16.mxu0 %v7209_v44  ;;  %2153 = vmatprep.mubr.bf16.mxu1 %v7209_v44  ;;  %7390 = vst [vmem:[#allocation34_spill] sm:$0xff] %v5686_v11 }
 0x378   :  { %2083 = vmatpush1.bf16.msra.mxu0 %v7387_v22  ;;  %2124 = vmatpush1.bf16.msra.mxu1 %v7388_v43 }
 0x379   :  { %2084 = vmatprep.subr.bf16.mxu0 %v5441_v29  ;;  %2125 = vmatprep.subr.bf16.mxu1 %v5679_v51  ;;  %v5693_v29 = vld [vmem:[%s6909_s5 + $0x8c] ss:$16 sps:$4 sm:$0xff]  }
 0x37a   :  { %7391 = vst [vmem:[#allocation35_spill] sm:$0xff] %v5693_v29 }
 0x37c   :  { %2085 = vmatpush1.bf16.msra.mxu0 %v5448_v39  ;;  %2126 = vmatpush1.bf16.msra.mxu1 %v5686_v11  ;;  %v5699_v39 = vld [vmem:[%s6909_s5 + $0x80] ss:$16 sps:$4 sm:$0xff]   ;;  %v5705_v11 = vld [vmem:[%s6909_s5 + $0x88] ss:$16 sps:$4 sm:$0xff]  }
 0x37d   :  { %2086 = vmatprep.subr.bf16.mxu0 %v5455_v24  ;;  %2127 = vmatprep.subr.bf16.mxu1 %v5693_v29  ;;  %7392 = vst [vmem:[#allocation36_spill] sm:$0xff] %v5699_v39  ;;  %7393 = vst [vmem:[#allocation37_spill] sm:$0xff] %v5705_v11  ;;  %v5711_v24 = vld [vmem:[%s6909_s5 + $0x64] ss:$16 sps:$4 sm:$0xff]   ;;  %v5717_v29 = vld [vmem:[%s6909_s5 + $0x6c] ss:$16 sps:$4 sm:$0xff]  }
 0x37e   :  { %7394 = vst [vmem:[#allocation38_spill] sm:$0xff] %v5711_v24  ;;  %7395 = vst [vmem:[#allocation39_spill] sm:$0xff] %v5717_v29 }
 0x380   :  { %2087 = vmatpush1.bf16.msra.mxu0 %v5699_v39  ;;  %2128 = vmatpush1.bf16.msra.mxu1 %v5705_v11  ;;  %v5723_v39 = vld [vmem:[%s6909_s5 + $0x60] ss:$16 sps:$4 sm:$0xff]   ;;  %v5729_v11 = vld [vmem:[%s6909_s5 + $0x68] ss:$16 sps:$4 sm:$0xff]  }
 0x381   :  { %2088 = vmatprep.subr.bf16.mxu0 %v5711_v24  ;;  %2129 = vmatprep.subr.bf16.mxu1 %v5717_v29  ;;  %7396 = vst [vmem:[#allocation40_spill] sm:$0xff] %v5723_v39  ;;  %7397 = vst [vmem:[#allocation41_spill] sm:$0xff] %v5729_v11  ;;  %v5735_v24 = vld [vmem:[%s6909_s5 + $0x44] ss:$16 sps:$4 sm:$0xff]   ;;  %v5741_v29 = vld [vmem:[%s6909_s5 + $0x4c] ss:$16 sps:$4 sm:$0xff]  }
 0x382   :  { %7398 = vst [vmem:[#allocation42_spill] sm:$0xff] %v5735_v24  ;;  %7399 = vst [vmem:[#allocation43_spill] sm:$0xff] %v5741_v29 }
 0x384   :  { %2089 = vmatpush1.bf16.msra.mxu0 %v5723_v39  ;;  %2130 = vmatpush1.bf16.msra.mxu1 %v5729_v11  ;;  %v5747_v39 = vld [vmem:[%s6909_s5 + $0x40] ss:$16 sps:$4 sm:$0xff]   ;;  %v5753_v11 = vld [vmem:[%s6909_s5 + $0x48] ss:$16 sps:$4 sm:$0xff]  }
 0x385   :  { %2090 = vmatprep.subr.bf16.mxu0 %v5735_v24  ;;  %2131 = vmatprep.subr.bf16.mxu1 %v5741_v29  ;;  %7400 = vst [vmem:[#allocation44_spill] sm:$0xff] %v5747_v39  ;;  %7401 = vst [vmem:[#allocation45_spill] sm:$0xff] %v5753_v11  ;;  %v5759_v24 = vld [vmem:[%s6909_s5 + $0x24] ss:$16 sps:$4 sm:$0xff]   ;;  %v5765_v29 = vld [vmem:[%s6909_s5 + $0x2c] ss:$16 sps:$4 sm:$0xff]  }
 0x386   :  { %7402 = vst [vmem:[#allocation46_spill] sm:$0xff] %v5759_v24  ;;  %7403 = vst [vmem:[#allocation47_spill] sm:$0xff] %v5765_v29 }
 0x388   :  { %2091 = vmatpush1.bf16.msra.mxu0 %v5747_v39  ;;  %2132 = vmatpush1.bf16.msra.mxu1 %v5753_v11  ;;  %v5771_v39 = vld [vmem:[%s6909_s5 + $0x20] ss:$16 sps:$4 sm:$0xff]   ;;  %v5777_v11 = vld [vmem:[%s6909_s5 + $0x28] ss:$16 sps:$4 sm:$0xff]  }
 0x389   :  { %2092 = vmatprep.subr.bf16.mxu0 %v5759_v24  ;;  %2133 = vmatprep.subr.bf16.mxu1 %v5765_v29  ;;  %7404 = vst [vmem:[#allocation48_spill] sm:$0xff] %v5771_v39  ;;  %7405 = vst [vmem:[#allocation49_spill] sm:$0xff] %v5777_v11  ;;  %v5783_v24 = vld [vmem:[%s6909_s5 + $0x4] ss:$16 sps:$4 sm:$0xff]   ;;  %v5789_v29 = vld [vmem:[%s6909_s5 + $0xc] ss:$16 sps:$4 sm:$0xff]  }
 0x38a   :  { %7406 = vst [vmem:[#allocation50_spill] sm:$0xff] %v5783_v24  ;;  %7407 = vst [vmem:[#allocation51_spill] sm:$0xff] %v5789_v29 }
 0x38c   :  { %2093 = vmatpush1.bf16.msra.mxu0 %v5771_v39  ;;  %2134 = vmatpush1.bf16.msra.mxu1 %v5777_v11  ;;  %v5795_v39 = vld [vmem:[%s6909_s5] ss:$16 sps:$4 sm:$0xff]   ;;  %v5801_v11 = vld [vmem:[%s6909_s5 + $0x8] ss:$16 sps:$4 sm:$0xff]  }
 0x38d   :  { %2094 = vmatprep.subr.bf16.mxu0 %v5783_v24  ;;  %2135 = vmatprep.subr.bf16.mxu1 %v5789_v29  ;;  %7408 = vst [vmem:[#allocation52_spill] sm:$0xff] %v5795_v39  ;;  %7409 = vst [vmem:[#allocation53_spill] sm:$0xff] %v5801_v11  ;;  %v5807_v24 = vld [vmem:[%s6910_s4 + $0xe4] ss:$16 sps:$4 sm:$0xff]   ;;  %v5813_v29 = vld [vmem:[%s6910_s4 + $0xec] ss:$16 sps:$4 sm:$0xff]  }
 0x38e   :  { %7410 = vst [vmem:[#allocation54_spill] sm:$0xff] %v5807_v24  ;;  %7411 = vst [vmem:[#allocation55_spill] sm:$0xff] %v5813_v29 }
 0x390   :  { %2095 = vmatpush1.bf16.msra.mxu0 %v5795_v39  ;;  %2136 = vmatpush1.bf16.msra.mxu1 %v5801_v11 }
 0x391   :  { %2162 = vmatprep.subr.bf16.mxu0 %v5807_v24  ;;  %2203 = vmatprep.subr.bf16.mxu1 %v5813_v29 }
 0x3f3   :  { %v1814_v39 = vpop.f32.mrf.mxu0  ;;  %v1855_v51 = vpop.f32.mrf.mxu1 }
 0x3f5   :  { %v1816_v43 = vpop.f32.mrf.mxu0  ;;  %v1857_v22 = vpop.f32.mrf.mxu1 }
 0x3f7   :  { %v1818_v10 = vpop.f32.mrf.mxu0  ;;  %v1859_v11 = vpop.f32.mrf.mxu1 }
 0x3f9   :  { %v1819_v12 = vpop.f32.mrf.mxu0  ;;  %v1860_v45 = vpop.f32.mrf.mxu1 }
 0x413   :  { %v1896_v59 = vpop.f32.mrf.mxu0  ;;  %v1937_v49 = vpop.f32.mrf.mxu1 }
 0x414   :  { %v1897_v52 = vadd.f32 %v1896_v59, %v1814_v39  ;;  %v1938_v12 = vadd.f32 %v1937_v49, %v1855_v51 }
 0x415   :  { %v1898_v15 = vpop.f32.mrf.mxu0  ;;  %v1939_v24 = vpop.f32.mrf.mxu1 }
 0x416   :  { %v1944_v48 = vadd.f32 %v1897_v52, %v5123_v13  ;;  %v1899_v46 = vadd.f32 %v1898_v15, %v1816_v43  ;;  %v1940_v37 = vadd.f32 %v1939_v24, %v1857_v22  ;;  %v1946_v39 = vadd.f32 %v1938_v12, %v5138_v33 }
 0x417   :  { %v1900_v41 = vpop.f32.mrf.mxu0  ;;  %v1941_v40 = vpop.f32.mrf.mxu1 }
 0x418   :  { %v1948_v38 = vmul.f32 0.5, %v1944_v48  ;;  %v1945_v29 = vadd.f32 %v1899_v46, %v5127_v28  ;;  %v1947_v45 = vadd.f32 %v1940_v37, %v5133_v20  ;;  %v1950_v11 = vmul.f32 0.5, %v1946_v39 }
 0x419   :  { %v1901_v42 = vpop.f32.mrf.mxu0  ;;  %v1942_v36 = vpop.f32.mrf.mxu1 }
 0x41a   :  { %3884 = vtanh.f32 %v1948_v38  ;;  %v1949_v10 = vmul.f32 0.5, %v1945_v29  ;;  %v7412_v38 = vld [vmem:[#allocation72_spill] sm:$0xff] }
 0x41c   :  { %3886 = vtanh.f32 %v1949_v10  ;;  %v7413_v10 = vld [vmem:[#allocation74_spill] sm:$0xff] }
 0x41d   :  { %3888 = vtanh.f32 %v1947_v45 }
 0x41e   :  { %3890 = vtanh.f32 %v1950_v11 }
 0x427   :  { %v3885_v52 = vpop.eup %3884 }
 0x428   :  { %v1954_v15 = vmul.f32 0.5, %v3885_v52 }
 0x429   :  { %v3887_v41 = vpop.eup %3886 }
 0x42a   :  { %v1957_v40 = vadd.f32 0.5, %v1954_v15  ;;  %v1955_v48 = vmul.f32 0.5, %v3887_v41  ;;  %v3889_v24 = vpop.eup %3888 }
 0x42b   :  { %v3891_v12 = vpop.eup %3890 }
 0x42c   :  { %v1958_v46 = vadd.f32 0.5, %v1955_v48  ;;  %v1962_v36 = vmul.f32 %v3889_v24, %v1957_v40  ;;  %v1956_v48 = vmul.f32 0.5, %v3891_v12 }
 0x42e   :  { %v1961_v22 = vmul.f32 %v1958_v46, %v5484_v0  ;;  %v7414_v0 = vld [vmem:[#allocation75_spill] sm:$0xff]  ;;  %v1959_v46 = vadd.f32 0.5, %v1956_v48  ;;  %v7419_v48 = vld [vmem:[#allocation65_spill] sm:$0xff] }
 0x430   :  { %v5821_v42 = vadd.f32 %v1962_v36, %v1961_v22  ;;  %v7415_v22 = vld [vmem:[#allocation9_spill] sm:$0xff] }
 0x431   :  { %v1666_v36 = vadd.f32 %v5491_v63, %v7415_v22  ;;  %v5867_v22 = vld [vmem:[%s6910_s4 + $0x48] ss:$16 sps:$4 sm:$0xff]  }
 0x432   :  { %3892 = vtanh.f32 %v5821_v42 }
 0x433   :  { %v2008_v29 = vpop.f32.mrf.mxu0  ;;  %v2049_v37 = vpop.f32.mrf.mxu1 }
 0x434   :  { %v2056_v43 = vadd.f32 %v2008_v29, %v7412_v38  ;;  %v7416_v29 = vld [vmem:[#allocation73_spill] sm:$0xff] }
 0x435   :  { %v2010_v49 = vpop.f32.mrf.mxu0  ;;  %v2051_v59 = vpop.f32.mrf.mxu1  ;;  %v2058_v38 = vadd.f32 %v2049_v37, %v7416_v29  ;;  %v5879_v29 = vld [vmem:[%s6910_s4 + $0x2c] ss:$16 sps:$4 sm:$0xff]  }
 0x436   :  { %v2060_v51 = vmul.f32 0.5, %v2056_v43  ;;  %v2057_v45 = vadd.f32 %v2010_v49, %v7413_v10  ;;  %v2059_v15 = vadd.f32 %v2051_v59, %v7414_v0 }
 0x437   :  { %v2012_v39 = vpop.f32.mrf.mxu0  ;;  %v2053_v11 = vpop.f32.mrf.mxu1 }
 0x438   :  { %3894 = vtanh.f32 %v2060_v51  ;;  %v2061_v52 = vmul.f32 0.5, %v2057_v45  ;;  %v2062_v51 = vmul.f32 0.5, %v2058_v38 }
 0x439   :  { %v2013_v41 = vpop.f32.mrf.mxu0  ;;  %v2054_v40 = vpop.f32.mrf.mxu1 }
 0x43a   :  { %3896 = vtanh.f32 %v2061_v52  ;;  %v7417_v41 = vld [vmem:[#allocation66_spill] sm:$0xff]  ;;  %v7418_v40 = vld [vmem:[#allocation67_spill] sm:$0xff] }
 0x43b   :  { %3898 = vtanh.f32 %v2059_v15 }
 0x43c   :  { %3900 = vtanh.f32 %v2062_v51  ;;  %v5891_v51 = vld [vmem:[%s6910_s4 + $0x28] ss:$16 sps:$4 sm:$0xff]  }
 0x43f   :  { %v3893_v24 = vpop.eup %3892 }
 0x440   :  { %v1965_v43 = vmul.f32 %v3893_v24, %v1959_v46  ;;  %v5861_v24 = vld [vmem:[%s6910_s4 + $0x40] ss:$16 sps:$4 sm:$0xff]  }
 0x442   :  { %v5830_v49 = vadd.f32 %v1965_v43, %v1666_v36  ;;  %v2079_v10 = vpack.c.bf16 %v1965_v43, %v1965_v43  ;;  %v5873_v36 = vld [vmem:[%s6910_s4 + $0x24] ss:$16 sps:$4 sm:$0xff]  }
 0x444   :  { %2113 = vmatmul.mubr.bf16.vlgmr.msra.gmra.mxu0 %v2079_v10  ;;  %2154 = vmatmul.mubr.bf16.vlgmr.msra.gmra.mxu1 %v2079_v10  ;;  %v5885_v10 = vld [vmem:[%s6910_s4 + $0x20] ss:$16 sps:$4 sm:$0xff]  }
 0x445   :  { %v3895_v59 = vpop.eup %3894  ;;  %2163 = vmatpush1.bf16.msra.mxu0 %v5498_v4  ;;  %2204 = vmatpush1.bf16.msra.mxu1 %v5504_v57 }
 0x446   :  { %v2066_v45 = vmul.f32 0.5, %v3895_v59  ;;  %2164 = vmatprep.subr.bf16.mxu0 %v5510_v7  ;;  %2205 = vmatprep.subr.bf16.mxu1 %v5516_v8  ;;  %v5897_v59 = vld [vmem:[%s6910_s4 + $0x4] ss:$16 sps:$4 sm:$0xff]  }
 0x447   :  { %v3897_v63 = vpop.eup %3896  ;;  %2194 = vmatprep.mubr.bf16.mxu0 %v7209_v44  ;;  %2235 = vmatprep.mubr.bf16.mxu1 %v7209_v44 }
 0x448   :  { %v2069_v37 = vadd.f32 0.5, %v2066_v45  ;;  %v2067_v12 = vmul.f32 0.5, %v3897_v63  ;;  %v3899_v39 = vpop.eup %3898  ;;  %v5903_v45 = vld [vmem:[%s6910_s4 + $0xc] ss:$16 sps:$4 sm:$0xff]  }
 0x449   :  { %2165 = vmatpush1.bf16.msra.mxu0 %v5524_v54  ;;  %2206 = vmatpush1.bf16.msra.mxu1 %v5530_v14 }
 0x44a   :  { %v2070_v11 = vadd.f32 0.5, %v2067_v12  ;;  %v2074_v52 = vmul.f32 %v3899_v39, %v2069_v37  ;;  %2166 = vmatprep.subr.bf16.mxu0 %v5536_v56  ;;  %2207 = vmatprep.subr.bf16.mxu1 %v5542_v58  ;;  %v5909_v12 = vld [vmem:[%s6910_s4] ss:$16 sps:$4 sm:$0xff]   ;;  %v5915_v39 = vld [vmem:[%s6910_s4 + $0x8] ss:$16 sps:$4 sm:$0xff]  }
 0x44c   :  { %v2073_v0 = vmul.f32 %v2070_v11, %v5558_v60  ;;  %v3901_v60 = vpop.eup %3900  ;;  %v7437_v11 = vld [vmem:[#allocation27_spill] sm:$0xff] }
 0x44d   :  { %2167 = vmatpush1.bf16.msra.mxu0 %v5549_v61  ;;  %2208 = vmatpush1.bf16.msra.mxu1 %v5555_v50  ;;  %v2068_v46 = vmul.f32 0.5, %v3901_v60  ;;  %v7440_v60 = vld [vmem:[#allocation28_spill] sm:$0xff] }
 0x44e   :  { %v5845_v15 = vadd.f32 %v2074_v52, %v2073_v0  ;;  %2168 = vmatprep.subr.bf16.mxu0 %v5563_v31  ;;  %2209 = vmatprep.subr.bf16.mxu1 %v5569_v47  ;;  %v7438_v52 = vld [vmem:[#allocation26_spill] sm:$0xff]  ;;  %v7439_v0 = vld [vmem:[#allocation29_spill] sm:$0xff] }
 0x44f   :  { %v2071_v38 = vadd.f32 0.5, %v2068_v46  ;;  %v7441_v46 = vld [vmem:[#allocation30_spill] sm:$0xff] }
 0x450   :  { %3902 = vtanh.f32 %v5845_v15 }
 0x451   :  { %2169 = vmatpush1.bf16.msra.mxu0 %v5576_v2  ;;  %2210 = vmatpush1.bf16.msra.mxu1 %v5582_v3 }
 0x452   :  { %2170 = vmatprep.subr.bf16.mxu0 %v5588_v5  ;;  %2211 = vmatprep.subr.bf16.mxu1 %v5594_v9 }
 0x455   :  { %2171 = vmatpush1.bf16.msra.mxu0 %v7417_v41  ;;  %2212 = vmatpush1.bf16.msra.mxu1 %v7418_v40 }
 0x456   :  { %2172 = vmatprep.subr.bf16.mxu0 %v5612_v55  ;;  %2213 = vmatprep.subr.bf16.mxu1 %v7419_v48 }
 0x459   :  { %2173 = vmatpush1.bf16.msra.mxu0 %v5861_v24  ;;  %2214 = vmatpush1.bf16.msra.mxu1 %v5867_v22 }
 0x45a   :  { %2174 = vmatprep.subr.bf16.mxu0 %v5873_v36  ;;  %2215 = vmatprep.subr.bf16.mxu1 %v5879_v29 }
 0x45d   :  { %v3903_v43 = vpop.eup %3902  ;;  %2175 = vmatpush1.bf16.msra.mxu0 %v5885_v10  ;;  %2216 = vmatpush1.bf16.msra.mxu1 %v5891_v51 }
 0x45e   :  { %2176 = vmatprep.subr.bf16.mxu0 %v5897_v59  ;;  %2217 = vmatprep.subr.bf16.mxu1 %v5903_v45  ;;  %v2077_v63 = vmul.f32 %v3903_v43, %v2071_v38  ;;  %v7442_v38 = vld [vmem:[#allocation31_spill] sm:$0xff]  ;;  %v7443_v43 = vld [vmem:[#allocation32_spill] sm:$0xff] }
 0x460   :  { %v2078_v37 = vpack.c.bf16 %v2077_v63, %v2077_v63  ;;  %v7444_v63 = vld [vmem:[#allocation33_spill] sm:$0xff] }
 0x461   :  { %2177 = vmatpush1.bf16.msra.mxu0 %v5909_v12  ;;  %2218 = vmatpush1.bf16.msra.mxu1 %v5915_v39 }
 0x462   :  { %2274 = vmatprep.subr.bf16.mxu0 %v5193_v6  ;;  %2315 = vmatprep.subr.bf16.mxu1 %v5199_v53  ;;  %v7420_v6 = vld [vmem:[#allocation8_spill] sm:$0xff]  ;;  %v7421_v53 = vld [vmem:[#allocation11_spill] sm:$0xff] }
 0x464   :  { %2195 = vmatmul.mubr.bf16.vlgmr.msra.gmra.mxu0 %v2078_v37  ;;  %2236 = vmatmul.mubr.bf16.vlgmr.msra.gmra.mxu1 %v2078_v37 }
 0x465   :  { %2275 = vmatpush1.bf16.msra.mxu0 %v5207_v27  ;;  %2316 = vmatpush1.bf16.msra.mxu1 %v5213_v21  ;;  %v7422_v27 = vld [vmem:[#allocation10_spill] sm:$0xff]  ;;  %v7423_v21 = vld [vmem:[#allocation13_spill] sm:$0xff] }
 0x466   :  { %2276 = vmatprep.subr.bf16.mxu0 %v5219_v25  ;;  %2317 = vmatprep.subr.bf16.mxu1 %v5225_v32  ;;  %v7424_v25 = vld [vmem:[#allocation12_spill] sm:$0xff]  ;;  %v7425_v32 = vld [vmem:[#allocation15_spill] sm:$0xff] }
 0x467   :  { %2306 = vmatprep.mubr.bf16.mxu0 %v7209_v44  ;;  %2347 = vmatprep.mubr.bf16.mxu1 %v7209_v44 }
 0x469   :  { %2277 = vmatpush1.bf16.msra.mxu0 %v5233_v35  ;;  %2318 = vmatpush1.bf16.msra.mxu1 %v5239_v23  ;;  %v7426_v35 = vld [vmem:[#allocation14_spill] sm:$0xff]  ;;  %v7427_v23 = vld [vmem:[#allocation17_spill] sm:$0xff] }
 0x46a   :  { %2278 = vmatprep.subr.bf16.mxu0 %v5245_v16  ;;  %2319 = vmatprep.subr.bf16.mxu1 %v5251_v1  ;;  %v7428_v16 = vld [vmem:[#allocation16_spill] sm:$0xff]  ;;  %v7429_v1 = vld [vmem:[#allocation19_spill] sm:$0xff] }
 0x46d   :  { %2279 = vmatpush1.bf16.msra.mxu0 %v5257_v26  ;;  %2320 = vmatpush1.bf16.msra.mxu1 %v5263_v30  ;;  %v7430_v26 = vld [vmem:[#allocation18_spill] sm:$0xff]  ;;  %v7431_v30 = vld [vmem:[#allocation21_spill] sm:$0xff] }
 0x46e   :  { %2280 = vmatprep.subr.bf16.mxu0 %v5269_v34  ;;  %2321 = vmatprep.subr.bf16.mxu1 %v5275_v17  ;;  %v7432_v34 = vld [vmem:[#allocation20_spill] sm:$0xff]  ;;  %v7433_v17 = vld [vmem:[#allocation23_spill] sm:$0xff] }
 0x471   :  { %2281 = vmatpush1.bf16.msra.mxu0 %v5281_v18  ;;  %2322 = vmatpush1.bf16.msra.mxu1 %v5287_v62  ;;  %v7434_v18 = vld [vmem:[#allocation22_spill] sm:$0xff]  ;;  %v7435_v62 = vld [vmem:[#allocation25_spill] sm:$0xff] }
 0x472   :  { %2282 = vmatprep.subr.bf16.mxu0 %v5293_v19  ;;  %2323 = vmatprep.subr.bf16.mxu1 %v7420_v6  ;;  %v7436_v19 = vld [vmem:[#allocation24_spill] sm:$0xff]  ;;  %v7446_v6 = vld [vmem:[#allocation34_spill] sm:$0xff] }
 0x475   :  { %2283 = vmatpush1.bf16.msra.mxu0 %v7421_v53  ;;  %2324 = vmatpush1.bf16.msra.mxu1 %v7422_v27  ;;  %v7447_v53 = vld [vmem:[#allocation64_spill] sm:$0xff]  ;;  %v7448_v27 = vld [vmem:[#allocation35_spill] sm:$0xff] }
 0x476   :  { %2284 = vmatprep.subr.bf16.mxu0 %v7423_v21  ;;  %2325 = vmatprep.subr.bf16.mxu1 %v7424_v25  ;;  %v7449_v21 = vld [vmem:[#allocation36_spill] sm:$0xff]  ;;  %v7450_v25 = vld [vmem:[#allocation37_spill] sm:$0xff] }
 0x479   :  { %2285 = vmatpush1.bf16.msra.mxu0 %v7425_v32  ;;  %2326 = vmatpush1.bf16.msra.mxu1 %v7426_v35  ;;  %v7451_v32 = vld [vmem:[#allocation38_spill] sm:$0xff]  ;;  %v7452_v35 = vld [vmem:[#allocation39_spill] sm:$0xff] }
 0x47a   :  { %2286 = vmatprep.subr.bf16.mxu0 %v7427_v23  ;;  %2327 = vmatprep.subr.bf16.mxu1 %v7428_v16  ;;  %v7453_v23 = vld [vmem:[#allocation40_spill] sm:$0xff]  ;;  %v7454_v16 = vld [vmem:[#allocation41_spill] sm:$0xff] }
 0x47d   :  { %2287 = vmatpush1.bf16.msra.mxu0 %v7429_v1  ;;  %2328 = vmatpush1.bf16.msra.mxu1 %v7430_v26  ;;  %v7455_v1 = vld [vmem:[#allocation42_spill] sm:$0xff]  ;;  %v7456_v26 = vld [vmem:[#allocation43_spill] sm:$0xff] }
 0x47e   :  { %2288 = vmatprep.subr.bf16.mxu0 %v7431_v30  ;;  %2329 = vmatprep.subr.bf16.mxu1 %v7432_v34  ;;  %v7457_v30 = vld [vmem:[#allocation44_spill] sm:$0xff]  ;;  %v7458_v34 = vld [vmem:[#allocation45_spill] sm:$0xff] }
 0x481   :  { %2289 = vmatpush1.bf16.msra.mxu0 %v7433_v17  ;;  %2330 = vmatpush1.bf16.msra.mxu1 %v7434_v18  ;;  %v7459_v17 = vld [vmem:[#allocation46_spill] sm:$0xff]  ;;  %v7460_v18 = vld [vmem:[#allocation47_spill] sm:$0xff] }
 0x482   :  { %2380 = vmatprep.subr.bf16.mxu0 %v7435_v62  ;;  %2421 = vmatprep.subr.bf16.mxu1 %v7436_v19  ;;  %v7461_v62 = vld [vmem:[#allocation48_spill] sm:$0xff]  ;;  %v7462_v19 = vld [vmem:[#allocation49_spill] sm:$0xff] }
 0x484   :  { %2307 = vmatmul.mubr.bf16.vlgmr.msra.gmra.mxu0 %v2078_v37  ;;  %2348 = vmatmul.mubr.bf16.vlgmr.msra.gmra.mxu1 %v2078_v37  ;;  %v7445_v37 = vld [vmem:[#allocation63_spill] sm:$0xff] }
 0x485   :  { %2381 = vmatpush1.bf16.msra.mxu0 %v7437_v11  ;;  %2422 = vmatpush1.bf16.msra.mxu1 %v7438_v52  ;;  %v7463_v11 = vld [vmem:[#allocation50_spill] sm:$0xff]  ;;  %v7464_v52 = vld [vmem:[#allocation51_spill] sm:$0xff] }
 0x486   :  { %2382 = vmatprep.subr.bf16.mxu0 %v7439_v0  ;;  %2423 = vmatprep.subr.bf16.mxu1 %v7440_v60  ;;  %v7465_v0 = vld [vmem:[#allocation52_spill] sm:$0xff]  ;;  %v7466_v60 = vld [vmem:[#allocation53_spill] sm:$0xff] }
 0x487   :  { %2412 = vmatprep.mubr.bf16.mxu0 %v7209_v44  ;;  %2453 = vmatprep.mubr.bf16.mxu1 %v7209_v44 }
 0x489   :  { %2383 = vmatpush1.bf16.msra.mxu0 %v7441_v46  ;;  %2424 = vmatpush1.bf16.msra.mxu1 %v7442_v38  ;;  %v7467_v46 = vld [vmem:[#allocation54_spill] sm:$0xff]  ;;  %v7468_v38 = vld [vmem:[#allocation55_spill] sm:$0xff] }
 0x48a   :  { %2384 = vmatprep.subr.bf16.mxu0 %v7443_v43  ;;  %2425 = vmatprep.subr.bf16.mxu1 %v7444_v63 }
 0x48d   :  { %2385 = vmatpush1.bf16.msra.mxu0 %v7445_v37  ;;  %2426 = vmatpush1.bf16.msra.mxu1 %v7446_v6 }
 0x48e   :  { %2386 = vmatprep.subr.bf16.mxu0 %v7447_v53  ;;  %2427 = vmatprep.subr.bf16.mxu1 %v7448_v27 }
 0x491   :  { %2387 = vmatpush1.bf16.msra.mxu0 %v7449_v21  ;;  %2428 = vmatpush1.bf16.msra.mxu1 %v7450_v25 }
 0x492   :  { %2388 = vmatprep.subr.bf16.mxu0 %v7451_v32  ;;  %2429 = vmatprep.subr.bf16.mxu1 %v7452_v35 }
 0x495   :  { %2389 = vmatpush1.bf16.msra.mxu0 %v7453_v23  ;;  %2430 = vmatpush1.bf16.msra.mxu1 %v7454_v16 }
 0x496   :  { %2390 = vmatprep.subr.bf16.mxu0 %v7455_v1  ;;  %2431 = vmatprep.subr.bf16.mxu1 %v7456_v26 }
 0x499   :  { %2391 = vmatpush1.bf16.msra.mxu0 %v7457_v30  ;;  %2432 = vmatpush1.bf16.msra.mxu1 %v7458_v34 }
 0x49a   :  { %2392 = vmatprep.subr.bf16.mxu0 %v7459_v17  ;;  %2433 = vmatprep.subr.bf16.mxu1 %v7460_v18 }
 0x49d   :  { %2393 = vmatpush1.bf16.msra.mxu0 %v7461_v62  ;;  %2434 = vmatpush1.bf16.msra.mxu1 %v7462_v19 }
 0x49e   :  { %2394 = vmatprep.subr.bf16.mxu0 %v7463_v11  ;;  %2435 = vmatprep.subr.bf16.mxu1 %v7464_v52 }
 0x4a1   :  { %2395 = vmatpush1.bf16.msra.mxu0 %v7465_v0  ;;  %2436 = vmatpush1.bf16.msra.mxu1 %v7466_v60 }
 0x4a2   :  { %2462 = vmatprep.subr.bf16.mxu0 %v7467_v46  ;;  %2503 = vmatprep.subr.bf16.mxu1 %v7468_v38 }
 0x504   :  { %v2114_v43 = vpop.f32.mrf.mxu0  ;;  %v2155_v37 = vpop.f32.mrf.mxu1 }
 0x506   :  { %v2116_v53 = vpop.f32.mrf.mxu0  ;;  %v2157_v18 = vpop.f32.mrf.mxu1 }
 0x508   :  { %v2118_v17 = vpop.f32.mrf.mxu0  ;;  %v2159_v62 = vpop.f32.mrf.mxu1 }
 0x50a   :  { %v2119_v34 = vpop.f32.mrf.mxu0  ;;  %v2160_v19 = vpop.f32.mrf.mxu1 }
 0x524   :  { %v2196_v30 = vpop.f32.mrf.mxu0  ;;  %v2237_v11 = vpop.f32.mrf.mxu1 }
 0x525   :  { %v2197_v26 = vadd.f32 %v2196_v30, %v2114_v43  ;;  %v2238_v62 = vadd.f32 %v2237_v11, %v2155_v37  ;;  %v7469_v11 = vld [vmem:[#allocation76_spill] sm:$0xff] }
 0x526   :  { %v2198_v52 = vpop.f32.mrf.mxu0  ;;  %v2239_v1 = vpop.f32.mrf.mxu1 }
 0x527   :  { %v2244_v0 = vadd.f32 %v2197_v26, %v5123_v13  ;;  %v2199_v60 = vadd.f32 %v2198_v52, %v2116_v53  ;;  %v2240_v35 = vadd.f32 %v2239_v1, %v2157_v18  ;;  %v2246_v30 = vadd.f32 %v2238_v62, %v5138_v33 }
 0x528   :  { %v2200_v16 = vpop.f32.mrf.mxu0  ;;  %v2241_v46 = vpop.f32.mrf.mxu1 }
 0x529   :  { %v2248_v23 = vmul.f32 0.5, %v2244_v0  ;;  %v2245_v38 = vadd.f32 %v2199_v60, %v5127_v28  ;;  %v2247_v34 = vadd.f32 %v2240_v35, %v5133_v20  ;;  %v2250_v19 = vmul.f32 0.5, %v2246_v30 }
 0x52a   :  { %v2201_v32 = vpop.f32.mrf.mxu0  ;;  %v2242_v25 = vpop.f32.mrf.mxu1 }
 0x52b   :  { %3904 = vtanh.f32 %v2248_v23  ;;  %v2249_v17 = vmul.f32 0.5, %v2245_v38 }
 0x52d   :  { %3906 = vtanh.f32 %v2249_v17  ;;  %v7470_v17 = vld [vmem:[#allocation78_spill] sm:$0xff] }
 0x52e   :  { %3908 = vtanh.f32 %v2247_v34 }
 0x52f   :  { %3910 = vtanh.f32 %v2250_v19 }
 0x538   :  { %v3905_v26 = vpop.eup %3904 }
 0x539   :  { %v2254_v52 = vmul.f32 0.5, %v3905_v26 }
 0x53a   :  { %v3907_v16 = vpop.eup %3906 }
 0x53b   :  { %v2257_v46 = vadd.f32 0.5, %v2254_v52  ;;  %v2255_v0 = vmul.f32 0.5, %v3907_v16  ;;  %v3909_v1 = vpop.eup %3908 }
 0x53c   :  { %v3911_v62 = vpop.eup %3910 }
 0x53d   :  { %v2258_v60 = vadd.f32 0.5, %v2255_v0  ;;  %v2262_v32 = vmul.f32 %v3909_v1, %v2257_v46  ;;  %v2256_v0 = vmul.f32 0.5, %v3911_v62  ;;  %v6114_v62 = vld [vmem:[%s6908_s2 + $0xa8] ss:$16 sps:$4 sm:$0xff]  }
 0x53f   :  { %v2261_v25 = vmul.f32 %v2258_v60, %v5821_v42  ;;  %v7471_v42 = vld [vmem:[#allocation79_spill] sm:$0xff]  ;;  %v2259_v60 = vadd.f32 0.5, %v2256_v0 }
 0x540   :  { %v6162_v0 = vld [vmem:[%s6908_s2 + $0x68] ss:$16 sps:$4 sm:$0xff]  }
 0x541   :  { %v5993_v23 = vadd.f32 %v2262_v32, %v2261_v25  ;;  %v7472_v25 = vld [vmem:[#allocation77_spill] sm:$0xff]  ;;  %7475 = vst [vmem:[#allocation58_spill] sm:$0xff] %v6162_v0 }
 0x543   :  { %3912 = vtanh.f32 %v5993_v23 }
 0x544   :  { %v2308_v35 = vpop.f32.mrf.mxu0  ;;  %v2349_v18 = vpop.f32.mrf.mxu1 }
 0x545   :  { %v2356_v38 = vadd.f32 %v2308_v35, %v7469_v11  ;;  %v2358_v32 = vadd.f32 %v2349_v18, %v7472_v25  ;;  %v6180_v25 = vld [vmem:[%s6908_s2 + $0x40] ss:$16 sps:$4 sm:$0xff]  }
 0x546   :  { %v2310_v43 = vpop.f32.mrf.mxu0  ;;  %v2351_v37 = vpop.f32.mrf.mxu1  ;;  %7478 = vst [vmem:[#allocation61_spill] sm:$0xff] %v6180_v25 }
 0x547   :  { %v2360_v53 = vmul.f32 0.5, %v2356_v38  ;;  %v2357_v34 = vadd.f32 %v2310_v43, %v7470_v17  ;;  %v2359_v52 = vadd.f32 %v2351_v37, %v7471_v42  ;;  %v2362_v43 = vmul.f32 0.5, %v2358_v32  ;;  %v6138_v42 = vld [vmem:[%s6908_s2 + $0x88] ss:$16 sps:$4 sm:$0xff]  }
 0x548   :  { %v2312_v30 = vpop.f32.mrf.mxu0  ;;  %v2353_v19 = vpop.f32.mrf.mxu1  ;;  %v6186_v32 = vld [vmem:[%s6908_s2 + $0x48] ss:$16 sps:$4 sm:$0xff]  }
 0x549   :  { %3914 = vtanh.f32 %v2360_v53  ;;  %v2361_v26 = vmul.f32 0.5, %v2357_v34  ;;  %v6120_v30 = vld [vmem:[%s6908_s2 + $0x84] ss:$16 sps:$4 sm:$0xff]   ;;  %v6126_v19 = vld [vmem:[%s6908_s2 + $0x8c] ss:$16 sps:$4 sm:$0xff]   ;;  %7479 = vst [vmem:[#allocation62_spill] sm:$0xff] %v6186_v32 }
 0x54a   :  { %v2313_v16 = vpop.f32.mrf.mxu0  ;;  %v2354_v46 = vpop.f32.mrf.mxu1 }
 0x54b   :  { %3916 = vtanh.f32 %v2361_v26  ;;  %v6132_v26 = vld [vmem:[%s6908_s2 + $0x80] ss:$16 sps:$4 sm:$0xff]   ;;  %v6150_v16 = vld [vmem:[%s6908_s2 + $0x6c] ss:$16 sps:$4 sm:$0xff]  }
 0x54c   :  { %3918 = vtanh.f32 %v2359_v52  ;;  %v6144_v52 = vld [vmem:[%s6908_s2 + $0x64] ss:$16 sps:$4 sm:$0xff]   ;;  %7473 = vst [vmem:[#allocation56_spill] sm:$0xff] %v6150_v16  ;;  %v6156_v46 = vld [vmem:[%s6908_s2 + $0x60] ss:$16 sps:$4 sm:$0xff]  }
 0x54d   :  { %3920 = vtanh.f32 %v2362_v43  ;;  %7474 = vst [vmem:[#allocation57_spill] sm:$0xff] %v6156_v46  ;;  %v6204_v43 = vld [vmem:[%s6908_s2 + $0x20] ss:$16 sps:$4 sm:$0xff]  }
 0x54e   :  { %7482 = vst [vmem:[#allocation71_spill] sm:$0xff] %v6204_v43 }
 0x550   :  { %v3913_v1 = vpop.eup %3912 }
 0x551   :  { %v2265_v35 = vmul.f32 %v3913_v1, %v2259_v60  ;;  %v6168_v60 = vld [vmem:[%s6908_s2 + $0x44] ss:$16 sps:$4 sm:$0xff]   ;;  %v6174_v1 = vld [vmem:[%s6908_s2 + $0x4c] ss:$16 sps:$4 sm:$0xff]  }
 0x552   :  { %7476 = vst [vmem:[#allocation59_spill] sm:$0xff] %v6168_v60  ;;  %7477 = vst [vmem:[#allocation60_spill] sm:$0xff] %v6174_v1 }
 0x553   :  { %v6001_v11 = vadd.f32 %v2265_v35, %v5830_v49  ;;  %v2379_v38 = vpack.c.bf16 %v2265_v35, %v2265_v35  ;;  %v6192_v35 = vld [vmem:[%s6908_s2 + $0x24] ss:$16 sps:$4 sm:$0xff]  }
 0x554   :  { %7480 = vst [vmem:[#allocation68_spill] sm:$0xff] %v6192_v35 }
 0x555   :  { %2413 = vmatmul.mubr.bf16.vlgmr.msra.gmra.mxu0 %v2379_v38  ;;  %2454 = vmatmul.mubr.bf16.vlgmr.msra.gmra.mxu1 %v2379_v38  ;;  %v6198_v38 = vld [vmem:[%s6908_s2 + $0x2c] ss:$16 sps:$4 sm:$0xff]  }
 0x556   :  { %v3915_v53 = vpop.eup %3914  ;;  %2463 = vmatpush1.bf16.msra.mxu0 %v5498_v4  ;;  %2504 = vmatpush1.bf16.msra.mxu1 %v5504_v57  ;;  %7481 = vst [vmem:[#allocation70_spill] sm:$0xff] %v6198_v38 }
 0x557   :  { %v2366_v37 = vmul.f32 0.5, %v3915_v53  ;;  %2464 = vmatprep.subr.bf16.mxu0 %v5510_v7  ;;  %2505 = vmatprep.subr.bf16.mxu1 %v5516_v8  ;;  %v6210_v53 = vld [vmem:[%s6908_s2 + $0x28] ss:$16 sps:$4 sm:$0xff]  }
 0x558   :  { %v3917_v17 = vpop.eup %3916  ;;  %2494 = vmatprep.mubr.bf16.mxu0 %v7209_v44  ;;  %2535 = vmatprep.mubr.bf16.mxu1 %v7209_v44  ;;  %7483 = vst [vmem:[#allocation69_spill] sm:$0xff] %v6210_v53 }
 0x559   :  { %v2369_v49 = vadd.f32 0.5, %v2366_v37  ;;  %v2367_v18 = vmul.f32 0.5, %v3917_v17  ;;  %v3919_v34 = vpop.eup %3918  ;;  %v6216_v37 = vld [vmem:[%s6908_s2 + $0x4] ss:$16 sps:$4 sm:$0xff]   ;;  %v6222_v17 = vld [vmem:[%s6908_s2 + $0xc] ss:$16 sps:$4 sm:$0xff]  }
 0x55a   :  { %2465 = vmatpush1.bf16.msra.mxu0 %v5524_v54  ;;  %2506 = vmatpush1.bf16.msra.mxu1 %v5530_v14  ;;  %v3921_v54 = vpop.eup %3920  ;;  %7484 = vst [vmem:[#allocation72_spill] sm:$0xff] %v6216_v37  ;;  %7485 = vst [vmem:[#allocation74_spill] sm:$0xff] %v6222_v17 }
 0x55b   :  { %v2370_v4 = vadd.f32 0.5, %v2367_v18  ;;  %v2374_v57 = vmul.f32 %v3919_v34, %v2369_v49  ;;  %2466 = vmatprep.subr.bf16.mxu0 %v5536_v56  ;;  %2507 = vmatprep.subr.bf16.mxu1 %v5542_v58  ;;  %v2368_v14 = vmul.f32 0.5, %v3921_v54  ;;  %v6228_v49 = vld [vmem:[%s6908_s2] ss:$16 sps:$4 sm:$0xff]   ;;  %v6234_v18 = vld [vmem:[%s6908_s2 + $0x8] ss:$16 sps:$4 sm:$0xff]  }
 0x55c   :  { %7486 = vst [vmem:[#allocation75_spill] sm:$0xff] %v6228_v49  ;;  %7487 = vst [vmem:[#allocation9_spill] sm:$0xff] %v6234_v18  ;;  %v6240_v34 = vld [vmem:[%s6909_s5 + $0xe4] ss:$16 sps:$4 sm:$0xff]  }
 0x55d   :  { %v2373_v7 = vmul.f32 %v2370_v4, %v5845_v15  ;;  %v2371_v56 = vadd.f32 0.5, %v2368_v14  ;;  %v6090_v15 = vld [vmem:[%s6908_s2 + $0xc8] ss:$16 sps:$4 sm:$0xff]   ;;  %7488 = vst [vmem:[#allocation73_spill] sm:$0xff] %v6240_v34  ;;  %v6246_v4 = vld [vmem:[%s6909_s5 + $0xec] ss:$16 sps:$4 sm:$0xff]  }
 0x55e   :  { %2467 = vmatpush1.bf16.msra.mxu0 %v5549_v61  ;;  %2508 = vmatpush1.bf16.msra.mxu1 %v5555_v50  ;;  %7489 = vst [vmem:[#allocation66_spill] sm:$0xff] %v6246_v4  ;;  %v6266_v54 = vld [vmem:[%s6909_s5 + $0xc4] ss:$16 sps:$4 sm:$0xff]   ;;  %v6272_v14 = vld [vmem:[%s6909_s5 + $0xcc] ss:$16 sps:$4 sm:$0xff]  }
 0x55f   :  { %v6016_v8 = vadd.f32 %v2374_v57, %v2373_v7  ;;  %2468 = vmatprep.subr.bf16.mxu0 %v5563_v31  ;;  %2509 = vmatprep.subr.bf16.mxu1 %v5569_v47  ;;  %v6044_v31 = vld [vmem:[%s6908_s2 + $0xe4] ss:$16 sps:$4 sm:$0xff]   ;;  %v6050_v47 = vld [vmem:[%s6908_s2 + $0xec] ss:$16 sps:$4 sm:$0xff]   ;;  %v6254_v57 = vld [vmem:[%s6909_s5 + $0xe0] ss:$16 sps:$4 sm:$0xff]  }
 0x560   :  { %7490 = vst [vmem:[#allocation67_spill] sm:$0xff] %v6254_v57  ;;  %v6260_v7 = vld [vmem:[%s6909_s5 + $0xe8] ss:$16 sps:$4 sm:$0xff]   ;;  %7492 = vst [vmem:[#allocation8_spill] sm:$0xff] %v6266_v54 }
 0x561   :  { %3922 = vtanh.f32 %v6016_v8  ;;  %7491 = vst [vmem:[#allocation65_spill] sm:$0xff] %v6260_v7  ;;  %7493 = vst [vmem:[#allocation11_spill] sm:$0xff] %v6272_v14 }
 0x562   :  { %2469 = vmatpush1.bf16.msra.mxu0 %v5576_v2  ;;  %2510 = vmatpush1.bf16.msra.mxu1 %v5582_v3  ;;  %v6058_v2 = vld [vmem:[%s6908_s2 + $0xe0] ss:$16 sps:$4 sm:$0xff]   ;;  %v6064_v3 = vld [vmem:[%s6908_s2 + $0xe8] ss:$16 sps:$4 sm:$0xff]  }
 0x563   :  { %2470 = vmatprep.subr.bf16.mxu0 %v5588_v5  ;;  %2511 = vmatprep.subr.bf16.mxu1 %v5594_v9  ;;  %v6070_v5 = vld [vmem:[%s6908_s2 + $0xc4] ss:$16 sps:$4 sm:$0xff]   ;;  %v6076_v9 = vld [vmem:[%s6908_s2 + $0xcc] ss:$16 sps:$4 sm:$0xff]  }
 0x566   :  { %2471 = vmatpush1.bf16.msra.mxu0 %v7417_v41  ;;  %2512 = vmatpush1.bf16.msra.mxu1 %v7418_v40  ;;  %v6096_v41 = vld [vmem:[%s6908_s2 + $0xa4] ss:$16 sps:$4 sm:$0xff]   ;;  %v6102_v40 = vld [vmem:[%s6908_s2 + $0xac] ss:$16 sps:$4 sm:$0xff]  }
 0x567   :  { %2472 = vmatprep.subr.bf16.mxu0 %v5612_v55  ;;  %2513 = vmatprep.subr.bf16.mxu1 %v7419_v48  ;;  %v6084_v55 = vld [vmem:[%s6908_s2 + $0xc0] ss:$16 sps:$4 sm:$0xff]  }
 0x568   :  { %v6108_v48 = vld [vmem:[%s6908_s2 + $0xa0] ss:$16 sps:$4 sm:$0xff]  }
 0x56a   :  { %2473 = vmatpush1.bf16.msra.mxu0 %v5861_v24  ;;  %2514 = vmatpush1.bf16.msra.mxu1 %v5867_v22 }
 0x56b   :  { %2474 = vmatprep.subr.bf16.mxu0 %v5873_v36  ;;  %2515 = vmatprep.subr.bf16.mxu1 %v5879_v29 }
 0x56e   :  { %v3923_v58 = vpop.eup %3922  ;;  %2475 = vmatpush1.bf16.msra.mxu0 %v5885_v10  ;;  %2516 = vmatpush1.bf16.msra.mxu1 %v5891_v51 }
 0x56f   :  { %2476 = vmatprep.subr.bf16.mxu0 %v5897_v59  ;;  %2517 = vmatprep.subr.bf16.mxu1 %v5903_v45  ;;  %v2377_v61 = vmul.f32 %v3923_v58, %v2371_v56  ;;  %v6280_v56 = vld [vmem:[%s6909_s5 + $0xc0] ss:$16 sps:$4 sm:$0xff]   ;;  %v6286_v58 = vld [vmem:[%s6909_s5 + $0xc8] ss:$16 sps:$4 sm:$0xff]  }
 0x570   :  { %7494 = vst [vmem:[#allocation10_spill] sm:$0xff] %v6280_v56  ;;  %7495 = vst [vmem:[#allocation13_spill] sm:$0xff] %v6286_v58 }
 0x571   :  { %v6037_v50 = vpack.c.bf16 %v2377_v61, %v2377_v61  ;;  %v6292_v61 = vld [vmem:[%s6909_s5 + $0xa4] ss:$16 sps:$4 sm:$0xff]  }
 0x572   :  { %2477 = vmatpush1.bf16.msra.mxu0 %v5909_v12  ;;  %2518 = vmatpush1.bf16.msra.mxu1 %v5915_v39  ;;  %7496 = vst [vmem:[#allocation12_spill] sm:$0xff] %v6292_v61 }
 0x573   :  { %2574 = vmatprep.subr.bf16.mxu0 %v6044_v31  ;;  %2615 = vmatprep.subr.bf16.mxu1 %v6050_v47 }
 0x575   :  { %2495 = vmatmul.mubr.bf16.vlgmr.msra.gmra.mxu0 %v6037_v50  ;;  %2536 = vmatmul.mubr.bf16.vlgmr.msra.gmra.mxu1 %v6037_v50 }
 0x576   :  { %2575 = vmatpush1.bf16.msra.mxu0 %v6058_v2  ;;  %2616 = vmatpush1.bf16.msra.mxu1 %v6064_v3 }
 0x577   :  { %2576 = vmatprep.subr.bf16.mxu0 %v6070_v5  ;;  %2617 = vmatprep.subr.bf16.mxu1 %v6076_v9 }
 0x578   :  { %2606 = vmatprep.mubr.bf16.mxu0 %v7209_v44  ;;  %2647 = vmatprep.mubr.bf16.mxu1 %v7209_v44 }
 0x57a   :  { %2577 = vmatpush1.bf16.msra.mxu0 %v6084_v55  ;;  %2618 = vmatpush1.bf16.msra.mxu1 %v6090_v15 }
 0x57b   :  { %2578 = vmatprep.subr.bf16.mxu0 %v6096_v41  ;;  %2619 = vmatprep.subr.bf16.mxu1 %v6102_v40 }
 0x57e   :  { %2579 = vmatpush1.bf16.msra.mxu0 %v6108_v48  ;;  %2620 = vmatpush1.bf16.msra.mxu1 %v6114_v62 }
 0x57f   :  { %2580 = vmatprep.subr.bf16.mxu0 %v6120_v30  ;;  %2621 = vmatprep.subr.bf16.mxu1 %v6126_v19 }
 0x582   :  { %2581 = vmatpush1.bf16.msra.mxu0 %v6132_v26  ;;  %2622 = vmatpush1.bf16.msra.mxu1 %v6138_v42 }
 0x583   :  { %2582 = vmatprep.subr.bf16.mxu0 %v6144_v52  ;;  %2623 = vmatprep.subr.bf16.mxu1 %v6150_v16 }
 0x586   :  { %2583 = vmatpush1.bf16.msra.mxu0 %v6156_v46  ;;  %2624 = vmatpush1.bf16.msra.mxu1 %v6162_v0 }
 0x587   :  { %2584 = vmatprep.subr.bf16.mxu0 %v6168_v60  ;;  %2625 = vmatprep.subr.bf16.mxu1 %v6174_v1 }
 0x58a   :  { %2585 = vmatpush1.bf16.msra.mxu0 %v6180_v25  ;;  %2626 = vmatpush1.bf16.msra.mxu1 %v6186_v32 }
 0x58b   :  { %2586 = vmatprep.subr.bf16.mxu0 %v6192_v35  ;;  %2627 = vmatprep.subr.bf16.mxu1 %v6198_v38 }
 0x58e   :  { %2587 = vmatpush1.bf16.msra.mxu0 %v6204_v43  ;;  %2628 = vmatpush1.bf16.msra.mxu1 %v6210_v53 }
 0x58f   :  { %2588 = vmatprep.subr.bf16.mxu0 %v6216_v37  ;;  %2629 = vmatprep.subr.bf16.mxu1 %v6222_v17 }
 0x592   :  { %2589 = vmatpush1.bf16.msra.mxu0 %v6228_v49  ;;  %2630 = vmatpush1.bf16.msra.mxu1 %v6234_v18 }
 0x593   :  { %2680 = vmatprep.subr.bf16.mxu0 %v6240_v34  ;;  %2721 = vmatprep.subr.bf16.mxu1 %v6246_v4 }
 0x595   :  { %2607 = vmatmul.mubr.bf16.vlgmr.msra.gmra.mxu0 %v6037_v50  ;;  %2648 = vmatmul.mubr.bf16.vlgmr.msra.gmra.mxu1 %v6037_v50  ;;  %v6299_v50 = vld [vmem:[%s6909_s5 + $0xa0] ss:$16 sps:$4 sm:$0xff]  }
 0x596   :  { %2681 = vmatpush1.bf16.msra.mxu0 %v6254_v57  ;;  %2722 = vmatpush1.bf16.msra.mxu1 %v6260_v7  ;;  %7497 = vst [vmem:[#allocation15_spill] sm:$0xff] %v6299_v50  ;;  %v7506_v7 = vld [vmem:[#allocation44_spill] sm:$0xff] }
 0x597   :  { %2682 = vmatprep.subr.bf16.mxu0 %v6266_v54  ;;  %2723 = vmatprep.subr.bf16.mxu1 %v6272_v14  ;;  %v7504_v14 = vld [vmem:[#allocation42_spill] sm:$0xff]  ;;  %v7505_v54 = vld [vmem:[#allocation43_spill] sm:$0xff] }
 0x598   :  { %2712 = vmatprep.mubr.bf16.mxu0 %v7209_v44  ;;  %2753 = vmatprep.mubr.bf16.mxu1 %v7209_v44 }
 0x59a   :  { %2683 = vmatpush1.bf16.msra.mxu0 %v6280_v56  ;;  %2724 = vmatpush1.bf16.msra.mxu1 %v6286_v58  ;;  %v6306_v58 = vld [vmem:[%s6909_s5 + $0x84] ss:$16 sps:$4 sm:$0xff]   ;;  %v7501_v56 = vld [vmem:[#allocation39_spill] sm:$0xff] }
 0x59b   :  { %2684 = vmatprep.subr.bf16.mxu0 %v6292_v61  ;;  %2725 = vmatprep.subr.bf16.mxu1 %v7444_v63  ;;  %7498 = vst [vmem:[#allocation14_spill] sm:$0xff] %v6306_v58  ;;  %v7499_v63 = vld [vmem:[#allocation37_spill] sm:$0xff]  ;;  %v7500_v61 = vld [vmem:[#allocation38_spill] sm:$0xff] }
 0x59e   :  { %2685 = vmatpush1.bf16.msra.mxu0 %v6299_v50  ;;  %2726 = vmatpush1.bf16.msra.mxu1 %v7446_v6  ;;  %v7502_v50 = vld [vmem:[#allocation40_spill] sm:$0xff]  ;;  %v7503_v6 = vld [vmem:[#allocation41_spill] sm:$0xff] }
 0x59f   :  { %2686 = vmatprep.subr.bf16.mxu0 %v6306_v58  ;;  %2727 = vmatprep.subr.bf16.mxu1 %v7448_v27  ;;  %v7507_v58 = vld [vmem:[#allocation45_spill] sm:$0xff]  ;;  %v7508_v27 = vld [vmem:[#allocation46_spill] sm:$0xff] }
 0x5a2   :  { %2687 = vmatpush1.bf16.msra.mxu0 %v7449_v21  ;;  %2728 = vmatpush1.bf16.msra.mxu1 %v7499_v63  ;;  %v7509_v21 = vld [vmem:[#allocation47_spill] sm:$0xff]  ;;  %v7510_v63 = vld [vmem:[#allocation48_spill] sm:$0xff] }
 0x5a3   :  { %2688 = vmatprep.subr.bf16.mxu0 %v7500_v61  ;;  %2729 = vmatprep.subr.bf16.mxu1 %v7501_v56  ;;  %v7511_v61 = vld [vmem:[#allocation49_spill] sm:$0xff]  ;;  %v7512_v56 = vld [vmem:[#allocation50_spill] sm:$0xff] }
 0x5a6   :  { %2689 = vmatpush1.bf16.msra.mxu0 %v7502_v50  ;;  %2730 = vmatpush1.bf16.msra.mxu1 %v7503_v6  ;;  %v7513_v50 = vld [vmem:[#allocation51_spill] sm:$0xff]  ;;  %v7514_v6 = vld [vmem:[#allocation52_spill] sm:$0xff] }
 0x5a7   :  { %2690 = vmatprep.subr.bf16.mxu0 %v7504_v14  ;;  %2731 = vmatprep.subr.bf16.mxu1 %v7505_v54  ;;  %v7515_v14 = vld [vmem:[#allocation53_spill] sm:$0xff]  ;;  %v7516_v54 = vld [vmem:[#allocation54_spill] sm:$0xff] }
 0x5aa   :  { %2691 = vmatpush1.bf16.msra.mxu0 %v7506_v7  ;;  %2732 = vmatpush1.bf16.msra.mxu1 %v7507_v58  ;;  %v7517_v7 = vld [vmem:[#allocation55_spill] sm:$0xff] }
 0x5ab   :  { %2692 = vmatprep.subr.bf16.mxu0 %v7508_v27  ;;  %2733 = vmatprep.subr.bf16.mxu1 %v7509_v21 }
 0x5ae   :  { %2693 = vmatpush1.bf16.msra.mxu0 %v7510_v63  ;;  %2734 = vmatpush1.bf16.msra.mxu1 %v7511_v61 }
 0x5af   :  { %2694 = vmatprep.subr.bf16.mxu0 %v7512_v56  ;;  %2735 = vmatprep.subr.bf16.mxu1 %v7513_v50 }
 0x5b2   :  { %2695 = vmatpush1.bf16.msra.mxu0 %v7514_v6  ;;  %2736 = vmatpush1.bf16.msra.mxu1 %v7515_v14 }
 0x5b3   :  { %2762 = vmatprep.subr.bf16.mxu0 %v7516_v54  ;;  %2803 = vmatprep.subr.bf16.mxu1 %v7517_v7 }
 0x615   :  { %v2414_v58 = vpop.f32.mrf.mxu0  ;;  %v2455_v27 = vpop.f32.mrf.mxu1 }
 0x617   :  { %v2416_v57 = vpop.f32.mrf.mxu0  ;;  %v2457_v21 = vpop.f32.mrf.mxu1 }
 0x619   :  { %v2418_v4 = vpop.f32.mrf.mxu0  ;;  %v2459_v63 = vpop.f32.mrf.mxu1 }
 0x61b   :  { %v2419_v34 = vpop.f32.mrf.mxu0  ;;  %v2460_v61 = vpop.f32.mrf.mxu1 }
 0x635   :  { %v2496_v18 = vpop.f32.mrf.mxu0  ;;  %v2537_v56 = vpop.f32.mrf.mxu1 }
 0x636   :  { %v2497_v49 = vadd.f32 %v2496_v18, %v2414_v58  ;;  %v2538_v63 = vadd.f32 %v2537_v56, %v2455_v27 }
 0x637   :  { %v2498_v50 = vpop.f32.mrf.mxu0  ;;  %v2539_v17 = vpop.f32.mrf.mxu1 }
 0x638   :  { %v2544_v6 = vadd.f32 %v2497_v49, %v5123_v13  ;;  %v2499_v14 = vadd.f32 %v2498_v50, %v2416_v57  ;;  %v2540_v43 = vadd.f32 %v2539_v17, %v2457_v21  ;;  %v2546_v18 = vadd.f32 %v2538_v63, %v5138_v33  ;;  %v7518_v21 = vld [vmem:[#allocation80_spill] sm:$0xff] }
 0x639   :  { %v2500_v37 = vpop.f32.mrf.mxu0  ;;  %v2541_v54 = vpop.f32.mrf.mxu1 }
 0x63a   :  { %v2548_v53 = vmul.f32 0.5, %v2544_v6  ;;  %v2545_v7 = vadd.f32 %v2499_v14, %v5127_v28  ;;  %v2547_v34 = vadd.f32 %v2540_v43, %v5133_v20  ;;  %v2550_v58 = vmul.f32 0.5, %v2546_v18 }
 0x63b   :  { %v2501_v38 = vpop.f32.mrf.mxu0  ;;  %v2542_v35 = vpop.f32.mrf.mxu1 }
 0x63c   :  { %3924 = vtanh.f32 %v2548_v53  ;;  %v2549_v4 = vmul.f32 0.5, %v2545_v7 }
 0x63e   :  { %3926 = vtanh.f32 %v2549_v4  ;;  %v7519_v4 = vld [vmem:[#allocation82_spill] sm:$0xff] }
 0x63f   :  { %3928 = vtanh.f32 %v2547_v34 }
 0x640   :  { %3930 = vtanh.f32 %v2550_v58 }
 0x649   :  { %v3925_v49 = vpop.eup %3924 }
 0x64a   :  { %v2554_v57 = vmul.f32 0.5, %v3925_v49 }
 0x64b   :  { %v3927_v37 = vpop.eup %3926 }
 0x64c   :  { %v2557_v61 = vadd.f32 0.5, %v2554_v57  ;;  %v2555_v50 = vmul.f32 0.5, %v3927_v37  ;;  %v3929_v17 = vpop.eup %3928 }
 0x64d   :  { %v3931_v63 = vpop.eup %3930 }
 0x64e   :  { %v2558_v6 = vadd.f32 0.5, %v2555_v50  ;;  %v2562_v38 = vmul.f32 %v3929_v17, %v2557_v61  ;;  %v2556_v50 = vmul.f32 0.5, %v3931_v63 }
 0x650   :  { %v2561_v35 = vmul.f32 %v2558_v6, %v5993_v23  ;;  %v7520_v23 = vld [vmem:[#allocation83_spill] sm:$0xff]  ;;  %v2559_v6 = vadd.f32 0.5, %v2556_v50  ;;  %v6386_v50 = vld [vmem:[%s6910_s4 + $0xa4] ss:$16 sps:$4 sm:$0xff]  }
 0x652   :  { %v6335_v53 = vadd.f32 %v2562_v38, %v2561_v35  ;;  %v7521_v35 = vld [vmem:[#allocation81_spill] sm:$0xff] }
 0x654   :  { %3932 = vtanh.f32 %v6335_v53 }
 0x655   :  { %v2608_v43 = vpop.f32.mrf.mxu0  ;;  %v2649_v27 = vpop.f32.mrf.mxu1 }
 0x656   :  { %v2656_v56 = vadd.f32 %v2608_v43, %v7518_v21  ;;  %v2658_v38 = vadd.f32 %v2649_v27, %v7521_v35  ;;  %v6354_v27 = vld [vmem:[%s6910_s4 + $0xe8] ss:$16 sps:$4 sm:$0xff]   ;;  %v6399_v35 = vld [vmem:[%s6910_s4 + $0xa0] ss:$16 sps:$4 sm:$0xff]  }
 0x657   :  { %v2610_v14 = vpop.f32.mrf.mxu0  ;;  %v2651_v54 = vpop.f32.mrf.mxu1 }
 0x658   :  { %v2660_v7 = vmul.f32 0.5, %v2656_v56  ;;  %v2657_v34 = vadd.f32 %v2610_v14, %v7519_v4  ;;  %v2659_v57 = vadd.f32 %v2651_v54, %v7520_v23  ;;  %v2662_v14 = vmul.f32 0.5, %v2658_v38  ;;  %v6348_v54 = vld [vmem:[%s6910_s4 + $0xe0] ss:$16 sps:$4 sm:$0xff]   ;;  %v6360_v4 = vld [vmem:[%s6910_s4 + $0xc4] ss:$16 sps:$4 sm:$0xff]  }
 0x659   :  { %v2612_v18 = vpop.f32.mrf.mxu0  ;;  %v2653_v58 = vpop.f32.mrf.mxu1  ;;  %v6374_v23 = vld [vmem:[%s6910_s4 + $0xc0] ss:$16 sps:$4 sm:$0xff]   ;;  %v6405_v38 = vld [vmem:[%s6910_s4 + $0xa8] ss:$16 sps:$4 sm:$0xff]  }
 0x65a   :  { %3934 = vtanh.f32 %v2660_v7  ;;  %v2661_v49 = vmul.f32 0.5, %v2657_v34  ;;  %v6366_v34 = vld [vmem:[%s6910_s4 + $0xcc] ss:$16 sps:$4 sm:$0xff]  }
 0x65b   :  { %v2613_v37 = vpop.f32.mrf.mxu0  ;;  %v2654_v61 = vpop.f32.mrf.mxu1 }
 0x65c   :  { %3936 = vtanh.f32 %v2661_v49 }
 0x65d   :  { %3938 = vtanh.f32 %v2659_v57  ;;  %v6380_v57 = vld [vmem:[%s6910_s4 + $0xc8] ss:$16 sps:$4 sm:$0xff]  }
 0x65e   :  { %3940 = vtanh.f32 %v2662_v14  ;;  %v6426_v14 = vld [vmem:[%s6910_s4 + $0x80] ss:$16 sps:$4 sm:$0xff]  }
 0x661   :  { %v3933_v17 = vpop.eup %3932 }
 0x662   :  { %v2565_v43 = vmul.f32 %v3933_v17, %v2559_v6  ;;  %v6392_v6 = vld [vmem:[%s6910_s4 + $0xac] ss:$16 sps:$4 sm:$0xff]  }
 0x664   :  { %v6343_v21 = vadd.f32 %v2565_v43, %v6001_v11  ;;  %v2679_v56 = vpack.c.bf16 %v2565_v43, %v2565_v43 }
 0x666   :  { %2713 = vmatmul.mubr.bf16.vlgmr.msra.gmra.mxu0 %v2679_v56  ;;  %2754 = vmatmul.mubr.bf16.vlgmr.msra.gmra.mxu1 %v2679_v56  ;;  %v6419_v56 = vld [vmem:[%s6910_s4 + $0x8c] ss:$16 sps:$4 sm:$0xff]  }
 0x667   :  { %v3935_v7 = vpop.eup %3934  ;;  %2763 = vmatpush1.bf16.msra.mxu0 %v6348_v54  ;;  %2804 = vmatpush1.bf16.msra.mxu1 %v6354_v27 }
 0x668   :  { %v2666_v11 = vmul.f32 0.5, %v3935_v7  ;;  %2764 = vmatprep.subr.bf16.mxu0 %v6360_v4  ;;  %2805 = vmatprep.subr.bf16.mxu1 %v6366_v34  ;;  %v6432_v7 = vld [vmem:[%s6910_s4 + $0x88] ss:$16 sps:$4 sm:$0xff]  }
 0x669   :  { %v3937_v63 = vpop.eup %3936  ;;  %2794 = vmatprep.mubr.bf16.mxu0 %v7209_v44  ;;  %2835 = vmatprep.mubr.bf16.mxu1 %v7209_v44 }
 0x66a   :  { %v2669_v18 = vadd.f32 0.5, %v2666_v11  ;;  %v2667_v58 = vmul.f32 0.5, %v3937_v63  ;;  %v3939_v49 = vpop.eup %3938  ;;  %v6438_v11 = vld [vmem:[%s6910_s4 + $0x64] ss:$16 sps:$4 sm:$0xff]   ;;  %v6444_v63 = vld [vmem:[%s6910_s4 + $0x6c] ss:$16 sps:$4 sm:$0xff]  }
 0x66b   :  { %2765 = vmatpush1.bf16.msra.mxu0 %v6374_v23  ;;  %2806 = vmatpush1.bf16.msra.mxu1 %v6380_v57 }
 0x66c   :  { %v2670_v37 = vadd.f32 0.5, %v2667_v58  ;;  %v2674_v61 = vmul.f32 %v3939_v49, %v2669_v18  ;;  %2766 = vmatprep.subr.bf16.mxu0 %v6386_v50  ;;  %2807 = vmatprep.subr.bf16.mxu1 %v6392_v6  ;;  %v3941_v18 = vpop.eup %3940  ;;  %v6450_v58 = vld [vmem:[%s6910_s4 + $0x60] ss:$16 sps:$4 sm:$0xff]   ;;  %v6456_v49 = vld [vmem:[%s6910_s4 + $0x68] ss:$16 sps:$4 sm:$0xff]  }
 0x66d   :  { %7522 = vst [vmem:[#allocation17_spill] sm:$0xff] %v6450_v58  ;;  %7523 = vst [vmem:[#allocation16_spill] sm:$0xff] %v6456_v49 }
 0x66e   :  { %v2673_v17 = vmul.f32 %v2670_v37, %v6016_v8  ;;  %v6413_v8 = vld [vmem:[%s6910_s4 + $0x84] ss:$16 sps:$4 sm:$0xff]  }
 0x66f   :  { %2767 = vmatpush1.bf16.msra.mxu0 %v6399_v35  ;;  %2808 = vmatpush1.bf16.msra.mxu1 %v6405_v38  ;;  %v6462_v37 = vld [vmem:[%s6910_s4 + $0x44] ss:$16 sps:$4 sm:$0xff]  }
 0x670   :  { %v6408_v43 = vadd.f32 %v2674_v61, %v2673_v17  ;;  %2768 = vmatprep.subr.bf16.mxu0 %v6413_v8  ;;  %2809 = vmatprep.subr.bf16.mxu1 %v6419_v56  ;;  %v6468_v61 = vld [vmem:[%s6910_s4 + $0x4c] ss:$16 sps:$4 sm:$0xff]   ;;  %v2668_v17 = vmul.f32 0.5, %v3941_v18 }
 0x671   :  { %7524 = vst [vmem:[#allocation19_spill] sm:$0xff] %v6468_v61 }
 0x672   :  { %3942 = vtanh.f32 %v6408_v43 }
 0x673   :  { %2769 = vmatpush1.bf16.msra.mxu0 %v6426_v14  ;;  %2810 = vmatpush1.bf16.msra.mxu1 %v6432_v7 }
 0x674   :  { %2770 = vmatprep.subr.bf16.mxu0 %v6438_v11  ;;  %2811 = vmatprep.subr.bf16.mxu1 %v6444_v63 }
 0x677   :  { %2771 = vmatpush1.bf16.msra.mxu0 %v6450_v58  ;;  %2812 = vmatpush1.bf16.msra.mxu1 %v6456_v49  ;;  %v2671_v49 = vadd.f32 0.5, %v2668_v17  ;;  %v7538_v17 = vld [vmem:[#allocation11_spill] sm:$0xff] }
 0x678   :  { %2772 = vmatprep.subr.bf16.mxu0 %v6462_v37  ;;  %2813 = vmatprep.subr.bf16.mxu1 %v6468_v61 }
 0x67b   :  { %2773 = vmatpush1.bf16.msra.mxu0 %v5861_v24  ;;  %2814 = vmatpush1.bf16.msra.mxu1 %v5867_v22  ;;  %v7525_v24 = vld [vmem:[#allocation68_spill] sm:$0xff]  ;;  %v7526_v22 = vld [vmem:[#allocation70_spill] sm:$0xff] }
 0x67c   :  { %2774 = vmatprep.subr.bf16.mxu0 %v5873_v36  ;;  %2815 = vmatprep.subr.bf16.mxu1 %v5879_v29  ;;  %v7527_v36 = vld [vmem:[#allocation71_spill] sm:$0xff]  ;;  %v7528_v29 = vld [vmem:[#allocation69_spill] sm:$0xff] }
 0x67f   :  { %v3943_v58 = vpop.eup %3942  ;;  %2775 = vmatpush1.bf16.msra.mxu0 %v5885_v10  ;;  %2816 = vmatpush1.bf16.msra.mxu1 %v5891_v51  ;;  %v7529_v10 = vld [vmem:[#allocation72_spill] sm:$0xff]  ;;  %v7530_v51 = vld [vmem:[#allocation74_spill] sm:$0xff] }
 0x680   :  { %2776 = vmatprep.subr.bf16.mxu0 %v5897_v59  ;;  %2817 = vmatprep.subr.bf16.mxu1 %v5903_v45  ;;  %v2677_v61 = vmul.f32 %v3943_v58, %v2671_v49  ;;  %v7531_v59 = vld [vmem:[#allocation75_spill] sm:$0xff]  ;;  %v7532_v45 = vld [vmem:[#allocation9_spill] sm:$0xff] }
 0x681   :  { %v7535_v58 = vld [vmem:[#allocation67_spill] sm:$0xff]  ;;  %v7536_v49 = vld [vmem:[#allocation65_spill] sm:$0xff] }
 0x682   :  { %v2678_v18 = vpack.c.bf16 %v2677_v61, %v2677_v61  ;;  %v7537_v61 = vld [vmem:[#allocation8_spill] sm:$0xff] }
 0x683   :  { %2777 = vmatpush1.bf16.msra.mxu0 %v5909_v12  ;;  %2818 = vmatpush1.bf16.msra.mxu1 %v5915_v39  ;;  %v7533_v12 = vld [vmem:[#allocation73_spill] sm:$0xff]  ;;  %v7534_v39 = vld [vmem:[#allocation66_spill] sm:$0xff] }
 0x684   :  { %2874 = vmatprep.subr.bf16.mxu0 %v6044_v31  ;;  %2915 = vmatprep.subr.bf16.mxu1 %v6050_v47 }
 0x686   :  { %2795 = vmatmul.mubr.bf16.vlgmr.msra.gmra.mxu0 %v2678_v18  ;;  %2836 = vmatmul.mubr.bf16.vlgmr.msra.gmra.mxu1 %v2678_v18 }
 0x687   :  { %2875 = vmatpush1.bf16.msra.mxu0 %v6058_v2  ;;  %2916 = vmatpush1.bf16.msra.mxu1 %v6064_v3 }
 0x688   :  { %2876 = vmatprep.subr.bf16.mxu0 %v6070_v5  ;;  %2917 = vmatprep.subr.bf16.mxu1 %v6076_v9 }
 0x689   :  { %2906 = vmatprep.mubr.bf16.mxu0 %v7209_v44  ;;  %2947 = vmatprep.mubr.bf16.mxu1 %v7209_v44 }
 0x68b   :  { %2877 = vmatpush1.bf16.msra.mxu0 %v6084_v55  ;;  %2918 = vmatpush1.bf16.msra.mxu1 %v6090_v15 }
 0x68c   :  { %2878 = vmatprep.subr.bf16.mxu0 %v6096_v41  ;;  %2919 = vmatprep.subr.bf16.mxu1 %v6102_v40 }
 0x68f   :  { %2879 = vmatpush1.bf16.msra.mxu0 %v6108_v48  ;;  %2920 = vmatpush1.bf16.msra.mxu1 %v6114_v62 }
 0x690   :  { %2880 = vmatprep.subr.bf16.mxu0 %v6120_v30  ;;  %2921 = vmatprep.subr.bf16.mxu1 %v6126_v19 }
 0x693   :  { %2881 = vmatpush1.bf16.msra.mxu0 %v6132_v26  ;;  %2922 = vmatpush1.bf16.msra.mxu1 %v6138_v42 }
 0x694   :  { %2882 = vmatprep.subr.bf16.mxu0 %v6144_v52  ;;  %2923 = vmatprep.subr.bf16.mxu1 %v6150_v16 }
 0x697   :  { %2883 = vmatpush1.bf16.msra.mxu0 %v6156_v46  ;;  %2924 = vmatpush1.bf16.msra.mxu1 %v6162_v0 }
 0x698   :  { %2884 = vmatprep.subr.bf16.mxu0 %v6168_v60  ;;  %2925 = vmatprep.subr.bf16.mxu1 %v6174_v1 }
 0x69b   :  { %2885 = vmatpush1.bf16.msra.mxu0 %v6180_v25  ;;  %2926 = vmatpush1.bf16.msra.mxu1 %v6186_v32 }
 0x69c   :  { %2886 = vmatprep.subr.bf16.mxu0 %v7525_v24  ;;  %2927 = vmatprep.subr.bf16.mxu1 %v7526_v22 }
 0x69f   :  { %2887 = vmatpush1.bf16.msra.mxu0 %v7527_v36  ;;  %2928 = vmatpush1.bf16.msra.mxu1 %v7528_v29 }
 0x6a0   :  { %2888 = vmatprep.subr.bf16.mxu0 %v7529_v10  ;;  %2929 = vmatprep.subr.bf16.mxu1 %v7530_v51 }
 0x6a3   :  { %2889 = vmatpush1.bf16.msra.mxu0 %v7531_v59  ;;  %2930 = vmatpush1.bf16.msra.mxu1 %v7532_v45  ;;  %v7539_v59 = vld [vmem:[#allocation10_spill] sm:$0xff]  ;;  %v7540_v45 = vld [vmem:[#allocation13_spill] sm:$0xff] }
 0x6a4   :  { %2980 = vmatprep.subr.bf16.mxu0 %v7533_v12  ;;  %3021 = vmatprep.subr.bf16.mxu1 %v7534_v39  ;;  %v7541_v12 = vld [vmem:[#allocation12_spill] sm:$0xff] }
 0x6a6   :  { %2907 = vmatmul.mubr.bf16.vlgmr.msra.gmra.mxu0 %v2678_v18  ;;  %2948 = vmatmul.mubr.bf16.vlgmr.msra.gmra.mxu1 %v2678_v18  ;;  %v6529_v18 = vld [vmem:[%s6909_s5 + $0xac] ss:$16 sps:$4 sm:$0xff]  }
 0x6a7   :  { %2981 = vmatpush1.bf16.msra.mxu0 %v7535_v58  ;;  %3022 = vmatpush1.bf16.msra.mxu1 %v7536_v49  ;;  %7542 = vst [vmem:[#allocation18_spill] sm:$0xff] %v6529_v18 }
 0x6a8   :  { %2982 = vmatprep.subr.bf16.mxu0 %v7537_v61  ;;  %3023 = vmatprep.subr.bf16.mxu1 %v7538_v17  ;;  %v7543_v61 = vld [vmem:[#allocation15_spill] sm:$0xff] }
 0x6a9   :  { %3012 = vmatprep.mubr.bf16.mxu0 %v7209_v44  ;;  %3053 = vmatprep.mubr.bf16.mxu1 %v7209_v44  ;;  %v6536_v17 = vld [vmem:[%s6909_s5 + $0xa8] ss:$16 sps:$4 sm:$0xff]  }
 0x6aa   :  { %7544 = vst [vmem:[#allocation21_spill] sm:$0xff] %v6536_v17 }
 0x6ab   :  { %2983 = vmatpush1.bf16.msra.mxu0 %v7539_v59  ;;  %3024 = vmatpush1.bf16.msra.mxu1 %v7540_v45  ;;  %v7545_v59 = vld [vmem:[#allocation14_spill] sm:$0xff] }
 0x6ac   :  { %2984 = vmatprep.subr.bf16.mxu0 %v7541_v12  ;;  %3025 = vmatprep.subr.bf16.mxu1 %v6529_v18  ;;  %v6543_v12 = vld [vmem:[%s6909_s5 + $0x8c] ss:$16 sps:$4 sm:$0xff]  }
 0x6ad   :  { %7546 = vst [vmem:[#allocation20_spill] sm:$0xff] %v6543_v12 }
 0x6af   :  { %2985 = vmatpush1.bf16.msra.mxu0 %v7543_v61  ;;  %3026 = vmatpush1.bf16.msra.mxu1 %v6536_v17  ;;  %v6549_v61 = vld [vmem:[%s6909_s5 + $0x80] ss:$16 sps:$4 sm:$0xff]   ;;  %v6555_v17 = vld [vmem:[%s6909_s5 + $0x88] ss:$16 sps:$4 sm:$0xff]  }
 0x6b0   :  { %2986 = vmatprep.subr.bf16.mxu0 %v7545_v59  ;;  %3027 = vmatprep.subr.bf16.mxu1 %v6543_v12  ;;  %7547 = vst [vmem:[#allocation23_spill] sm:$0xff] %v6549_v61  ;;  %7548 = vst [vmem:[#allocation22_spill] sm:$0xff] %v6555_v17  ;;  %v6561_v59 = vld [vmem:[%s6909_s5 + $0x64] ss:$16 sps:$4 sm:$0xff]   ;;  %v6567_v12 = vld [vmem:[%s6909_s5 + $0x6c] ss:$16 sps:$4 sm:$0xff]  }
 0x6b1   :  { %7549 = vst [vmem:[#allocation25_spill] sm:$0xff] %v6561_v59  ;;  %7550 = vst [vmem:[#allocation24_spill] sm:$0xff] %v6567_v12 }
 0x6b3   :  { %2987 = vmatpush1.bf16.msra.mxu0 %v6549_v61  ;;  %3028 = vmatpush1.bf16.msra.mxu1 %v6555_v17  ;;  %v6573_v61 = vld [vmem:[%s6909_s5 + $0x60] ss:$16 sps:$4 sm:$0xff]   ;;  %v6579_v17 = vld [vmem:[%s6909_s5 + $0x68] ss:$16 sps:$4 sm:$0xff]  }
 0x6b4   :  { %2988 = vmatprep.subr.bf16.mxu0 %v6561_v59  ;;  %3029 = vmatprep.subr.bf16.mxu1 %v6567_v12  ;;  %7551 = vst [vmem:[#allocation27_spill] sm:$0xff] %v6573_v61  ;;  %7552 = vst [vmem:[#allocation26_spill] sm:$0xff] %v6579_v17  ;;  %v6585_v59 = vld [vmem:[%s6909_s5 + $0x44] ss:$16 sps:$4 sm:$0xff]   ;;  %v6591_v12 = vld [vmem:[%s6909_s5 + $0x4c] ss:$16 sps:$4 sm:$0xff]  }
 0x6b5   :  { %7553 = vst [vmem:[#allocation29_spill] sm:$0xff] %v6585_v59  ;;  %7554 = vst [vmem:[#allocation28_spill] sm:$0xff] %v6591_v12 }
 0x6b7   :  { %2989 = vmatpush1.bf16.msra.mxu0 %v6573_v61  ;;  %3030 = vmatpush1.bf16.msra.mxu1 %v6579_v17  ;;  %v6597_v61 = vld [vmem:[%s6909_s5 + $0x40] ss:$16 sps:$4 sm:$0xff]   ;;  %v6603_v17 = vld [vmem:[%s6909_s5 + $0x48] ss:$16 sps:$4 sm:$0xff]  }
 0x6b8   :  { %2990 = vmatprep.subr.bf16.mxu0 %v6585_v59  ;;  %3031 = vmatprep.subr.bf16.mxu1 %v6591_v12  ;;  %7555 = vst [vmem:[#allocation30_spill] sm:$0xff] %v6597_v61  ;;  %7556 = vst [vmem:[#allocation31_spill] sm:$0xff] %v6603_v17  ;;  %v6609_v59 = vld [vmem:[%s6909_s5 + $0x24] ss:$16 sps:$4 sm:$0xff]   ;;  %v6615_v12 = vld [vmem:[%s6909_s5 + $0x2c] ss:$16 sps:$4 sm:$0xff]  }
 0x6b9   :  { %7557 = vst [vmem:[#allocation32_spill] sm:$0xff] %v6609_v59  ;;  %7558 = vst [vmem:[#allocation33_spill] sm:$0xff] %v6615_v12 }
 0x6bb   :  { %2991 = vmatpush1.bf16.msra.mxu0 %v6597_v61  ;;  %3032 = vmatpush1.bf16.msra.mxu1 %v6603_v17  ;;  %v6621_v61 = vld [vmem:[%s6909_s5 + $0x20] ss:$16 sps:$4 sm:$0xff]   ;;  %v6627_v17 = vld [vmem:[%s6909_s5 + $0x28] ss:$16 sps:$4 sm:$0xff]  }
 0x6bc   :  { %2992 = vmatprep.subr.bf16.mxu0 %v6609_v59  ;;  %3033 = vmatprep.subr.bf16.mxu1 %v6615_v12  ;;  %7559 = vst [vmem:[#allocation63_spill] sm:$0xff] %v6621_v61  ;;  %7560 = vst [vmem:[#allocation34_spill] sm:$0xff] %v6627_v17  ;;  %v6633_v59 = vld [vmem:[%s6909_s5 + $0x4] ss:$16 sps:$4 sm:$0xff]   ;;  %v6639_v12 = vld [vmem:[%s6909_s5 + $0xc] ss:$16 sps:$4 sm:$0xff]  }
 0x6bd   :  { %7561 = vst [vmem:[#allocation64_spill] sm:$0xff] %v6633_v59  ;;  %7562 = vst [vmem:[#allocation35_spill] sm:$0xff] %v6639_v12 }
 0x6bf   :  { %2993 = vmatpush1.bf16.msra.mxu0 %v6621_v61  ;;  %3034 = vmatpush1.bf16.msra.mxu1 %v6627_v17  ;;  %v6645_v61 = vld [vmem:[%s6909_s5] ss:$16 sps:$4 sm:$0xff]   ;;  %v6651_v17 = vld [vmem:[%s6909_s5 + $0x8] ss:$16 sps:$4 sm:$0xff]  }
 0x6c0   :  { %2994 = vmatprep.subr.bf16.mxu0 %v6633_v59  ;;  %3035 = vmatprep.subr.bf16.mxu1 %v6639_v12  ;;  %7563 = vst [vmem:[#allocation36_spill] sm:$0xff] %v6645_v61  ;;  %7564 = vst [vmem:[#allocation76_spill] sm:$0xff] %v6651_v17  ;;  %v6657_v59 = vld [vmem:[%s6910_s4 + $0xe4] ss:$16 sps:$4 sm:$0xff]   ;;  %v6663_v12 = vld [vmem:[%s6910_s4 + $0xec] ss:$16 sps:$4 sm:$0xff]  }
 0x6c1   :  { %7565 = vst [vmem:[#allocation78_spill] sm:$0xff] %v6657_v59  ;;  %7566 = vst [vmem:[#allocation79_spill] sm:$0xff] %v6663_v12 }
 0x6c3   :  { %2995 = vmatpush1.bf16.msra.mxu0 %v6645_v61  ;;  %3036 = vmatpush1.bf16.msra.mxu1 %v6651_v17 }
 0x6c4   :  { %3062 = vmatprep.subr.bf16.mxu0 %v6657_v59  ;;  %3103 = vmatprep.subr.bf16.mxu1 %v6663_v12 }
 0x726   :  { %v2714_v61 = vpop.f32.mrf.mxu0  ;;  %v2755_v18 = vpop.f32.mrf.mxu1 }
 0x728   :  { %v2716_v45 = vpop.f32.mrf.mxu0  ;;  %v2757_v49 = vpop.f32.mrf.mxu1 }
 0x72a   :  { %v2718_v58 = vpop.f32.mrf.mxu0  ;;  %v2759_v17 = vpop.f32.mrf.mxu1 }
 0x72c   :  { %v2719_v39 = vpop.f32.mrf.mxu0  ;;  %v2760_v51 = vpop.f32.mrf.mxu1 }
 0x746   :  { %v2796_v10 = vpop.f32.mrf.mxu0  ;;  %v2837_v29 = vpop.f32.mrf.mxu1 }
 0x747   :  { %v2797_v36 = vadd.f32 %v2796_v10, %v2714_v61  ;;  %v2838_v39 = vadd.f32 %v2837_v29, %v2755_v18 }
 0x748   :  { %v2798_v22 = vpop.f32.mrf.mxu0  ;;  %v2839_v59 = vpop.f32.mrf.mxu1 }
 0x749   :  { %v2844_v24 = vadd.f32 %v2797_v36, %v5123_v13  ;;  %v2799_v32 = vadd.f32 %v2798_v22, %v2716_v45  ;;  %v2840_v0 = vadd.f32 %v2839_v59, %v2757_v49  ;;  %v2846_v10 = vadd.f32 %v2838_v39, %v5138_v33  ;;  %v7567_v45 = vld [vmem:[#allocation84_spill] sm:$0xff] }
 0x74a   :  { %v2800_v25 = vpop.f32.mrf.mxu0  ;;  %v2841_v1 = vpop.f32.mrf.mxu1 }
 0x74b   :  { %v2848_v60 = vmul.f32 0.5, %v2844_v24  ;;  %v2845_v12 = vadd.f32 %v2799_v32, %v5127_v28  ;;  %v2847_v51 = vadd.f32 %v2840_v0, %v5133_v20  ;;  %v2850_v61 = vmul.f32 0.5, %v2846_v10 }
 0x74c   :  { %v2801_v46 = vpop.f32.mrf.mxu0  ;;  %v2842_v16 = vpop.f32.mrf.mxu1 }
 0x74d   :  { %3944 = vtanh.f32 %v2848_v60  ;;  %v2849_v58 = vmul.f32 0.5, %v2845_v12 }
 0x74f   :  { %3946 = vtanh.f32 %v2849_v58  ;;  %v7568_v58 = vld [vmem:[#allocation86_spill] sm:$0xff] }
 0x750   :  { %3948 = vtanh.f32 %v2847_v51 }
 0x751   :  { %3950 = vtanh.f32 %v2850_v61 }
 0x75a   :  { %v3945_v36 = vpop.eup %3944 }
 0x75b   :  { %v2854_v22 = vmul.f32 0.5, %v3945_v36 }
 0x75c   :  { %v3947_v25 = vpop.eup %3946 }
 0x75d   :  { %v2857_v1 = vadd.f32 0.5, %v2854_v22  ;;  %v2855_v24 = vmul.f32 0.5, %v3947_v25  ;;  %v3949_v59 = vpop.eup %3948 }
 0x75e   :  { %v3951_v39 = vpop.eup %3950 }
 0x75f   :  { %v2858_v32 = vadd.f32 0.5, %v2855_v24  ;;  %v2862_v46 = vmul.f32 %v3949_v59, %v2857_v1  ;;  %v2856_v24 = vmul.f32 0.5, %v3951_v39 }
 0x761   :  { %v2861_v16 = vmul.f32 %v2858_v32, %v6335_v53  ;;  %v7569_v53 = vld [vmem:[#allocation87_spill] sm:$0xff]  ;;  %v2859_v32 = vadd.f32 0.5, %v2856_v24  ;;  %v6710_v24 = vld [vmem:[%s6910_s4 + $0x40] ss:$16 sps:$4 sm:$0xff]  }
 0x763   :  { %v6671_v60 = vadd.f32 %v2862_v46, %v2861_v16  ;;  %v7570_v16 = vld [vmem:[#allocation85_spill] sm:$0xff] }
 0x765   :  { %3952 = vtanh.f32 %v6671_v60 }
 0x766   :  { %v2908_v0 = vpop.f32.mrf.mxu0  ;;  %v2949_v29 = vpop.f32.mrf.mxu1 }
 0x767   :  { %v2956_v12 = vadd.f32 %v2908_v0, %v7567_v45  ;;  %v2958_v46 = vadd.f32 %v2949_v29, %v7570_v16  ;;  %v6728_v16 = vld [vmem:[%s6910_s4 + $0x2c] ss:$16 sps:$4 sm:$0xff]  }
 0x768   :  { %v2910_v49 = vpop.f32.mrf.mxu0  ;;  %v2951_v17 = vpop.f32.mrf.mxu1 }
 0x769   :  { %v2960_v18 = vmul.f32 0.5, %v2956_v12  ;;  %v2957_v51 = vadd.f32 %v2910_v49, %v7568_v58  ;;  %v2959_v22 = vadd.f32 %v2951_v17, %v7569_v53  ;;  %v2962_v49 = vmul.f32 0.5, %v2958_v46  ;;  %v7571_v53 = vld [vmem:[#allocation17_spill] sm:$0xff] }
 0x76a   :  { %v2912_v10 = vpop.f32.mrf.mxu0  ;;  %v2953_v61 = vpop.f32.mrf.mxu1 }
 0x76b   :  { %3954 = vtanh.f32 %v2960_v18  ;;  %v2961_v36 = vmul.f32 0.5, %v2957_v51 }
 0x76c   :  { %v2913_v25 = vpop.f32.mrf.mxu0  ;;  %v2954_v1 = vpop.f32.mrf.mxu1 }
 0x76d   :  { %3956 = vtanh.f32 %v2961_v36  ;;  %v7573_v25 = vld [vmem:[#allocation19_spill] sm:$0xff] }
 0x76e   :  { %3958 = vtanh.f32 %v2959_v22  ;;  %v7572_v22 = vld [vmem:[#allocation16_spill] sm:$0xff] }
 0x76f   :  { %3960 = vtanh.f32 %v2962_v49  ;;  %v6740_v49 = vld [vmem:[%s6910_s4 + $0x28] ss:$16 sps:$4 sm:$0xff]  }
 0x772   :  { %v3953_v59 = vpop.eup %3952 }
 0x773   :  { %v2865_v0 = vmul.f32 %v3953_v59, %v2859_v32  ;;  %v6716_v32 = vld [vmem:[%s6910_s4 + $0x48] ss:$16 sps:$4 sm:$0xff]   ;;  %v6722_v59 = vld [vmem:[%s6910_s4 + $0x24] ss:$16 sps:$4 sm:$0xff]  }
 0x775   :  { %v6679_v45 = vadd.f32 %v2865_v0, %v6343_v21  ;;  %v2979_v12 = vpack.c.bf16 %v2865_v0, %v2865_v0 }
 0x777   :  { %3013 = vmatmul.mubr.bf16.vlgmr.msra.gmra.mxu0 %v2979_v12  ;;  %3054 = vmatmul.mubr.bf16.vlgmr.msra.gmra.mxu1 %v2979_v12  ;;  %v6734_v12 = vld [vmem:[%s6910_s4 + $0x20] ss:$16 sps:$4 sm:$0xff]  }
 0x778   :  { %v3955_v18 = vpop.eup %3954  ;;  %3063 = vmatpush1.bf16.msra.mxu0 %v6348_v54  ;;  %3104 = vmatpush1.bf16.msra.mxu1 %v6354_v27 }
 0x779   :  { %v2966_v17 = vmul.f32 0.5, %v3955_v18  ;;  %3064 = vmatprep.subr.bf16.mxu0 %v6360_v4  ;;  %3105 = vmatprep.subr.bf16.mxu1 %v6366_v34  ;;  %v6746_v18 = vld [vmem:[%s6910_s4 + $0x4] ss:$16 sps:$4 sm:$0xff]  }
 0x77a   :  { %v3957_v58 = vpop.eup %3956  ;;  %3094 = vmatprep.mubr.bf16.mxu0 %v7209_v44  ;;  %3135 = vmatprep.mubr.bf16.mxu1 %v7209_v44 }
 0x77b   :  { %v2969_v21 = vadd.f32 0.5, %v2966_v17  ;;  %v2967_v29 = vmul.f32 0.5, %v3957_v58  ;;  %v3959_v51 = vpop.eup %3958  ;;  %v6752_v17 = vld [vmem:[%s6910_s4 + $0xc] ss:$16 sps:$4 sm:$0xff]  }
 0x77c   :  { %3065 = vmatpush1.bf16.msra.mxu0 %v6374_v23  ;;  %3106 = vmatpush1.bf16.msra.mxu1 %v6380_v57 }
 0x77d   :  { %v2970_v39 = vadd.f32 0.5, %v2967_v29  ;;  %v2974_v10 = vmul.f32 %v3959_v51, %v2969_v21  ;;  %3066 = vmatprep.subr.bf16.mxu0 %v6386_v50  ;;  %3107 = vmatprep.subr.bf16.mxu1 %v6392_v6  ;;  %v6758_v29 = vld [vmem:[%s6910_s4] ss:$16 sps:$4 sm:$0xff]   ;;  %v6764_v51 = vld [vmem:[%s6910_s4 + $0x8] ss:$16 sps:$4 sm:$0xff]  }
 0x77f   :  { %v2973_v61 = vmul.f32 %v2970_v39, %v6408_v43  ;;  %v3961_v43 = vpop.eup %3960  ;;  %v7591_v39 = vld [vmem:[#allocation67_spill] sm:$0xff] }
 0x780   :  { %3067 = vmatpush1.bf16.msra.mxu0 %v6399_v35  ;;  %3108 = vmatpush1.bf16.msra.mxu1 %v6405_v38  ;;  %v2968_v1 = vmul.f32 0.5, %v3961_v43  ;;  %v7594_v43 = vld [vmem:[#allocation11_spill] sm:$0xff] }
 0x781   :  { %v6694_v36 = vadd.f32 %v2974_v10, %v2973_v61  ;;  %3068 = vmatprep.subr.bf16.mxu0 %v6413_v8  ;;  %3109 = vmatprep.subr.bf16.mxu1 %v6419_v56  ;;  %v7592_v10 = vld [vmem:[#allocation65_spill] sm:$0xff]  ;;  %v7593_v61 = vld [vmem:[#allocation8_spill] sm:$0xff] }
 0x782   :  { %v2971_v46 = vadd.f32 0.5, %v2968_v1  ;;  %v7595_v1 = vld [vmem:[#allocation10_spill] sm:$0xff] }
 0x783   :  { %3962 = vtanh.f32 %v6694_v36 }
 0x784   :  { %3069 = vmatpush1.bf16.msra.mxu0 %v6426_v14  ;;  %3110 = vmatpush1.bf16.msra.mxu1 %v6432_v7 }
 0x785   :  { %3070 = vmatprep.subr.bf16.mxu0 %v6438_v11  ;;  %3111 = vmatprep.subr.bf16.mxu1 %v6444_v63 }
 0x788   :  { %3071 = vmatpush1.bf16.msra.mxu0 %v7571_v53  ;;  %3112 = vmatpush1.bf16.msra.mxu1 %v7572_v22 }
 0x789   :  { %3072 = vmatprep.subr.bf16.mxu0 %v6462_v37  ;;  %3113 = vmatprep.subr.bf16.mxu1 %v7573_v25 }
 0x78c   :  { %3073 = vmatpush1.bf16.msra.mxu0 %v6710_v24  ;;  %3114 = vmatpush1.bf16.msra.mxu1 %v6716_v32 }
 0x78d   :  { %3074 = vmatprep.subr.bf16.mxu0 %v6722_v59  ;;  %3115 = vmatprep.subr.bf16.mxu1 %v6728_v16 }
 0x790   :  { %v3963_v0 = vpop.eup %3962  ;;  %3075 = vmatpush1.bf16.msra.mxu0 %v6734_v12  ;;  %3116 = vmatpush1.bf16.msra.mxu1 %v6740_v49 }
 0x791   :  { %3076 = vmatprep.subr.bf16.mxu0 %v6746_v18  ;;  %3117 = vmatprep.subr.bf16.mxu1 %v6752_v17  ;;  %v2977_v58 = vmul.f32 %v3963_v0, %v2971_v46  ;;  %v7596_v46 = vld [vmem:[#allocation13_spill] sm:$0xff]  ;;  %v7597_v0 = vld [vmem:[#allocation12_spill] sm:$0xff] }
 0x793   :  { %v2978_v21 = vpack.c.bf16 %v2977_v58, %v2977_v58  ;;  %v7598_v58 = vld [vmem:[#allocation18_spill] sm:$0xff] }
 0x794   :  { %3077 = vmatpush1.bf16.msra.mxu0 %v6758_v29  ;;  %3118 = vmatpush1.bf16.msra.mxu1 %v6764_v51 }
 0x795   :  { %3174 = vmatprep.subr.bf16.mxu0 %v6044_v31  ;;  %3215 = vmatprep.subr.bf16.mxu1 %v6050_v47  ;;  %v7574_v31 = vld [vmem:[#allocation56_spill] sm:$0xff]  ;;  %v7575_v47 = vld [vmem:[#allocation57_spill] sm:$0xff] }
 0x797   :  { %3095 = vmatmul.mubr.bf16.vlgmr.msra.gmra.mxu0 %v2978_v21  ;;  %3136 = vmatmul.mubr.bf16.vlgmr.msra.gmra.mxu1 %v2978_v21 }
 0x798   :  { %3175 = vmatpush1.bf16.msra.mxu0 %v6058_v2  ;;  %3216 = vmatpush1.bf16.msra.mxu1 %v6064_v3  ;;  %v7576_v2 = vld [vmem:[#allocation58_spill] sm:$0xff]  ;;  %v7577_v3 = vld [vmem:[#allocation59_spill] sm:$0xff] }
 0x799   :  { %3176 = vmatprep.subr.bf16.mxu0 %v6070_v5  ;;  %3217 = vmatprep.subr.bf16.mxu1 %v6076_v9  ;;  %v7578_v5 = vld [vmem:[#allocation60_spill] sm:$0xff]  ;;  %v7579_v9 = vld [vmem:[#allocation61_spill] sm:$0xff] }
 0x79a   :  { %3206 = vmatprep.mubr.bf16.mxu0 %v7209_v44  ;;  %3247 = vmatprep.mubr.bf16.mxu1 %v7209_v44 }
 0x79c   :  { %3177 = vmatpush1.bf16.msra.mxu0 %v6084_v55  ;;  %3218 = vmatpush1.bf16.msra.mxu1 %v6090_v15  ;;  %v7580_v55 = vld [vmem:[#allocation62_spill] sm:$0xff]  ;;  %v7581_v15 = vld [vmem:[#allocation68_spill] sm:$0xff] }
 0x79d   :  { %3178 = vmatprep.subr.bf16.mxu0 %v6096_v41  ;;  %3219 = vmatprep.subr.bf16.mxu1 %v6102_v40  ;;  %v7582_v41 = vld [vmem:[#allocation70_spill] sm:$0xff]  ;;  %v7583_v40 = vld [vmem:[#allocation71_spill] sm:$0xff] }
 0x7a0   :  { %3179 = vmatpush1.bf16.msra.mxu0 %v6108_v48  ;;  %3220 = vmatpush1.bf16.msra.mxu1 %v6114_v62  ;;  %v7584_v48 = vld [vmem:[#allocation69_spill] sm:$0xff]  ;;  %v7585_v62 = vld [vmem:[#allocation72_spill] sm:$0xff] }
 0x7a1   :  { %3180 = vmatprep.subr.bf16.mxu0 %v6120_v30  ;;  %3221 = vmatprep.subr.bf16.mxu1 %v6126_v19  ;;  %v7586_v30 = vld [vmem:[#allocation74_spill] sm:$0xff]  ;;  %v7587_v19 = vld [vmem:[#allocation75_spill] sm:$0xff] }
 0x7a4   :  { %3181 = vmatpush1.bf16.msra.mxu0 %v6132_v26  ;;  %3222 = vmatpush1.bf16.msra.mxu1 %v6138_v42  ;;  %v7588_v26 = vld [vmem:[#allocation9_spill] sm:$0xff] }
 0x7a5   :  { %3182 = vmatprep.subr.bf16.mxu0 %v6144_v52  ;;  %3223 = vmatprep.subr.bf16.mxu1 %v7574_v31  ;;  %v7589_v42 = vld [vmem:[#allocation73_spill] sm:$0xff]  ;;  %v7590_v52 = vld [vmem:[#allocation66_spill] sm:$0xff] }
 0x7a6   :  { %v7600_v31 = vld [vmem:[#allocation21_spill] sm:$0xff] }
 0x7a8   :  { %3183 = vmatpush1.bf16.msra.mxu0 %v7575_v47  ;;  %3224 = vmatpush1.bf16.msra.mxu1 %v7576_v2  ;;  %v7601_v47 = vld [vmem:[#allocation14_spill] sm:$0xff]  ;;  %v7602_v2 = vld [vmem:[#allocation20_spill] sm:$0xff] }
 0x7a9   :  { %3184 = vmatprep.subr.bf16.mxu0 %v7577_v3  ;;  %3225 = vmatprep.subr.bf16.mxu1 %v7578_v5  ;;  %v7603_v3 = vld [vmem:[#allocation23_spill] sm:$0xff]  ;;  %v7604_v5 = vld [vmem:[#allocation22_spill] sm:$0xff] }
 0x7ac   :  { %3185 = vmatpush1.bf16.msra.mxu0 %v7579_v9  ;;  %3226 = vmatpush1.bf16.msra.mxu1 %v7580_v55  ;;  %v7605_v9 = vld [vmem:[#allocation25_spill] sm:$0xff]  ;;  %v7606_v55 = vld [vmem:[#allocation24_spill] sm:$0xff] }
 0x7ad   :  { %3186 = vmatprep.subr.bf16.mxu0 %v7581_v15  ;;  %3227 = vmatprep.subr.bf16.mxu1 %v7582_v41  ;;  %v7607_v15 = vld [vmem:[#allocation27_spill] sm:$0xff]  ;;  %v7608_v41 = vld [vmem:[#allocation26_spill] sm:$0xff] }
 0x7b0   :  { %3187 = vmatpush1.bf16.msra.mxu0 %v7583_v40  ;;  %3228 = vmatpush1.bf16.msra.mxu1 %v7584_v48  ;;  %v7609_v40 = vld [vmem:[#allocation29_spill] sm:$0xff]  ;;  %v7610_v48 = vld [vmem:[#allocation28_spill] sm:$0xff] }
 0x7b1   :  { %3188 = vmatprep.subr.bf16.mxu0 %v7585_v62  ;;  %3229 = vmatprep.subr.bf16.mxu1 %v7586_v30  ;;  %v7611_v62 = vld [vmem:[#allocation30_spill] sm:$0xff]  ;;  %v7612_v30 = vld [vmem:[#allocation31_spill] sm:$0xff] }
 0x7b4   :  { %3189 = vmatpush1.bf16.msra.mxu0 %v7587_v19  ;;  %3230 = vmatpush1.bf16.msra.mxu1 %v7588_v26  ;;  %v7613_v19 = vld [vmem:[#allocation32_spill] sm:$0xff]  ;;  %v7614_v26 = vld [vmem:[#allocation33_spill] sm:$0xff] }
 0x7b5   :  { %3280 = vmatprep.subr.bf16.mxu0 %v7589_v42  ;;  %3321 = vmatprep.subr.bf16.mxu1 %v7590_v52  ;;  %v7615_v42 = vld [vmem:[#allocation63_spill] sm:$0xff]  ;;  %v7616_v52 = vld [vmem:[#allocation34_spill] sm:$0xff] }
 0x7b7   :  { %3207 = vmatmul.mubr.bf16.vlgmr.msra.gmra.mxu0 %v2978_v21  ;;  %3248 = vmatmul.mubr.bf16.vlgmr.msra.gmra.mxu1 %v2978_v21  ;;  %v7599_v21 = vld [vmem:[#allocation15_spill] sm:$0xff] }
 0x7b8   :  { %3281 = vmatpush1.bf16.msra.mxu0 %v7591_v39  ;;  %3322 = vmatpush1.bf16.msra.mxu1 %v7592_v10  ;;  %v7617_v39 = vld [vmem:[#allocation64_spill] sm:$0xff]  ;;  %v7618_v10 = vld [vmem:[#allocation35_spill] sm:$0xff] }
 0x7b9   :  { %3282 = vmatprep.subr.bf16.mxu0 %v7593_v61  ;;  %3323 = vmatprep.subr.bf16.mxu1 %v7594_v43  ;;  %v7619_v61 = vld [vmem:[#allocation36_spill] sm:$0xff] }
 0x7ba   :  { %3312 = vmatprep.mubr.bf16.mxu0 %v7209_v44  ;;  %3353 = vmatprep.mubr.bf16.mxu1 %v7209_v44  ;;  %v7620_v43 = vld [vmem:[#allocation76_spill] sm:$0xff] }
 0x7bc   :  { %3283 = vmatpush1.bf16.msra.mxu0 %v7595_v1  ;;  %3324 = vmatpush1.bf16.msra.mxu1 %v7596_v46  ;;  %v7621_v1 = vld [vmem:[#allocation78_spill] sm:$0xff]  ;;  %v7622_v46 = vld [vmem:[#allocation79_spill] sm:$0xff] }
 0x7bd   :  { %3284 = vmatprep.subr.bf16.mxu0 %v7597_v0  ;;  %3325 = vmatprep.subr.bf16.mxu1 %v7598_v58 }
 0x7c0   :  { %3285 = vmatpush1.bf16.msra.mxu0 %v7599_v21  ;;  %3326 = vmatpush1.bf16.msra.mxu1 %v7600_v31 }
 0x7c1   :  { %3286 = vmatprep.subr.bf16.mxu0 %v7601_v47  ;;  %3327 = vmatprep.subr.bf16.mxu1 %v7602_v2 }
 0x7c4   :  { %3287 = vmatpush1.bf16.msra.mxu0 %v7603_v3  ;;  %3328 = vmatpush1.bf16.msra.mxu1 %v7604_v5 }
 0x7c5   :  { %3288 = vmatprep.subr.bf16.mxu0 %v7605_v9  ;;  %3329 = vmatprep.subr.bf16.mxu1 %v7606_v55 }
 0x7c8   :  { %3289 = vmatpush1.bf16.msra.mxu0 %v7607_v15  ;;  %3330 = vmatpush1.bf16.msra.mxu1 %v7608_v41 }
 0x7c9   :  { %3290 = vmatprep.subr.bf16.mxu0 %v7609_v40  ;;  %3331 = vmatprep.subr.bf16.mxu1 %v7610_v48 }
 0x7cc   :  { %3291 = vmatpush1.bf16.msra.mxu0 %v7611_v62  ;;  %3332 = vmatpush1.bf16.msra.mxu1 %v7612_v30 }
 0x7cd   :  { %3292 = vmatprep.subr.bf16.mxu0 %v7613_v19  ;;  %3333 = vmatprep.subr.bf16.mxu1 %v7614_v26 }
 0x7d0   :  { %3293 = vmatpush1.bf16.msra.mxu0 %v7615_v42  ;;  %3334 = vmatpush1.bf16.msra.mxu1 %v7616_v52 }
 0x7d1   :  { %3294 = vmatprep.subr.bf16.mxu0 %v7617_v39  ;;  %3335 = vmatprep.subr.bf16.mxu1 %v7618_v10 }
 0x7d4   :  { %3295 = vmatpush1.bf16.msra.mxu0 %v7619_v61  ;;  %3336 = vmatpush1.bf16.msra.mxu1 %v7620_v43 }
 0x7d5   :  { %3362 = vmatprep.subr.bf16.mxu0 %v7621_v1  ;;  %3403 = vmatprep.subr.bf16.mxu1 %v7622_v46 }
 0x837   :  { %v3014_v0 = vpop.f32.mrf.mxu0  ;;  %v3055_v58 = vpop.f32.mrf.mxu1 }
 0x839   :  { %v3016_v21 = vpop.f32.mrf.mxu0  ;;  %v3057_v31 = vpop.f32.mrf.mxu1 }
 0x83b   :  { %v3018_v47 = vpop.f32.mrf.mxu0  ;;  %v3059_v2 = vpop.f32.mrf.mxu1 }
 0x83d   :  { %v3019_v3 = vpop.f32.mrf.mxu0  ;;  %v3060_v5 = vpop.f32.mrf.mxu1 }
 0x857   :  { %v3096_v9 = vpop.f32.mrf.mxu0  ;;  %v3137_v55 = vpop.f32.mrf.mxu1 }
 0x858   :  { %v3097_v15 = vadd.f32 %v3096_v9, %v3014_v0  ;;  %v3138_v1 = vadd.f32 %v3137_v55, %v3055_v58 }
 0x859   :  { %v3098_v41 = vpop.f32.mrf.mxu0  ;;  %v3139_v40 = vpop.f32.mrf.mxu1 }
 0x85a   :  { %v3144_v48 = vadd.f32 %v3097_v15, %v5123_v13  ;;  %v3099_v62 = vadd.f32 %v3098_v41, %v3016_v21  ;;  %v3140_v52 = vadd.f32 %v3139_v40, %v3057_v31  ;;  %v3146_v46 = vadd.f32 %v3138_v1, %v5138_v33 }
 0x85b   :  { %v3100_v30 = vpop.f32.mrf.mxu0  ;;  %v3141_v19 = vpop.f32.mrf.mxu1 }
 0x85c   :  { %v3148_v26 = vmul.f32 0.5, %v3144_v48  ;;  %v3145_v42 = vadd.f32 %v3099_v62, %v5127_v28  ;;  %v3147_v43 = vadd.f32 %v3140_v52, %v5133_v20  ;;  %v3150_v0 = vmul.f32 0.5, %v3146_v46  ;;  %v7623_v48 = vld [vmem:[#allocation88_spill] sm:$0xff] }
 0x85d   :  { %v3101_v39 = vpop.f32.mrf.mxu0  ;;  %v3142_v10 = vpop.f32.mrf.mxu1 }
 0x85e   :  { %3964 = vtanh.f32 %v3148_v26  ;;  %v3149_v61 = vmul.f32 0.5, %v3145_v42  ;;  %v7624_v42 = vld [vmem:[#allocation90_spill] sm:$0xff] }
 0x860   :  { %3966 = vtanh.f32 %v3149_v61 }
 0x861   :  { %3968 = vtanh.f32 %v3147_v43 }
 0x862   :  { %3970 = vtanh.f32 %v3150_v0 }
 0x86b   :  { %v3965_v47 = vpop.eup %3964 }
 0x86c   :  { %v3154_v21 = vmul.f32 0.5, %v3965_v47 }
 0x86d   :  { %v3967_v2 = vpop.eup %3966 }
 0x86e   :  { %v3157_v3 = vadd.f32 0.5, %v3154_v21  ;;  %v3155_v5 = vmul.f32 0.5, %v3967_v2  ;;  %v3969_v31 = vpop.eup %3968 }
 0x86f   :  { %v3971_v39 = vpop.eup %3970 }
 0x870   :  { %v3158_v9 = vadd.f32 0.5, %v3155_v5  ;;  %v3162_v41 = vmul.f32 %v3969_v31, %v3157_v3  ;;  %v3156_v47 = vmul.f32 0.5, %v3971_v39  ;;  %v7626_v3 = vld [vmem:[#allocation89_spill] sm:$0xff] }
 0x872   :  { %v3161_v15 = vmul.f32 %v3158_v9, %v6671_v60  ;;  %v7625_v60 = vld [vmem:[#allocation91_spill] sm:$0xff]  ;;  %v3159_v21 = vadd.f32 0.5, %v3156_v47 }
 0x874   :  { %v6842_v40 = vadd.f32 %v3162_v41, %v3161_v15 }
 0x876   :  { %3972 = vtanh.f32 %v6842_v40 }
 0x877   :  { %v3208_v58 = vpop.f32.mrf.mxu0  ;;  %v3249_v55 = vpop.f32.mrf.mxu1 }
 0x878   :  { %v3256_v62 = vadd.f32 %v3208_v58, %v7623_v48  ;;  %v3258_v5 = vadd.f32 %v3249_v55, %v7626_v3 }
 0x879   :  { %v3210_v30 = vpop.f32.mrf.mxu0  ;;  %v3251_v19 = vpop.f32.mrf.mxu1 }
 0x87a   :  { %v3260_v26 = vmul.f32 0.5, %v3256_v62  ;;  %v3257_v52 = vadd.f32 %v3210_v30, %v7624_v42  ;;  %v3259_v1 = vadd.f32 %v3251_v19, %v7625_v60  ;;  %v3262_v41 = vmul.f32 0.5, %v3258_v5 }
 0x87b   :  { %v3212_v10 = vpop.f32.mrf.mxu0  ;;  %v3253_v61 = vpop.f32.mrf.mxu1 }
 0x87c   :  { %3974 = vtanh.f32 %v3260_v26  ;;  %v3261_v43 = vmul.f32 0.5, %v3257_v52 }
 0x87d   :  { %v3213_v46 = vpop.f32.mrf.mxu0  ;;  %v3254_v0 = vpop.f32.mrf.mxu1 }
 0x87e   :  { %3976 = vtanh.f32 %v3261_v43 }
 0x87f   :  { %3978 = vtanh.f32 %v3259_v1 }
 0x880   :  { %3980 = vtanh.f32 %v3262_v41 }
 0x883   :  { %v3973_v2 = vpop.eup %3972 }
 0x884   :  { %v3165_v9 = vmul.f32 %v3973_v2, %v3159_v21 }
 0x886   :  { %v6850_v31 = vadd.f32 %v3165_v9, %v6679_v45  ;;  %v3279_v15 = vpack.c.bf16 %v3165_v9, %v3165_v9 }
 0x888   :  { %3313 = vmatmul.mubr.bf16.vlgmr.msra.gmra.mxu0 %v3279_v15  ;;  %3354 = vmatmul.mubr.bf16.vlgmr.msra.gmra.mxu1 %v3279_v15 }
 0x889   :  { %v3975_v58 = vpop.eup %3974  ;;  %3363 = vmatpush1.bf16.msra.mxu0 %v6348_v54  ;;  %3404 = vmatpush1.bf16.msra.mxu1 %v6354_v27 }
 0x88a   :  { %v3266_v48 = vmul.f32 0.5, %v3975_v58  ;;  %3364 = vmatprep.subr.bf16.mxu0 %v6360_v4  ;;  %3405 = vmatprep.subr.bf16.mxu1 %v6366_v34 }
 0x88b   :  { %v3977_v62 = vpop.eup %3976  ;;  %3394 = vmatprep.mubr.bf16.mxu0 %v7209_v44  ;;  %3435 = vmatprep.mubr.bf16.mxu1 %v7209_v44 }
 0x88c   :  { %v3269_v45 = vadd.f32 0.5, %v3266_v48  ;;  %v3267_v55 = vmul.f32 0.5, %v3977_v62  ;;  %v3979_v30 = vpop.eup %3978 }
 0x88d   :  { %3365 = vmatpush1.bf16.msra.mxu0 %v6374_v23  ;;  %3406 = vmatpush1.bf16.msra.mxu1 %v6380_v57  ;;  %v3981_v34 = vpop.eup %3980 }
 0x88e   :  { %v3270_v54 = vadd.f32 0.5, %v3267_v55  ;;  %v3274_v27 = vmul.f32 %v3979_v30, %v3269_v45  ;;  %3366 = vmatprep.subr.bf16.mxu0 %v6386_v50  ;;  %3407 = vmatprep.subr.bf16.mxu1 %v6392_v6  ;;  %v3268_v23 = vmul.f32 0.5, %v3981_v34 }
 0x890   :  { %v3273_v4 = vmul.f32 %v3270_v54, %v6694_v36  ;;  %v3271_v57 = vadd.f32 0.5, %v3268_v23 }
 0x891   :  { %3367 = vmatpush1.bf16.msra.mxu0 %v6399_v35  ;;  %3408 = vmatpush1.bf16.msra.mxu1 %v6405_v38 }
 0x892   :  { %v3275_v44 = vadd.f32 %v3274_v27, %v3273_v4  ;;  %3368 = vmatprep.subr.bf16.mxu0 %v6413_v8  ;;  %3409 = vmatprep.subr.bf16.mxu1 %v6419_v56 }
 0x894   :  { %3982 = vtanh.f32 %v3275_v44  ;;  %3480 = vst [vmem:[%s6913_s9] sm:$0xff] %v3275_v44 }
 0x895   :  { %3369 = vmatpush1.bf16.msra.mxu0 %v6426_v14  ;;  %3410 = vmatpush1.bf16.msra.mxu1 %v6432_v7 }
 0x896   :  { %3370 = vmatprep.subr.bf16.mxu0 %v6438_v11  ;;  %3411 = vmatprep.subr.bf16.mxu1 %v6444_v63 }
 0x899   :  { %3371 = vmatpush1.bf16.msra.mxu0 %v7571_v53  ;;  %3412 = vmatpush1.bf16.msra.mxu1 %v7572_v22 }
 0x89a   :  { %3372 = vmatprep.subr.bf16.mxu0 %v6462_v37  ;;  %3413 = vmatprep.subr.bf16.mxu1 %v7573_v25 }
 0x89d   :  { %3373 = vmatpush1.bf16.msra.mxu0 %v6710_v24  ;;  %3414 = vmatpush1.bf16.msra.mxu1 %v6716_v32 }
 0x89e   :  { %3374 = vmatprep.subr.bf16.mxu0 %v6722_v59  ;;  %3415 = vmatprep.subr.bf16.mxu1 %v6728_v16 }
 0x8a1   :  { %v3983_v50 = vpop.eup %3982  ;;  %3375 = vmatpush1.bf16.msra.mxu0 %v6734_v12  ;;  %3416 = vmatpush1.bf16.msra.mxu1 %v6740_v49 }
 0x8a2   :  { %3376 = vmatprep.subr.bf16.mxu0 %v6746_v18  ;;  %3417 = vmatprep.subr.bf16.mxu1 %v6752_v17  ;;  %v3277_v6 = vmul.f32 %v3983_v50, %v3271_v57 }
 0x8a4   :  { %v3278_v35 = vpack.c.bf16 %v3277_v6, %v3277_v6  ;;  %3477 = vst [vmem:[%s6914_s8] sm:$0xff] %v3277_v6 }
 0x8a5   :  { %3377 = vmatpush1.bf16.msra.mxu0 %v6758_v29  ;;  %3418 = vmatpush1.bf16.msra.mxu1 %v6764_v51 }
 0x8a8   :  { %3395 = vmatmul.mubr.bf16.vlgmr.msra.gmra.mxu0 %v3278_v35  ;;  %3436 = vmatmul.mubr.bf16.vlgmr.msra.gmra.mxu1 %v3278_v35 }
 0x948   :  { %v3314_v38 = vpop.f32.mrf.mxu0  ;;  %v3355_v8 = vpop.f32.mrf.mxu1 }
 0x94a   :  { %v3316_v56 = vpop.f32.mrf.mxu0  ;;  %v3357_v14 = vpop.f32.mrf.mxu1 }
 0x94c   :  { %v3318_v7 = vpop.f32.mrf.mxu0  ;;  %v3359_v11 = vpop.f32.mrf.mxu1 }
 0x94e   :  { %v3319_v63 = vpop.f32.mrf.mxu0  ;;  %v3360_v37 = vpop.f32.mrf.mxu1 }
 0x968   :  { %v3396_v36 = vpop.f32.mrf.mxu0  ;;  %v3437_v53 = vpop.f32.mrf.mxu1 }
 0x969   :  { %v3397_v22 = vadd.f32 %v3396_v36, %v3314_v38  ;;  %v3438_v42 = vadd.f32 %v3437_v53, %v3355_v8 }
 0x96a   :  { %v3398_v25 = vpop.f32.mrf.mxu0  ;;  %v3439_v24 = vpop.f32.mrf.mxu1 }
 0x96b   :  { %v3444_v32 = vadd.f32 %v3397_v22, %v5123_v13  ;;  %v3399_v59 = vadd.f32 %v3398_v25, %v3316_v56  ;;  %v3440_v17 = vadd.f32 %v3439_v24, %v3357_v14  ;;  %v3446_v52 = vadd.f32 %v3438_v42, %v5138_v33 }
 0x96c   :  { %v3400_v16 = vpop.f32.mrf.mxu0  ;;  %v3441_v12 = vpop.f32.mrf.mxu1 }
 0x96d   :  { %v3448_v49 = vmul.f32 0.5, %v3444_v32  ;;  %v3445_v18 = vadd.f32 %v3399_v59, %v5127_v28  ;;  %v3447_v26 = vadd.f32 %v3440_v17, %v5133_v20  ;;  %v3450_v39 = vmul.f32 0.5, %v3446_v52 }
 0x96e   :  { %v3401_v29 = vpop.f32.mrf.mxu0  ;;  %v3442_v51 = vpop.f32.mrf.mxu1 }
 0x96f   :  { %3984 = vtanh.f32 %v3448_v49  ;;  %v3449_v19 = vmul.f32 0.5, %v3445_v18 }
 0x971   :  { %3986 = vtanh.f32 %v3449_v19 }
 0x972   :  { %3988 = vtanh.f32 %v3447_v26 }
 0x973   :  { %3990 = vtanh.f32 %v3450_v39 }
 0x97c   :  { %v3985_v13 = vpop.eup %3984 }
 0x97d   :  { %v3454_v10 = vmul.f32 0.5, %v3985_v13 }
 0x97e   :  { %v3987_v61 = vpop.eup %3986 }
 0x97f   :  { %v3457_v43 = vadd.f32 0.5, %v3454_v10  ;;  %v3455_v60 = vmul.f32 0.5, %v3987_v61  ;;  %v3989_v1 = vpop.eup %3988 }
 0x980   :  { %v3991_v20 = vpop.eup %3990 }
 0x981   :  { %v3458_v28 = vadd.f32 0.5, %v3455_v60  ;;  %v3462_v0 = vmul.f32 %v3989_v1, %v3457_v43  ;;  %v3456_v33 = vmul.f32 0.5, %v3991_v20 }
 0x983   :  { %v3461_v46 = vmul.f32 %v3458_v28, %v6842_v40  ;;  %v3459_v21 = vadd.f32 0.5, %v3456_v33 }
 0x985   :  { %v3463_v47 = vadd.f32 %v3462_v0, %v3461_v46 }
 0x987   :  { %3992 = vtanh.f32 %v3463_v47  ;;  %3635 = vst [vmem:[%s6913_s9 + $0x8] sm:$0xff] %v3463_v47 }
 0x994   :  { %v3993_v2 = vpop.eup %3992 }
 0x995   :  { %v3465_v3 = vmul.f32 %v3993_v2, %v3459_v21 }
 0x997   :  { %v3466_v5 = vadd.f32 %v3465_v3, %v6850_v31  ;;  %3634 = vst [vmem:[%s6914_s8 + $0x8] sm:$0xff] %v3465_v3 }
 0x999   :  { %v3475_v9 = vmul.f32 0.125, %v3466_v5 }
 0x99b   :  { %3476 = vst [vmem:[%s6915_s7] sm:$0xff] %v3475_v9 }

</bundles_post_ra>
